<compile_context>
chip_gen: v5e
topology: v5e:2x2
jax: 0.10.0
libtpu: 0.0.40
codegen_flags: <defaults>
</compile_context>

<pallas_src>
import functools

import jax
import jax.numpy as jnp
from jax.experimental import pallas as pl
from jax.experimental.pallas import tpu as pltpu


def _round_up(x, m):
    return (x + m - 1) // m * m


def _vmem_capacity_bytes():
    try:
        info = pltpu.get_tpu_info()
        cap = int(getattr(info, "vmem_capacity_bytes", 0))
        if cap > 0:
            return cap
    except Exception:
        pass
    return 64 * 1024 * 1024  # conservative (v7x per-TensorCore VMEM)


def _vmem_limit(est_bytes, cap_bytes):
    # Raise the scoped-VMEM limit above the 16/32 MiB default when needed,
    # leaving headroom for Mosaic-internal scratch and tile-granule rounding.
    return int(min(cap_bytes * 0.85,
                   max(32 * 1024 * 1024, est_bytes * 1.5 + (2 << 20))))


def _lstm_vmem_bytes(tc, bt, e, hp, wbytes):
    g = 4 * hp
    return (2 * tc * bt * e * wbytes        # embed in (double buffered)
            + 2 * bt * tc * hp * wbytes     # hseq out (double buffered)
            + 4 * 2 * bt * hp * 4           # h0/c0 in + h/c out (f32, dbl buf)
            + e * g * wbytes                # W_ih^T (Buffered(1))
            + hp * g * wbytes               # W_hh^T (Buffered(1))
            + 8 * g * 4                     # bias (sublane padded)
            + tc * bt * g * wbytes          # xw scratch (hoisted projection)
            + tc * bt * hp * 4              # f32 hseq staging scratch
            + 2 * bt * hp * 4)              # h/c carries


def _dense_vmem_bytes(tm, tv, hp, wbytes):
    return (2 * tm * hp * wbytes            # x block
            + 2 * hp * tv * wbytes          # W block
            + 2 * 8 * tv * 4                # bias block
            + 2 * tm * tv * 4)              # f32 out block


def _batch_tile_candidates(bp, want_two):
    cands = [bt for bt in range(8, min(bp, 256) + 1, 8) if bp % bt == 0]
    if want_two:
        two = [bt for bt in cands if bp // bt >= 2]
        if two:
            cands = two
    return sorted(cands, reverse=True)


def _fit_lstm_tiling(t, bp, e, hp, wbytes, budget):
    # Tc capped at 16 (8-16 already amortizes the ~0.35us/step grid overhead);
    # Tc == t (single chunk) is the fallback so the (Bt, Tc, Hp) output block
    # always satisfies the (8, 128) constraint (Tc % 8 == 0 or Tc == T).
    tc_cands = [c for c in (16, 8) if t % c == 0] or [t]
    bt_cands = _batch_tile_candidates(bp, want_two=bp >= 16)
    for bt in bt_cands:
        for tc in tc_cands:
            if _lstm_vmem_bytes(tc, bt, e, hp, wbytes) <= budget:
                return bt, tc
    return bt_cands[-1], tc_cands[-1]


def _fit_dense_tm(m, tv, hp, wbytes, budget):
    cap_tm = _round_up(m, 8)
    cands = [1024, 512, 256, 128, 64, 32, 16, 8]
    if cap_tm < 1024:
        cands = [cap_tm] + [c for c in cands if c < cap_tm]
    for tm in cands:
        if _dense_vmem_bytes(tm, tv, hp, wbytes) <= budget:
            return tm
    return 8


# ----------------------------------------------------------------------------
# Weight packing (one-time, outside the per-call path).
# ----------------------------------------------------------------------------
def _pad_gate_cols(w, h, hp):
    """w: (rows, 4h), PyTorch gate order [i,f,g,o] -> (rows, 4hp), each gate
    block zero-padded from h to hp columns (lane-aligned gate slices)."""
    if h == hp:
        return w
    parts = [jnp.pad(w[:, k * h:(k + 1) * h], ((0, 0), (0, hp - h)))
             for k in range(4)]
    return jnp.concatenate(parts, axis=1)


def pack_params(params, *, weight_dtype=jnp.bfloat16):
    emb = params["embedding"]                       # (V, E)
    w_ih, w_hh = params["w_ih"], params["w_hh"]     # (4H, E), (4H, H)
    b_all = params["b_ih"] + params["b_hh"]         # (4H,)
    w_dense, b_dense = params["w_dense"], params["b_dense"]  # (V, H), (V,)

    V, E = emb.shape
    H = w_hh.shape[1]
    Hp = _round_up(H, 128)
    Vp = _round_up(V, 512) if V >= 1024 else _round_up(V, 128)

    w_ih_t = _pad_gate_cols(w_ih.T, H, Hp).astype(weight_dtype)       # (E, 4Hp)
    w_hh_t = jnp.pad(_pad_gate_cols(w_hh.T, H, Hp),
                     ((0, Hp - H), (0, 0))).astype(weight_dtype)      # (Hp, 4Hp)
    bias = _pad_gate_cols(b_all.reshape(1, 4 * H), H, Hp).astype(jnp.float32)

    w_dense_t = jnp.pad(w_dense.T, ((0, Hp - H), (0, Vp - V))).astype(weight_dtype)
    b_dense_p = jnp.pad(b_dense, (0, Vp - V)).reshape(1, Vp).astype(jnp.float32)

    # TODO(synk): on v7x, fp8 for w_dense_t would halve W_dense streaming again.
    return {
        "embedding": emb.astype(weight_dtype),
        "w_ih_t": w_ih_t,
        "w_hh_t": w_hh_t,
        "bias": bias,
        "w_dense_t": w_dense_t,
        "b_dense": b_dense_p,
    }


# ----------------------------------------------------------------------------
# Kernel 1: LSTM recurrence.  grid = (batch tiles, T // Tc); Tc steps per call.
# ----------------------------------------------------------------------------
def _lstm_kernel(embed_ref, wih_ref, whh_ref, b_ref, h0_ref, c0_ref,
                 hseq_ref, h_out_ref, c_out_ref,
                 xw_sc, hstage_sc, h_sc, c_sc, *, chunk, hidden):
    s = pl.program_id(1)

    # Re-initialize the recurrent carry at the start of each batch tile.
    @pl.when(s == 0)
    def _():
        h_sc[...] = h0_ref[...]
        c_sc[...] = c0_ref[...]

    # Hoisted input projection (+bias): one batched MXU push for all `chunk`
    # timesteps, fully parallel.  Only h @ W_hh stays on the serial path.
    tc, bt, e = embed_ref.shape
    xw = jnp.dot(embed_ref[...].reshape(tc * bt, e), wih_ref[...],
                 preferred_element_type=jnp.float32) + b_ref[...]
    xw_sc[...] = xw.reshape(tc, bt, 4 * hidden).astype(xw_sc.dtype)

    whh = whh_ref[...]                           # (Hp, 4Hp), resident weight

    def step(i, carry):
        h_prev, c_prev = carry
        gates = xw_sc[i].astype(jnp.float32) + jnp.dot(
            h_prev.astype(whh.dtype), whh, preferred_element_type=jnp.float32)
        # PyTorch gate order: input, forget, cell(g), output (lane-aligned).
        i_g = jax.nn.sigmoid(gates[:, 0 * hidden:1 * hidden])
        f_g = jax.nn.sigmoid(gates[:, 1 * hidden:2 * hidden])
        g_g = jnp.tanh(gates[:, 2 * hidden:3 * hidden])
        o_g = jax.nn.sigmoid(gates[:, 3 * hidden:4 * hidden])
        c_new = f_g * c_prev + i_g * g_g
        h_new = o_g * jnp.tanh(c_new)
        # Batch-major staging (f32): avoids the (T,B,H) transpose outside.
        hstage_sc[:, pl.ds(i, 1), :] = h_new.reshape(bt, 1, hidden)
        return h_new, c_new

    h_fin, c_fin = jax.lax.fori_loop(0, chunk, step, (h_sc[...], c_sc[...]),
                                     unroll=True)
    h_sc[...] = h_fin
    c_sc[...] = c_fin

    # One contiguous (Bt, Tc, Hp) cast+store per chunk.
    hseq_ref[...] = hstage_sc[...].astype(hseq_ref.dtype)

    @pl.when(s == pl.num_programs(1) - 1)
    def _():
        h_out_ref[...] = h_fin.astype(h_out_ref.dtype)
        c_out_ref[...] = c_fin.astype(c_out_ref.dtype)


# ----------------------------------------------------------------------------
# Kernel 2: batched dense projection  (M, Hp) @ (Hp, Vp) + b  (tiled M x V).
# ----------------------------------------------------------------------------
def _dense_kernel(x_ref, w_ref, b_ref, o_ref):
    o_ref[...] = (jnp.dot(x_ref[...], w_ref[...],
                          preferred_element_type=jnp.float32)
                  + b_ref[...]).astype(o_ref.dtype)


def _dense_projection(x, w_t, b, *, budget, cap):
    """x: (M, Hp) weight_dtype, w_t: (Hp, Vp), b: (1, Vp) f32 -> (M, Vp) f32."""
    M, Hp = x.shape
    Vp = w_t.shape[1]
    x = x.astype(w_t.dtype)
    wbytes = w_t.dtype.itemsize

    tv = 512 if Vp % 512 == 0 else (256 if Vp % 256 == 0 else 128)
    tm = _fit_dense_tm(M, tv, Hp, wbytes, budget)
    Mp = _round_up(M, tm)
    if Mp != M:
        x = jnp.pad(x, ((0, Mp - M), (0, 0)))

    est = _dense_vmem_bytes(tm, tv, Hp, wbytes)
    out = pl.pallas_call(
        _dense_kernel,
        out_shape=jax.ShapeDtypeStruct((Mp, Vp), jnp.float32),
        grid_spec=pltpu.PrefetchScalarGridSpec(
            num_scalar_prefetch=0,
            grid=(Mp // tm, Vp // tv),
            in_specs=[
                pl.BlockSpec((tm, Hp), lambda i, j: (i, 0)),
                pl.BlockSpec((Hp, tv), lambda i, j: (0, j)),
                pl.BlockSpec((1, tv), lambda i, j: (0, j)),
            ],
            out_specs=pl.BlockSpec((tm, tv), lambda i, j: (i, j)),
        ),
        compiler_params=pltpu.CompilerParams(
            dimension_semantics=("parallel", "parallel"),
            vmem_limit_bytes=_vmem_limit(est, cap),
        ),
    )(x, w_t, b)
    # TODO(synk): for very large Hp (>=2048) add a K grid axis + f32 accumulator
    # so the (tm, Hp)/(Hp, tv) strips stay bounded and tm can stay large.
    return out[:M]


# ----------------------------------------------------------------------------
# Wrapper: RNNModule.forward
# ----------------------------------------------------------------------------
def rnn_module_forward(x_tokens, prev_state, packed):
    """x_tokens: int32 [B, T]; prev_state: (h0, c0) each [1, B, H];
    packed: output of pack_params().  Returns (logits [B,T,V], (h, c))."""
    emb_table = packed["embedding"]            # (V, E) weight_dtype
    w_ih_t = packed["w_ih_t"]                  # (E, 4Hp)
    w_hh_t = packed["w_hh_t"]                  # (Hp, 4Hp)
    bias = packed["bias"]                      # (1, 4Hp) f32
    w_dense_t = packed["w_dense_t"]            # (Hp, Vp)
    b_dense = packed["b_dense"]                # (1, Vp) f32

    weight_dtype = w_ih_t.dtype
    wbytes = weight_dtype.itemsize

    B, T = x_tokens.shape
    V, E = emb_table.shape
    Hp = w_hh_t.shape[0]
    H = prev_state[0].shape[-1]

    h0 = prev_state[0][0].astype(jnp.float32)  # (B, H)
    c0 = prev_state[1][0].astype(jnp.float32)

    cap = _vmem_capacity_bytes()
    budget = int(cap * 0.75)

    # --- batch padding / tiling (sublane alignment, >=2 tiles for 2-TC v7x).
    Bp = _round_up(B, 8)
    Bt, Tc = _fit_lstm_tiling(T, Bp, E, Hp, wbytes, budget)
    Bp = _round_up(Bp, Bt)

    # --- glue (plain XLA): gather directly in time-major order.
    # TODO(synk): fold the embedding gather into the kernel via scalar-prefetched
    # token ids + per-row DMA; kept as jnp.take glue here.
    embed_tm = jnp.take(emb_table, x_tokens.T, axis=0)         # (T, B, E)
    if Bp != B:
        embed_tm = jnp.pad(embed_tm, ((0, 0), (0, Bp - B), (0, 0)))
    h0 = jnp.pad(h0, ((0, Bp - B), (0, Hp - H)))               # (Bp, Hp)
    c0 = jnp.pad(c0, ((0, Bp - B), (0, Hp - H)))

    est = _lstm_vmem_bytes(Tc, Bt, E, Hp, wbytes)
    kernel = functools.partial(_lstm_kernel, chunk=Tc, hidden=Hp)

    hseq, h_last, c_last = pl.pallas_call(
        kernel,
        out_shape=(
            jax.ShapeDtypeStruct((Bp, T, Hp), weight_dtype),   # batch-major hseq
            jax.ShapeDtypeStruct((Bp, Hp), jnp.float32),       # final h
            jax.ShapeDtypeStruct((Bp, Hp), jnp.float32),       # final c
        ),
        grid_spec=pltpu.PrefetchScalarGridSpec(
            num_scalar_prefetch=0,
            grid=(Bp // Bt, T // Tc),
            in_specs=[
                # time-chunked embeddings, indexed by (batch tile, time chunk)
                pl.BlockSpec((Tc, Bt, E), lambda b, s: (s, b, 0)),
                # grid-invariant weights / bias: single-buffered
                pl.BlockSpec((E, 4 * Hp), lambda b, s: (0, 0),
                             pipeline_mode=pl.Buffered(1)),
                pl.BlockSpec((Hp, 4 * Hp), lambda b, s: (0, 0),
                             pipeline_mode=pl.Buffered(1)),
                pl.BlockSpec((1, 4 * Hp), lambda b, s: (0, 0),
                             pipeline_mode=pl.Buffered(1)),
                # initial state, per batch tile
                pl.BlockSpec((Bt, Hp), lambda b, s: (b, 0)),
                pl.BlockSpec((Bt, Hp), lambda b, s: (b, 0)),
            ],
            out_specs=[
                pl.BlockSpec((Bt, Tc, Hp), lambda b, s: (b, s, 0)),
                pl.BlockSpec((Bt, Hp), lambda b, s: (b, 0)),
                pl.BlockSpec((Bt, Hp), lambda b, s: (b, 0)),
            ],
            scratch_shapes=[
                pltpu.VMEM((Tc, Bt, 4 * Hp), weight_dtype),    # hoisted x@W_ih
                pltpu.VMEM((Bt, Tc, Hp), jnp.float32),         # hseq staging
                pltpu.VMEM((Bt, Hp), jnp.float32),             # h carry
                pltpu.VMEM((Bt, Hp), jnp.float32),             # c carry
            ],
        ),
        compiler_params=pltpu.CompilerParams(
            dimension_semantics=("parallel", "arbitrary"),     # batch ||, time seq
            vmem_limit_bytes=_vmem_limit(est, cap),
        ),
    )(embed_tm, w_ih_t, w_hh_t, bias, h0, c0)

    # --- hoisted vocab projection: hseq is already batch-major, no transpose.
    h_bm = hseq[:B].reshape(B * T, Hp)
    logits = _dense_projection(h_bm, w_dense_t, b_dense, budget=budget, cap=cap)
    logits = logits[:, :V].reshape(B, T, V)

    return logits, (h_last[:B, :H][None], c_last[:B, :H][None])


# ----------------------------------------------------------------------------
# Pure-JAX reference mirroring PyTorch semantics.
# ----------------------------------------------------------------------------
def _reference_forward(x_tokens, prev_state, params):
    emb = jnp.take(params["embedding"], x_tokens, axis=0)   # (B, T, E)
    H = params["w_hh"].shape[1]
    h = prev_state[0][0]
    c = prev_state[1][0]
    w_ih, w_hh = params["w_ih"], params["w_hh"]
    b = params["b_ih"] + params["b_hh"]
    outs = []
    for t in range(x_tokens.shape[1]):
        g = emb[:, t] @ w_ih.T + h @ w_hh.T + b
        i_g = jax.nn.sigmoid(g[:, 0:H])
        f_g = jax.nn.sigmoid(g[:, H:2 * H])
        g_g = jnp.tanh(g[:, 2 * H:3 * H])
        o_g = jax.nn.sigmoid(g[:, 3 * H:4 * H])
        c = f_g * c + i_g * g_g
        h = o_g * jnp.tanh(c)
        outs.append(h)
    out = jnp.stack(outs, axis=1)                            # (B, T, H)
    logits = out @ params["w_dense"].T + params["b_dense"]
    return logits, (h[None], c[None])


def init_params(key, n_vocab, embedding_size, lstm_size):
    ks = jax.random.split(key, 7)
    s_lstm = 1.0 / jnp.sqrt(lstm_size)
    return {
        "embedding": jax.random.normal(ks[0], (n_vocab, embedding_size), jnp.float32),
        "w_ih": jax.random.uniform(ks[1], (4 * lstm_size, embedding_size), jnp.float32,
                                   -s_lstm, s_lstm),
        "w_hh": jax.random.uniform(ks[2], (4 * lstm_size, lstm_size), jnp.float32,
                                   -s_lstm, s_lstm),
        "b_ih": jax.random.uniform(ks[3], (4 * lstm_size,), jnp.float32, -s_lstm, s_lstm),
        "b_hh": jax.random.uniform(ks[4], (4 * lstm_size,), jnp.float32, -s_lstm, s_lstm),
        "w_dense": jax.random.uniform(ks[5], (n_vocab, lstm_size), jnp.float32,
                                      -s_lstm, s_lstm),
        "b_dense": jax.random.uniform(ks[6], (n_vocab,), jnp.float32, -s_lstm, s_lstm),
    }


if __name__ == "__main__":
    n_vocab, seq_size, embedding_size, lstm_size = 64, 8, 32, 32
    batch = 2

    key = jax.random.PRNGKey(0)
    k_param, k_tok = jax.random.split(key)
    params = init_params(k_param, n_vocab, embedding_size, lstm_size)

    x = jax.random.randint(k_tok, (batch, seq_size), 0, n_vocab, dtype=jnp.int32)
    zero_state = (jnp.zeros((1, batch, lstm_size), jnp.float32),
                  jnp.zeros((1, batch, lstm_size), jnp.float32))

    ref_logits, (ref_h, ref_c) = _reference_forward(x, zero_state, params)

    fwd = jax.jit(rnn_module_forward)

    # f32 weight path: tight check against the pure-JAX reference.
    packed_f32 = pack_params(params, weight_dtype=jnp.float32)
    logits, (h, c) = fwd(x, zero_state, packed_f32)
    jax.block_until_ready((logits, h, c))
    assert logits.shape == (batch, seq_size, n_vocab)
    assert h.shape == (1, batch, lstm_size) and c.shape == (1, batch, lstm_size)
    assert jnp.allclose(logits, ref_logits, atol=2e-3, rtol=2e-3)
    assert jnp.allclose(h, ref_h, atol=2e-3, rtol=2e-3)
    assert jnp.allclose(c, ref_c, atol=2e-3, rtol=2e-3)

    # bf16 weight path (production default): relaxed tolerance.
    packed_bf16 = pack_params(params)
    logits_b, (h_b, c_b) = fwd(x, zero_state, packed_bf16)
    jax.block_until_ready((logits_b, h_b, c_b))
    assert jnp.allclose(logits_b, ref_logits, atol=8e-2, rtol=8e-2)
    assert jnp.allclose(h_b, ref_h, atol=8e-2, rtol=8e-2)
    assert jnp.allclose(c_b, ref_c, atol=8e-2, rtol=8e-2)

    print("KERNEL_OK")
</pallas_src>

<mosaic_0001>
module attributes {stable_mosaic.version = 11 : i64} {
  func.func @_dense_kernel(%arg0: i32, %arg1: i32, %arg2: memref<16x128xf32, #tpu.memory_space<vmem>>, %arg3: memref<128x128xf32, #tpu.memory_space<vmem>>, %arg4: memref<1x128xf32, #tpu.memory_space<vmem>>, %arg5: memref<16x128xf32, #tpu.memory_space<vmem>>) attributes {dimension_semantics = [#tpu.dimension_semantics<parallel>, #tpu.dimension_semantics<parallel>], iteration_bounds = array<i64: 1, 1>, scalar_prefetch = 0 : i64, scratch_operands = 0 : i64, tpu.core_type = #tpu.core_type<tc>, window_params = [{transform_indices = @transform_0, window_bounds = array<i64: 16, 128>}, {transform_indices = @transform_1, window_bounds = array<i64: 128, 128>}, {transform_indices = @transform_2, window_bounds = array<i64: 1, 128>}, {transform_indices = @transform_3, window_bounds = array<i64: 16, 128>}]} {
    %c0 = arith.constant 0 : index
    %c0_0 = arith.constant 0 : index
    %0 = vector.load %arg2[%c0, %c0_0] : memref<16x128xf32, #tpu.memory_space<vmem>>, vector<16x128xf32>
    %c0_1 = arith.constant 0 : index
    %c0_2 = arith.constant 0 : index
    %1 = vector.load %arg3[%c0_1, %c0_2] : memref<128x128xf32, #tpu.memory_space<vmem>>, vector<128x128xf32>
    %cst = arith.constant dense<0.000000e+00> : vector<16x128xf32>
    %2 = tpu.matmul %0, %1, %cst {dimension_numbers = #tpu.dot_dimension_numbers<[1], [0], [0], [1], [0, 0, 1, 1], [], []>} : vector<16x128xf32>, vector<128x128xf32>, vector<16x128xf32> -> vector<16x128xf32>
    %c0_3 = arith.constant 0 : index
    %c0_4 = arith.constant 0 : index
    %3 = vector.load %arg4[%c0_3, %c0_4] : memref<1x128xf32, #tpu.memory_space<vmem>>, vector<1x128xf32>
    %4 = vector.broadcast %3 : vector<1x128xf32> to vector<16x128xf32>
    %5 = arith.addf %2, %4 : vector<16x128xf32>
    %c0_5 = arith.constant 0 : index
    %c0_6 = arith.constant 0 : index
    %6 = vector.load %arg5[%c0_5, %c0_6] : memref<16x128xf32, #tpu.memory_space<vmem>>, vector<16x128xf32>
    tpu.vector_store %arg5[%c0_5, %c0_6], %5 {strides = array<i32>} : memref<16x128xf32, #tpu.memory_space<vmem>>, vector<16x128xf32>,
    return
  }
  func.func @transform_0(%arg0: i32, %arg1: i32) -> (i32, i32) {
    %c0_i32 = arith.constant 0 : i32
    %c0_i32_0 = arith.constant 0 : i32
    return %arg0, %c0_i32 : i32, i32
  }
  func.func @transform_1(%arg0: i32, %arg1: i32) -> (i32, i32) {
    %c0_i32 = arith.constant 0 : i32
    %c0_i32_0 = arith.constant 0 : i32
    return %c0_i32, %arg1 : i32, i32
  }
  func.func @transform_2(%arg0: i32, %arg1: i32) -> (i32, i32) {
    %c0_i32 = arith.constant 0 : i32
    %c0_i32_0 = arith.constant 0 : i32
    return %c0_i32, %arg1 : i32, i32
  }
  func.func @transform_3(%arg0: i32, %arg1: i32) -> (i32, i32) {
    %c0_i32 = arith.constant 0 : i32
    return %arg0, %arg1 : i32, i32
  }
}

module attributes {stable_mosaic.version = 11 : i64} {
  func.func @_lstm_kernel(%arg0: i32, %arg1: i32, %arg2: memref<8x8x32xf32, #tpu.memory_space<vmem>>, %arg3: memref<32x512xf32, #tpu.memory_space<vmem>>, %arg4: memref<128x512xf32, #tpu.memory_space<vmem>>, %arg5: memref<1x512xf32, #tpu.memory_space<vmem>>, %arg6: memref<8x128xf32, #tpu.memory_space<vmem>>, %arg7: memref<8x128xf32, #tpu.memory_space<vmem>>, %arg8: memref<8x8x128xf32, #tpu.memory_space<vmem>>, %arg9: memref<8x128xf32, #tpu.memory_space<vmem>>, %arg10: memref<8x128xf32, #tpu.memory_space<vmem>>, %arg11: memref<8x8x512xf32, #tpu.memory_space<vmem>>, %arg12: memref<8x8x128xf32, #tpu.memory_space<vmem>>, %arg13: memref<8x128xf32, #tpu.memory_space<vmem>>, %arg14: memref<8x128xf32, #tpu.memory_space<vmem>>) attributes {dimension_semantics = [#tpu.dimension_semantics<parallel>, #tpu.dimension_semantics<arbitrary>], iteration_bounds = array<i64: 1, 1>, scalar_prefetch = 0 : i64, scratch_operands = 4 : i64, tpu.core_type = #tpu.core_type<tc>, window_params = [{transform_indices = @transform_0, window_bounds = array<i64: 8, 8, 32>}, {pipeline_mode = #tpu.pipeline_mode<synchronous>, transform_indices = @transform_1, window_bounds = array<i64: 32, 512>}, {pipeline_mode = #tpu.pipeline_mode<synchronous>, transform_indices = @transform_2, window_bounds = array<i64: 128, 512>}, {pipeline_mode = #tpu.pipeline_mode<synchronous>, transform_indices = @transform_3, window_bounds = array<i64: 1, 512>}, {transform_indices = @transform_4, window_bounds = array<i64: 8, 128>}, {transform_indices = @transform_5, window_bounds = array<i64: 8, 128>}, {transform_indices = @transform_6, window_bounds = array<i64: 8, 8, 128>}, {transform_indices = @transform_7, window_bounds = array<i64: 8, 128>}, {transform_indices = @transform_8, window_bounds = array<i64: 8, 128>}]} {
    %c0_i32 = arith.constant 0 : i32
    %0 = arith.cmpi eq, %arg1, %c0_i32 : i32
    %1 = arith.extui %0 : i1 to i32
    %c0_i32_0 = arith.constant 0 : i32
    %2 = arith.cmpi ne, %1, %c0_i32_0 : i32
    scf.if %2 {
      %c0_93 = arith.constant 0 : index
      %c0_94 = arith.constant 0 : index
      %286 = vector.load %arg6[%c0_93, %c0_94] : memref<8x128xf32, #tpu.memory_space<vmem>>, vector<8x128xf32>
      %c0_95 = arith.constant 0 : index
      %c0_96 = arith.constant 0 : index
      %287 = vector.load %arg13[%c0_95, %c0_96] : memref<8x128xf32, #tpu.memory_space<vmem>>, vector<8x128xf32>
      tpu.vector_store %arg13[%c0_95, %c0_96], %286 {strides = array<i32>} : memref<8x128xf32, #tpu.memory_space<vmem>>, vector<8x128xf32>,
      %c0_97 = arith.constant 0 : index
      %c0_98 = arith.constant 0 : index
      %288 = vector.load %arg7[%c0_97, %c0_98] : memref<8x128xf32, #tpu.memory_space<vmem>>, vector<8x128xf32>
      %c0_99 = arith.constant 0 : index
      %c0_100 = arith.constant 0 : index
      %289 = vector.load %arg14[%c0_99, %c0_100] : memref<8x128xf32, #tpu.memory_space<vmem>>, vector<8x128xf32>
      tpu.vector_store %arg14[%c0_99, %c0_100], %288 {strides = array<i32>} : memref<8x128xf32, #tpu.memory_space<vmem>>, vector<8x128xf32>,
    } else {
    }
    %c0 = arith.constant 0 : index
    %c0_1 = arith.constant 0 : index
    %c0_2 = arith.constant 0 : index
    %3 = vector.load %arg2[%c0, %c0_1, %c0_2] : memref<8x8x32xf32, #tpu.memory_space<vmem>>, vector<8x8x32xf32>
    %4 = vector.shape_cast %3 : vector<8x8x32xf32> to vector<64x32xf32>
    %c0_3 = arith.constant 0 : index
    %c0_4 = arith.constant 0 : index
    %5 = vector.load %arg3[%c0_3, %c0_4] : memref<32x512xf32, #tpu.memory_space<vmem>>, vector<32x512xf32>
    %cst = arith.constant dense<0.000000e+00> : vector<64x512xf32>
    %6 = tpu.matmul %4, %5, %cst {dimension_numbers = #tpu.dot_dimension_numbers<[1], [0], [0], [1], [0, 0, 1, 1], [], []>} : vector<64x32xf32>, vector<32x512xf32>, vector<64x512xf32> -> vector<64x512xf32>
    %c0_5 = arith.constant 0 : index
    %c0_6 = arith.constant 0 : index
    %7 = vector.load %arg5[%c0_5, %c0_6] : memref<1x512xf32, #tpu.memory_space<vmem>>, vector<1x512xf32>
    %8 = vector.broadcast %7 : vector<1x512xf32> to vector<64x512xf32>
    %9 = arith.addf %6, %8 : vector<64x512xf32>
    %10 = vector.shape_cast %9 : vector<64x512xf32> to vector<8x8x512xf32>
    %c0_7 = arith.constant 0 : index
    %c0_8 = arith.constant 0 : index
    %c0_9 = arith.constant 0 : index
    %11 = vector.load %arg11[%c0_7, %c0_8, %c0_9] : memref<8x8x512xf32, #tpu.memory_space<vmem>>, vector<8x8x512xf32>
    tpu.vector_store %arg11[%c0_7, %c0_8, %c0_9], %10 {strides = array<i32>} : memref<8x8x512xf32, #tpu.memory_space<vmem>>, vector<8x8x512xf32>,
    %c0_10 = arith.constant 0 : index
    %c0_11 = arith.constant 0 : index
    %12 = vector.load %arg4[%c0_10, %c0_11] : memref<128x512xf32, #tpu.memory_space<vmem>>, vector<128x512xf32>
    %c0_12 = arith.constant 0 : index
    %c0_13 = arith.constant 0 : index
    %13 = vector.load %arg13[%c0_12, %c0_13] : memref<8x128xf32, #tpu.memory_space<vmem>>, vector<8x128xf32>
    %c0_14 = arith.constant 0 : index
    %c0_15 = arith.constant 0 : index
    %14 = vector.load %arg14[%c0_14, %c0_15] : memref<8x128xf32, #tpu.memory_space<vmem>>, vector<8x128xf32>
    %c0_i32_16 = arith.constant 0 : i32
    %15 = arith.index_cast %c0_i32_16 : i32 to index
    %c0_17 = arith.constant 0 : index
    %c0_18 = arith.constant 0 : index
    %16 = vector.load %arg11[%15, %c0_17, %c0_18] : memref<8x8x512xf32, #tpu.memory_space<vmem>>, vector<1x8x512xf32>
    %17 = vector.shape_cast %16 : vector<1x8x512xf32> to vector<8x512xf32>
    %cst_19 = arith.constant dense<0.000000e+00> : vector<8x512xf32>
    %18 = tpu.matmul %13, %12, %cst_19 {dimension_numbers = #tpu.dot_dimension_numbers<[1], [0], [0], [1], [0, 0, 1, 1], [], []>} : vector<8x128xf32>, vector<128x512xf32>, vector<8x512xf32> -> vector<8x512xf32>
    %19 = arith.addf %17, %18 : vector<8x512xf32>
    %20 = vector.extract_strided_slice %19 {offsets = [0, 0], sizes = [8, 128], strides = [1, 1]} : vector<8x512xf32> to vector<8x128xf32>
    %21 = arith.negf %20 : vector<8x128xf32>
    %22 = math.exp %21 : vector<8x128xf32>
    %cst_20 = arith.constant 1.000000e+00 : f32
    %23 = vector.broadcast %cst_20 : f32 to vector<8x128xf32>
    %24 = arith.addf %23, %22 : vector<8x128xf32>
    %25 = arith.divf %23, %24 : vector<8x128xf32>
    %26 = vector.extract_strided_slice %19 {offsets = [0, 128], sizes = [8, 128], strides = [1, 1]} : vector<8x512xf32> to vector<8x128xf32>
    %27 = arith.negf %26 : vector<8x128xf32>
    %28 = math.exp %27 : vector<8x128xf32>
    %cst_21 = arith.constant 1.000000e+00 : f32
    %29 = vector.broadcast %cst_21 : f32 to vector<8x128xf32>
    %30 = arith.addf %29, %28 : vector<8x128xf32>
    %31 = arith.divf %29, %30 : vector<8x128xf32>
    %32 = vector.extract_strided_slice %19 {offsets = [0, 256], sizes = [8, 128], strides = [1, 1]} : vector<8x512xf32> to vector<8x128xf32>
    %33 = math.tanh %32 : vector<8x128xf32>
    %34 = vector.extract_strided_slice %19 {offsets = [0, 384], sizes = [8, 128], strides = [1, 1]} : vector<8x512xf32> to vector<8x128xf32>
    %35 = arith.negf %34 : vector<8x128xf32>
    %36 = math.exp %35 : vector<8x128xf32>
    %cst_22 = arith.constant 1.000000e+00 : f32
    %37 = vector.broadcast %cst_22 : f32 to vector<8x128xf32>
    %38 = arith.addf %37, %36 : vector<8x128xf32>
    %39 = arith.divf %37, %38 : vector<8x128xf32>
    %40 = arith.mulf %31, %14 : vector<8x128xf32>
    %41 = arith.mulf %25, %33 : vector<8x128xf32>
    %42 = arith.addf %40, %41 : vector<8x128xf32>
    %43 = math.tanh %42 : vector<8x128xf32>
    %44 = arith.mulf %39, %43 : vector<8x128xf32>
    %45 = vector.shape_cast %44 : vector<8x128xf32> to vector<8x1x128xf32>
    %c0_23 = arith.constant 0 : index
    %46 = arith.index_cast %c0_i32_16 : i32 to index
    %c0_24 = arith.constant 0 : index
    %47 = vector.load %arg12[%c0_23, %46, %c0_24] : memref<8x8x128xf32, #tpu.memory_space<vmem>>, vector<8x1x128xf32>
    tpu.vector_store %arg12[%c0_23, %46, %c0_24], %45 {strides = array<i32>} : memref<8x8x128xf32, #tpu.memory_space<vmem>>, vector<8x1x128xf32>,
    %c1_i32 = arith.constant 1 : i32
    %48 = arith.index_cast %c1_i32 : i32 to index
    %c0_25 = arith.constant 0 : index
    %c0_26 = arith.constant 0 : index
    %49 = vector.load %arg11[%48, %c0_25, %c0_26] : memref<8x8x512xf32, #tpu.memory_space<vmem>>, vector<1x8x512xf32>
    %50 = vector.shape_cast %49 : vector<1x8x512xf32> to vector<8x512xf32>
    %cst_27 = arith.constant dense<0.000000e+00> : vector<8x512xf32>
    %51 = tpu.matmul %44, %12, %cst_27 {dimension_numbers = #tpu.dot_dimension_numbers<[1], [0], [0], [1], [0, 0, 1, 1], [], []>} : vector<8x128xf32>, vector<128x512xf32>, vector<8x512xf32> -> vector<8x512xf32>
    %52 = arith.addf %50, %51 : vector<8x512xf32>
    %53 = vector.extract_strided_slice %52 {offsets = [0, 0], sizes = [8, 128], strides = [1, 1]} : vector<8x512xf32> to vector<8x128xf32>
    %54 = arith.negf %53 : vector<8x128xf32>
    %55 = math.exp %54 : vector<8x128xf32>
    %cst_28 = arith.constant 1.000000e+00 : f32
    %56 = vector.broadcast %cst_28 : f32 to vector<8x128xf32>
    %57 = arith.addf %56, %55 : vector<8x128xf32>
    %58 = arith.divf %56, %57 : vector<8x128xf32>
    %59 = vector.extract_strided_slice %52 {offsets = [0, 128], sizes = [8, 128], strides = [1, 1]} : vector<8x512xf32> to vector<8x128xf32>
    %60 = arith.negf %59 : vector<8x128xf32>
    %61 = math.exp %60 : vector<8x128xf32>
    %cst_29 = arith.constant 1.000000e+00 : f32
    %62 = vector.broadcast %cst_29 : f32 to vector<8x128xf32>
    %63 = arith.addf %62, %61 : vector<8x128xf32>
    %64 = arith.divf %62, %63 : vector<8x128xf32>
    %65 = vector.extract_strided_slice %52 {offsets = [0, 256], sizes = [8, 128], strides = [1, 1]} : vector<8x512xf32> to vector<8x128xf32>
    %66 = math.tanh %65 : vector<8x128xf32>
    %67 = vector.extract_strided_slice %52 {offsets = [0, 384], sizes = [8, 128], strides = [1, 1]} : vector<8x512xf32> to vector<8x128xf32>
    %68 = arith.negf %67 : vector<8x128xf32>
    %69 = math.exp %68 : vector<8x128xf32>
    %cst_30 = arith.constant 1.000000e+00 : f32
    %70 = vector.broadcast %cst_30 : f32 to vector<8x128xf32>
    %71 = arith.addf %70, %69 : vector<8x128xf32>
    %72 = arith.divf %70, %71 : vector<8x128xf32>
    %73 = arith.mulf %64, %42 : vector<8x128xf32>
    %74 = arith.mulf %58, %66 : vector<8x128xf32>
    %75 = arith.addf %73, %74 : vector<8x128xf32>
    %76 = math.tanh %75 : vector<8x128xf32>
    %77 = arith.mulf %72, %76 : vector<8x128xf32>
    %78 = vector.shape_cast %77 : vector<8x128xf32> to vector<8x1x128xf32>
    %c0_31 = arith.constant 0 : index
    %79 = arith.index_cast %c1_i32 : i32 to index
    %c0_32 = arith.constant 0 : index
    %80 = vector.load %arg12[%c0_31, %79, %c0_32] : memref<8x8x128xf32, #tpu.memory_space<vmem>>, vector<8x1x128xf32>
    tpu.vector_store %arg12[%c0_31, %79, %c0_32], %78 {strides = array<i32>} : memref<8x8x128xf32, #tpu.memory_space<vmem>>, vector<8x1x128xf32>,
    %c2_i32 = arith.constant 2 : i32
    %81 = arith.index_cast %c2_i32 : i32 to index
    %c0_33 = arith.constant 0 : index
    %c0_34 = arith.constant 0 : index
    %82 = vector.load %arg11[%81, %c0_33, %c0_34] : memref<8x8x512xf32, #tpu.memory_space<vmem>>, vector<1x8x512xf32>
    %83 = vector.shape_cast %82 : vector<1x8x512xf32> to vector<8x512xf32>
    %cst_35 = arith.constant dense<0.000000e+00> : vector<8x512xf32>
    %84 = tpu.matmul %77, %12, %cst_35 {dimension_numbers = #tpu.dot_dimension_numbers<[1], [0], [0], [1], [0, 0, 1, 1], [], []>} : vector<8x128xf32>, vector<128x512xf32>, vector<8x512xf32> -> vector<8x512xf32>
    %85 = arith.addf %83, %84 : vector<8x512xf32>
    %86 = vector.extract_strided_slice %85 {offsets = [0, 0], sizes = [8, 128], strides = [1, 1]} : vector<8x512xf32> to vector<8x128xf32>
    %87 = arith.negf %86 : vector<8x128xf32>
    %88 = math.exp %87 : vector<8x128xf32>
    %cst_36 = arith.constant 1.000000e+00 : f32
    %89 = vector.broadcast %cst_36 : f32 to vector<8x128xf32>
    %90 = arith.addf %89, %88 : vector<8x128xf32>
    %91 = arith.divf %89, %90 : vector<8x128xf32>
    %92 = vector.extract_strided_slice %85 {offsets = [0, 128], sizes = [8, 128], strides = [1, 1]} : vector<8x512xf32> to vector<8x128xf32>
    %93 = arith.negf %92 : vector<8x128xf32>
    %94 = math.exp %93 : vector<8x128xf32>
    %cst_37 = arith.constant 1.000000e+00 : f32
    %95 = vector.broadcast %cst_37 : f32 to vector<8x128xf32>
    %96 = arith.addf %95, %94 : vector<8x128xf32>
    %97 = arith.divf %95, %96 : vector<8x128xf32>
    %98 = vector.extract_strided_slice %85 {offsets = [0, 256], sizes = [8, 128], strides = [1, 1]} : vector<8x512xf32> to vector<8x128xf32>
    %99 = math.tanh %98 : vector<8x128xf32>
    %100 = vector.extract_strided_slice %85 {offsets = [0, 384], sizes = [8, 128], strides = [1, 1]} : vector<8x512xf32> to vector<8x128xf32>
    %101 = arith.negf %100 : vector<8x128xf32>
    %102 = math.exp %101 : vector<8x128xf32>
    %cst_38 = arith.constant 1.000000e+00 : f32
    %103 = vector.broadcast %cst_38 : f32 to vector<8x128xf32>
    %104 = arith.addf %103, %102 : vector<8x128xf32>
    %105 = arith.divf %103, %104 : vector<8x128xf32>
    %106 = arith.mulf %97, %75 : vector<8x128xf32>
    %107 = arith.mulf %91, %99 : vector<8x128xf32>
    %108 = arith.addf %106, %107 : vector<8x128xf32>
    %109 = math.tanh %108 : vector<8x128xf32>
    %110 = arith.mulf %105, %109 : vector<8x128xf32>
    %111 = vector.shape_cast %110 : vector<8x128xf32> to vector<8x1x128xf32>
    %c0_39 = arith.constant 0 : index
    %112 = arith.index_cast %c2_i32 : i32 to index
    %c0_40 = arith.constant 0 : index
    %113 = vector.load %arg12[%c0_39, %112, %c0_40] : memref<8x8x128xf32, #tpu.memory_space<vmem>>, vector<8x1x128xf32>
    tpu.vector_store %arg12[%c0_39, %112, %c0_40], %111 {strides = array<i32>} : memref<8x8x128xf32, #tpu.memory_space<vmem>>, vector<8x1x128xf32>,
    %c3_i32 = arith.constant 3 : i32
    %114 = arith.index_cast %c3_i32 : i32 to index
    %c0_41 = arith.constant 0 : index
    %c0_42 = arith.constant 0 : index
    %115 = vector.load %arg11[%114, %c0_41, %c0_42] : memref<8x8x512xf32, #tpu.memory_space<vmem>>, vector<1x8x512xf32>
    %116 = vector.shape_cast %115 : vector<1x8x512xf32> to vector<8x512xf32>
    %cst_43 = arith.constant dense<0.000000e+00> : vector<8x512xf32>
    %117 = tpu.matmul %110, %12, %cst_43 {dimension_numbers = #tpu.dot_dimension_numbers<[1], [0], [0], [1], [0, 0, 1, 1], [], []>} : vector<8x128xf32>, vector<128x512xf32>, vector<8x512xf32> -> vector<8x512xf32>
    %118 = arith.addf %116, %117 : vector<8x512xf32>
    %119 = vector.extract_strided_slice %118 {offsets = [0, 0], sizes = [8, 128], strides = [1, 1]} : vector<8x512xf32> to vector<8x128xf32>
    %120 = arith.negf %119 : vector<8x128xf32>
    %121 = math.exp %120 : vector<8x128xf32>
    %cst_44 = arith.constant 1.000000e+00 : f32
    %122 = vector.broadcast %cst_44 : f32 to vector<8x128xf32>
    %123 = arith.addf %122, %121 : vector<8x128xf32>
    %124 = arith.divf %122, %123 : vector<8x128xf32>
    %125 = vector.extract_strided_slice %118 {offsets = [0, 128], sizes = [8, 128], strides = [1, 1]} : vector<8x512xf32> to vector<8x128xf32>
    %126 = arith.negf %125 : vector<8x128xf32>
    %127 = math.exp %126 : vector<8x128xf32>
    %cst_45 = arith.constant 1.000000e+00 : f32
    %128 = vector.broadcast %cst_45 : f32 to vector<8x128xf32>
    %129 = arith.addf %128, %127 : vector<8x128xf32>
    %130 = arith.divf %128, %129 : vector<8x128xf32>
    %131 = vector.extract_strided_slice %118 {offsets = [0, 256], sizes = [8, 128], strides = [1, 1]} : vector<8x512xf32> to vector<8x128xf32>
    %132 = math.tanh %131 : vector<8x128xf32>
    %133 = vector.extract_strided_slice %118 {offsets = [0, 384], sizes = [8, 128], strides = [1, 1]} : vector<8x512xf32> to vector<8x128xf32>
    %134 = arith.negf %133 : vector<8x128xf32>
    %135 = math.exp %134 : vector<8x128xf32>
    %cst_46 = arith.constant 1.000000e+00 : f32
    %136 = vector.broadcast %cst_46 : f32 to vector<8x128xf32>
    %137 = arith.addf %136, %135 : vector<8x128xf32>
    %138 = arith.divf %136, %137 : vector<8x128xf32>
    %139 = arith.mulf %130, %108 : vector<8x128xf32>
    %140 = arith.mulf %124, %132 : vector<8x128xf32>
    %141 = arith.addf %139, %140 : vector<8x128xf32>
    %142 = math.tanh %141 : vector<8x128xf32>
    %143 = arith.mulf %138, %142 : vector<8x128xf32>
    %144 = vector.shape_cast %143 : vector<8x128xf32> to vector<8x1x128xf32>
    %c0_47 = arith.constant 0 : index
    %145 = arith.index_cast %c3_i32 : i32 to index
    %c0_48 = arith.constant 0 : index
    %146 = vector.load %arg12[%c0_47, %145, %c0_48] : memref<8x8x128xf32, #tpu.memory_space<vmem>>, vector<8x1x128xf32>
    tpu.vector_store %arg12[%c0_47, %145, %c0_48], %144 {strides = array<i32>} : memref<8x8x128xf32, #tpu.memory_space<vmem>>, vector<8x1x128xf32>,
    %c4_i32 = arith.constant 4 : i32
    %147 = arith.index_cast %c4_i32 : i32 to index
    %c0_49 = arith.constant 0 : index
    %c0_50 = arith.constant 0 : index
    %148 = vector.load %arg11[%147, %c0_49, %c0_50] : memref<8x8x512xf32, #tpu.memory_space<vmem>>, vector<1x8x512xf32>
    %149 = vector.shape_cast %148 : vector<1x8x512xf32> to vector<8x512xf32>
    %cst_51 = arith.constant dense<0.000000e+00> : vector<8x512xf32>
    %150 = tpu.matmul %143, %12, %cst_51 {dimension_numbers = #tpu.dot_dimension_numbers<[1], [0], [0], [1], [0, 0, 1, 1], [], []>} : vector<8x128xf32>, vector<128x512xf32>, vector<8x512xf32> -> vector<8x512xf32>
    %151 = arith.addf %149, %150 : vector<8x512xf32>
    %152 = vector.extract_strided_slice %151 {offsets = [0, 0], sizes = [8, 128], strides = [1, 1]} : vector<8x512xf32> to vector<8x128xf32>
    %153 = arith.negf %152 : vector<8x128xf32>
    %154 = math.exp %153 : vector<8x128xf32>
    %cst_52 = arith.constant 1.000000e+00 : f32
    %155 = vector.broadcast %cst_52 : f32 to vector<8x128xf32>
    %156 = arith.addf %155, %154 : vector<8x128xf32>
    %157 = arith.divf %155, %156 : vector<8x128xf32>
    %158 = vector.extract_strided_slice %151 {offsets = [0, 128], sizes = [8, 128], strides = [1, 1]} : vector<8x512xf32> to vector<8x128xf32>
    %159 = arith.negf %158 : vector<8x128xf32>
    %160 = math.exp %159 : vector<8x128xf32>
    %cst_53 = arith.constant 1.000000e+00 : f32
    %161 = vector.broadcast %cst_53 : f32 to vector<8x128xf32>
    %162 = arith.addf %161, %160 : vector<8x128xf32>
    %163 = arith.divf %161, %162 : vector<8x128xf32>
    %164 = vector.extract_strided_slice %151 {offsets = [0, 256], sizes = [8, 128], strides = [1, 1]} : vector<8x512xf32> to vector<8x128xf32>
    %165 = math.tanh %164 : vector<8x128xf32>
    %166 = vector.extract_strided_slice %151 {offsets = [0, 384], sizes = [8, 128], strides = [1, 1]} : vector<8x512xf32> to vector<8x128xf32>
    %167 = arith.negf %166 : vector<8x128xf32>
    %168 = math.exp %167 : vector<8x128xf32>
    %cst_54 = arith.constant 1.000000e+00 : f32
    %169 = vector.broadcast %cst_54 : f32 to vector<8x128xf32>
    %170 = arith.addf %169, %168 : vector<8x128xf32>
    %171 = arith.divf %169, %170 : vector<8x128xf32>
    %172 = arith.mulf %163, %141 : vector<8x128xf32>
    %173 = arith.mulf %157, %165 : vector<8x128xf32>
    %174 = arith.addf %172, %173 : vector<8x128xf32>
    %175 = math.tanh %174 : vector<8x128xf32>
    %176 = arith.mulf %171, %175 : vector<8x128xf32>
    %177 = vector.shape_cast %176 : vector<8x128xf32> to vector<8x1x128xf32>
    %c0_55 = arith.constant 0 : index
    %178 = arith.index_cast %c4_i32 : i32 to index
    %c0_56 = arith.constant 0 : index
    %179 = vector.load %arg12[%c0_55, %178, %c0_56] : memref<8x8x128xf32, #tpu.memory_space<vmem>>, vector<8x1x128xf32>
    tpu.vector_store %arg12[%c0_55, %178, %c0_56], %177 {strides = array<i32>} : memref<8x8x128xf32, #tpu.memory_space<vmem>>, vector<8x1x128xf32>,
    %c5_i32 = arith.constant 5 : i32
    %180 = arith.index_cast %c5_i32 : i32 to index
    %c0_57 = arith.constant 0 : index
    %c0_58 = arith.constant 0 : index
    %181 = vector.load %arg11[%180, %c0_57, %c0_58] : memref<8x8x512xf32, #tpu.memory_space<vmem>>, vector<1x8x512xf32>
    %182 = vector.shape_cast %181 : vector<1x8x512xf32> to vector<8x512xf32>
    %cst_59 = arith.constant dense<0.000000e+00> : vector<8x512xf32>
    %183 = tpu.matmul %176, %12, %cst_59 {dimension_numbers = #tpu.dot_dimension_numbers<[1], [0], [0], [1], [0, 0, 1, 1], [], []>} : vector<8x128xf32>, vector<128x512xf32>, vector<8x512xf32> -> vector<8x512xf32>
    %184 = arith.addf %182, %183 : vector<8x512xf32>
    %185 = vector.extract_strided_slice %184 {offsets = [0, 0], sizes = [8, 128], strides = [1, 1]} : vector<8x512xf32> to vector<8x128xf32>
    %186 = arith.negf %185 : vector<8x128xf32>
    %187 = math.exp %186 : vector<8x128xf32>
    %cst_60 = arith.constant 1.000000e+00 : f32
    %188 = vector.broadcast %cst_60 : f32 to vector<8x128xf32>
    %189 = arith.addf %188, %187 : vector<8x128xf32>
    %190 = arith.divf %188, %189 : vector<8x128xf32>
    %191 = vector.extract_strided_slice %184 {offsets = [0, 128], sizes = [8, 128], strides = [1, 1]} : vector<8x512xf32> to vector<8x128xf32>
    %192 = arith.negf %191 : vector<8x128xf32>
    %193 = math.exp %192 : vector<8x128xf32>
    %cst_61 = arith.constant 1.000000e+00 : f32
    %194 = vector.broadcast %cst_61 : f32 to vector<8x128xf32>
    %195 = arith.addf %194, %193 : vector<8x128xf32>
    %196 = arith.divf %194, %195 : vector<8x128xf32>
    %197 = vector.extract_strided_slice %184 {offsets = [0, 256], sizes = [8, 128], strides = [1, 1]} : vector<8x512xf32> to vector<8x128xf32>
    %198 = math.tanh %197 : vector<8x128xf32>
    %199 = vector.extract_strided_slice %184 {offsets = [0, 384], sizes = [8, 128], strides = [1, 1]} : vector<8x512xf32> to vector<8x128xf32>
    %200 = arith.negf %199 : vector<8x128xf32>
    %201 = math.exp %200 : vector<8x128xf32>
    %cst_62 = arith.constant 1.000000e+00 : f32
    %202 = vector.broadcast %cst_62 : f32 to vector<8x128xf32>
    %203 = arith.addf %202, %201 : vector<8x128xf32>
    %204 = arith.divf %202, %203 : vector<8x128xf32>
    %205 = arith.mulf %196, %174 : vector<8x128xf32>
    %206 = arith.mulf %190, %198 : vector<8x128xf32>
    %207 = arith.addf %205, %206 : vector<8x128xf32>
    %208 = math.tanh %207 : vector<8x128xf32>
    %209 = arith.mulf %204, %208 : vector<8x128xf32>
    %210 = vector.shape_cast %209 : vector<8x128xf32> to vector<8x1x128xf32>
    %c0_63 = arith.constant 0 : index
    %211 = arith.index_cast %c5_i32 : i32 to index
    %c0_64 = arith.constant 0 : index
    %212 = vector.load %arg12[%c0_63, %211, %c0_64] : memref<8x8x128xf32, #tpu.memory_space<vmem>>, vector<8x1x128xf32>
    tpu.vector_store %arg12[%c0_63, %211, %c0_64], %210 {strides = array<i32>} : memref<8x8x128xf32, #tpu.memory_space<vmem>>, vector<8x1x128xf32>,
    %c6_i32 = arith.constant 6 : i32
    %213 = arith.index_cast %c6_i32 : i32 to index
    %c0_65 = arith.constant 0 : index
    %c0_66 = arith.constant 0 : index
    %214 = vector.load %arg11[%213, %c0_65, %c0_66] : memref<8x8x512xf32, #tpu.memory_space<vmem>>, vector<1x8x512xf32>
    %215 = vector.shape_cast %214 : vector<1x8x512xf32> to vector<8x512xf32>
    %cst_67 = arith.constant dense<0.000000e+00> : vector<8x512xf32>
    %216 = tpu.matmul %209, %12, %cst_67 {dimension_numbers = #tpu.dot_dimension_numbers<[1], [0], [0], [1], [0, 0, 1, 1], [], []>} : vector<8x128xf32>, vector<128x512xf32>, vector<8x512xf32> -> vector<8x512xf32>
    %217 = arith.addf %215, %216 : vector<8x512xf32>
    %218 = vector.extract_strided_slice %217 {offsets = [0, 0], sizes = [8, 128], strides = [1, 1]} : vector<8x512xf32> to vector<8x128xf32>
    %219 = arith.negf %218 : vector<8x128xf32>
    %220 = math.exp %219 : vector<8x128xf32>
    %cst_68 = arith.constant 1.000000e+00 : f32
    %221 = vector.broadcast %cst_68 : f32 to vector<8x128xf32>
    %222 = arith.addf %221, %220 : vector<8x128xf32>
    %223 = arith.divf %221, %222 : vector<8x128xf32>
    %224 = vector.extract_strided_slice %217 {offsets = [0, 128], sizes = [8, 128], strides = [1, 1]} : vector<8x512xf32> to vector<8x128xf32>
    %225 = arith.negf %224 : vector<8x128xf32>
    %226 = math.exp %225 : vector<8x128xf32>
    %cst_69 = arith.constant 1.000000e+00 : f32
    %227 = vector.broadcast %cst_69 : f32 to vector<8x128xf32>
    %228 = arith.addf %227, %226 : vector<8x128xf32>
    %229 = arith.divf %227, %228 : vector<8x128xf32>
    %230 = vector.extract_strided_slice %217 {offsets = [0, 256], sizes = [8, 128], strides = [1, 1]} : vector<8x512xf32> to vector<8x128xf32>
    %231 = math.tanh %230 : vector<8x128xf32>
    %232 = vector.extract_strided_slice %217 {offsets = [0, 384], sizes = [8, 128], strides = [1, 1]} : vector<8x512xf32> to vector<8x128xf32>
    %233 = arith.negf %232 : vector<8x128xf32>
    %234 = math.exp %233 : vector<8x128xf32>
    %cst_70 = arith.constant 1.000000e+00 : f32
    %235 = vector.broadcast %cst_70 : f32 to vector<8x128xf32>
    %236 = arith.addf %235, %234 : vector<8x128xf32>
    %237 = arith.divf %235, %236 : vector<8x128xf32>
    %238 = arith.mulf %229, %207 : vector<8x128xf32>
    %239 = arith.mulf %223, %231 : vector<8x128xf32>
    %240 = arith.addf %238, %239 : vector<8x128xf32>
    %241 = math.tanh %240 : vector<8x128xf32>
    %242 = arith.mulf %237, %241 : vector<8x128xf32>
    %243 = vector.shape_cast %242 : vector<8x128xf32> to vector<8x1x128xf32>
    %c0_71 = arith.constant 0 : index
    %244 = arith.index_cast %c6_i32 : i32 to index
    %c0_72 = arith.constant 0 : index
    %245 = vector.load %arg12[%c0_71, %244, %c0_72] : memref<8x8x128xf32, #tpu.memory_space<vmem>>, vector<8x1x128xf32>
    tpu.vector_store %arg12[%c0_71, %244, %c0_72], %243 {strides = array<i32>} : memref<8x8x128xf32, #tpu.memory_space<vmem>>, vector<8x1x128xf32>,
    %c7_i32 = arith.constant 7 : i32
    %246 = arith.index_cast %c7_i32 : i32 to index
    %c0_73 = arith.constant 0 : index
    %c0_74 = arith.constant 0 : index
    %247 = vector.load %arg11[%246, %c0_73, %c0_74] : memref<8x8x512xf32, #tpu.memory_space<vmem>>, vector<1x8x512xf32>
    %248 = vector.shape_cast %247 : vector<1x8x512xf32> to vector<8x512xf32>
    %cst_75 = arith.constant dense<0.000000e+00> : vector<8x512xf32>
    %249 = tpu.matmul %242, %12, %cst_75 {dimension_numbers = #tpu.dot_dimension_numbers<[1], [0], [0], [1], [0, 0, 1, 1], [], []>} : vector<8x128xf32>, vector<128x512xf32>, vector<8x512xf32> -> vector<8x512xf32>
    %250 = arith.addf %248, %249 : vector<8x512xf32>
    %251 = vector.extract_strided_slice %250 {offsets = [0, 0], sizes = [8, 128], strides = [1, 1]} : vector<8x512xf32> to vector<8x128xf32>
    %252 = arith.negf %251 : vector<8x128xf32>
    %253 = math.exp %252 : vector<8x128xf32>
    %cst_76 = arith.constant 1.000000e+00 : f32
    %254 = vector.broadcast %cst_76 : f32 to vector<8x128xf32>
    %255 = arith.addf %254, %253 : vector<8x128xf32>
    %256 = arith.divf %254, %255 : vector<8x128xf32>
    %257 = vector.extract_strided_slice %250 {offsets = [0, 128], sizes = [8, 128], strides = [1, 1]} : vector<8x512xf32> to vector<8x128xf32>
    %258 = arith.negf %257 : vector<8x128xf32>
    %259 = math.exp %258 : vector<8x128xf32>
    %cst_77 = arith.constant 1.000000e+00 : f32
    %260 = vector.broadcast %cst_77 : f32 to vector<8x128xf32>
    %261 = arith.addf %260, %259 : vector<8x128xf32>
    %262 = arith.divf %260, %261 : vector<8x128xf32>
    %263 = vector.extract_strided_slice %250 {offsets = [0, 256], sizes = [8, 128], strides = [1, 1]} : vector<8x512xf32> to vector<8x128xf32>
    %264 = math.tanh %263 : vector<8x128xf32>
    %265 = vector.extract_strided_slice %250 {offsets = [0, 384], sizes = [8, 128], strides = [1, 1]} : vector<8x512xf32> to vector<8x128xf32>
    %266 = arith.negf %265 : vector<8x128xf32>
    %267 = math.exp %266 : vector<8x128xf32>
    %cst_78 = arith.constant 1.000000e+00 : f32
    %268 = vector.broadcast %cst_78 : f32 to vector<8x128xf32>
    %269 = arith.addf %268, %267 : vector<8x128xf32>
    %270 = arith.divf %268, %269 : vector<8x128xf32>
    %271 = arith.mulf %262, %240 : vector<8x128xf32>
    %272 = arith.mulf %256, %264 : vector<8x128xf32>
    %273 = arith.addf %271, %272 : vector<8x128xf32>
    %274 = math.tanh %273 : vector<8x128xf32>
    %275 = arith.mulf %270, %274 : vector<8x128xf32>
    %276 = vector.shape_cast %275 : vector<8x128xf32> to vector<8x1x128xf32>
    %c0_79 = arith.constant 0 : index
    %277 = arith.index_cast %c7_i32 : i32 to index
    %c0_80 = arith.constant 0 : index
    %278 = vector.load %arg12[%c0_79, %277, %c0_80] : memref<8x8x128xf32, #tpu.memory_space<vmem>>, vector<8x1x128xf32>
    tpu.vector_store %arg12[%c0_79, %277, %c0_80], %276 {strides = array<i32>} : memref<8x8x128xf32, #tpu.memory_space<vmem>>, vector<8x1x128xf32>,
    %c8_i32 = arith.constant 8 : i32
    %c0_81 = arith.constant 0 : index
    %c0_82 = arith.constant 0 : index
    %279 = vector.load %arg13[%c0_81, %c0_82] : memref<8x128xf32, #tpu.memory_space<vmem>>, vector<8x128xf32>
    tpu.vector_store %arg13[%c0_81, %c0_82], %275 {strides = array<i32>} : memref<8x128xf32, #tpu.memory_space<vmem>>, vector<8x128xf32>,
    %c0_83 = arith.constant 0 : index
    %c0_84 = arith.constant 0 : index
    %280 = vector.load %arg14[%c0_83, %c0_84] : memref<8x128xf32, #tpu.memory_space<vmem>>, vector<8x128xf32>
    tpu.vector_store %arg14[%c0_83, %c0_84], %273 {strides = array<i32>} : memref<8x128xf32, #tpu.memory_space<vmem>>, vector<8x128xf32>,
    %c0_85 = arith.constant 0 : index
    %c0_86 = arith.constant 0 : index
    %c0_87 = arith.constant 0 : index
    %281 = vector.load %arg12[%c0_85, %c0_86, %c0_87] : memref<8x8x128xf32, #tpu.memory_space<vmem>>, vector<8x8x128xf32>
    %c0_88 = arith.constant 0 : index
    %c0_89 = arith.constant 0 : index
    %c0_90 = arith.constant 0 : index
    %282 = vector.load %arg8[%c0_88, %c0_89, %c0_90] : memref<8x8x128xf32, #tpu.memory_space<vmem>>, vector<8x8x128xf32>
    tpu.vector_store %arg8[%c0_88, %c0_89, %c0_90], %281 {strides = array<i32>} : memref<8x8x128xf32, #tpu.memory_space<vmem>>, vector<8x8x128xf32>,
    %c0_i32_91 = arith.constant 0 : i32
    %283 = arith.cmpi eq, %arg1, %c0_i32_91 : i32
    %284 = arith.extui %283 : i1 to i32
    %c0_i32_92 = arith.constant 0 : i32
    %285 = arith.cmpi ne, %284, %c0_i32_92 : i32
    scf.if %285 {
      %c0_93 = arith.constant 0 : index
      %c0_94 = arith.constant 0 : index
      %286 = vector.load %arg9[%c0_93, %c0_94] : memref<8x128xf32, #tpu.memory_space<vmem>>, vector<8x128xf32>
      tpu.vector_store %arg9[%c0_93, %c0_94], %275 {strides = array<i32>} : memref<8x128xf32, #tpu.memory_space<vmem>>, vector<8x128xf32>,
      %c0_95 = arith.constant 0 : index
      %c0_96 = arith.constant 0 : index
      %287 = vector.load %arg10[%c0_95, %c0_96] : memref<8x128xf32, #tpu.memory_space<vmem>>, vector<8x128xf32>
      tpu.vector_store %arg10[%c0_95, %c0_96], %273 {strides = array<i32>} : memref<8x128xf32, #tpu.memory_space<vmem>>, vector<8x128xf32>,
    } else {
    }
    return
  }
  func.func @transform_0(%arg0: i32, %arg1: i32) -> (i32, i32, i32) {
    %c0_i32 = arith.constant 0 : i32
    %c0_i32_0 = arith.constant 0 : i32
    return %arg1, %arg0, %c0_i32 : i32, i32, i32
  }
  func.func @transform_1(%arg0: i32, %arg1: i32) -> (i32, i32) {
    %c0_i32 = arith.constant 0 : i32
    %c0_i32_0 = arith.constant 0 : i32
    %c0_i32_1 = arith.constant 0 : i32
    return %c0_i32, %c0_i32_0 : i32, i32
  }
  func.func @transform_2(%arg0: i32, %arg1: i32) -> (i32, i32) {
    %c0_i32 = arith.constant 0 : i32
    %c0_i32_0 = arith.constant 0 : i32
    %c0_i32_1 = arith.constant 0 : i32
    return %c0_i32, %c0_i32_0 : i32, i32
  }
  func.func @transform_3(%arg0: i32, %arg1: i32) -> (i32, i32) {
    %c0_i32 = arith.constant 0 : i32
    %c0_i32_0 = arith.constant 0 : i32
    %c0_i32_1 = arith.constant 0 : i32
    return %c0_i32, %c0_i32_0 : i32, i32
  }
  func.func @transform_4(%arg0: i32, %arg1: i32) -> (i32, i32) {
    %c0_i32 = arith.constant 0 : i32
    %c0_i32_0 = arith.constant 0 : i32
    return %arg0, %c0_i32 : i32, i32
  }
  func.func @transform_5(%arg0: i32, %arg1: i32) -> (i32, i32) {
    %c0_i32 = arith.constant 0 : i32
    %c0_i32_0 = arith.constant 0 : i32
    return %arg0, %c0_i32 : i32, i32
  }
  func.func @transform_6(%arg0: i32, %arg1: i32) -> (i32, i32, i32) {
    %c0_i32 = arith.constant 0 : i32
    %c0_i32_0 = arith.constant 0 : i32
    return %arg0, %arg1, %c0_i32 : i32, i32, i32
  }
  func.func @transform_7(%arg0: i32, %arg1: i32) -> (i32, i32) {
    %c0_i32 = arith.constant 0 : i32
    %c0_i32_0 = arith.constant 0 : i32
    return %arg0, %c0_i32 : i32, i32
  }
  func.func @transform_8(%arg0: i32, %arg1: i32) -> (i32, i32) {
    %c0_i32 = arith.constant 0 : i32
    %c0_i32_0 = arith.constant 0 : i32
    return %arg0, %c0_i32 : i32, i32
  }
}

</mosaic_0001>

<bundles_post_ra>
// kernel: rnn_module_forward.3
= control target key start
LH: loop header
LB: loop body
LE: loop exit
PB: predicated region body
PF: predicated region fallthrough
CT: control target
= control target key end

     0   :  { %s165_s1 = inlined_call_operand.vmem [shape: f32[128,128], index: 1, kind: input, shape index: {}]   ;;  %s166_s2 = inlined_call_operand.vmem [shape: f32[1,128], index: 2, kind: input, shape index: {}]   ;;  %s167_s0 = inlined_call_operand.vmem [shape: f32[16,128], index: 0, kind: input, shape index: {}]   ;;  %s168_s3 = inlined_call_operand.vmem [shape: f32[16,128], index: 3, kind: output, shape index: {}]  }
   0x1   :  { %v31_v0 = vld [vmem:[%s165_s1 + $0x78] sm:$0xff]  ;;  %v30_v1 = vld [vmem:[%s165_s1 + $0x70] sm:$0xff]  ;;  %v29_v2 = vld [vmem:[%s165_s1 + $0x68] sm:$0xff] }
   0x2   :  { %36 = vmatpush.msra.mxu0 %v31_v0  ;;  %65 = vmatpush.msra.mxu1 %v31_v0  ;;  %v28_v3 = vld [vmem:[%s165_s1 + $0x60] sm:$0xff]  ;;  %v27_v4 = vld [vmem:[%s165_s1 + $0x58] sm:$0xff]  ;;  %v26_v5 = vld [vmem:[%s165_s1 + $0x50] sm:$0xff] }
   0x3   :  { %v25_v6 = vld [vmem:[%s165_s1 + $0x48] sm:$0xff]  ;;  %v24_v7 = vld [vmem:[%s165_s1 + $0x40] sm:$0xff]  ;;  %v23_v8 = vld [vmem:[%s165_s1 + $0x38] sm:$0xff] }
   0x4   :  { %37 = vmatpush.msra.mxu0 %v30_v1  ;;  %66 = vmatpush.msra.mxu1 %v30_v1  ;;  %v22_v9 = vld [vmem:[%s165_s1 + $0x30] sm:$0xff]  ;;  %v21_v10 = vld [vmem:[%s165_s1 + $0x28] sm:$0xff]  ;;  %v20_v11 = vld [vmem:[%s165_s1 + $0x20] sm:$0xff] }
   0x5   :  { %v19_v12 = vld [vmem:[%s165_s1 + $0x18] sm:$0xff]  ;;  %v18_v13 = vld [vmem:[%s165_s1 + $0x10] sm:$0xff]  ;;  %v17_v14 = vld [vmem:[%s165_s1 + $0x8] sm:$0xff] }
   0x6   :  { %38 = vmatpush.msra.mxu0 %v29_v2  ;;  %67 = vmatpush.msra.mxu1 %v29_v2  ;;  %v16_v15 = vld [vmem:[%s165_s1] sm:$0xff]  ;;  %v15_v17 = vld [vmem:[%s167_s0 + $0x8] sm:$0xff] }
   0x7   :  { %v14_v16 = vld [vmem:[%s167_s0] sm:$0xff] }
   0x8   :  { %39 = vmatpush.msra.mxu0 %v28_v3  ;;  %68 = vmatpush.msra.mxu1 %v28_v3  ;;  %v81_v18 = vld [vmem:[%s166_s2] ss:$0 sm:$0xff] }
   0xa   :  { %40 = vmatpush.msra.mxu0 %v27_v4  ;;  %69 = vmatpush.msra.mxu1 %v27_v4 }
   0xc   :  { %41 = vmatpush.msra.mxu0 %v26_v5  ;;  %70 = vmatpush.msra.mxu1 %v26_v5 }
   0xe   :  { %42 = vmatpush.msra.mxu0 %v25_v6  ;;  %71 = vmatpush.msra.mxu1 %v25_v6 }
  0x10   :  { %43 = vmatpush.msra.mxu0 %v24_v7  ;;  %72 = vmatpush.msra.mxu1 %v24_v7 }
  0x12   :  { %44 = vmatpush.msra.mxu0 %v23_v8  ;;  %73 = vmatpush.msra.mxu1 %v23_v8 }
  0x14   :  { %45 = vmatpush.msra.mxu0 %v22_v9  ;;  %74 = vmatpush.msra.mxu1 %v22_v9 }
  0x16   :  { %46 = vmatpush.msra.mxu0 %v21_v10  ;;  %75 = vmatpush.msra.mxu1 %v21_v10 }
  0x18   :  { %47 = vmatpush.msra.mxu0 %v20_v11  ;;  %76 = vmatpush.msra.mxu1 %v20_v11 }
  0x1a   :  { %48 = vmatpush.msra.mxu0 %v19_v12  ;;  %77 = vmatpush.msra.mxu1 %v19_v12 }
  0x1c   :  { %49 = vmatpush.msra.mxu0 %v18_v13  ;;  %78 = vmatpush.msra.mxu1 %v18_v13 }
  0x1e   :  { %50 = vmatpush.msra.mxu0 %v17_v14  ;;  %79 = vmatpush.msra.mxu1 %v17_v14 }
  0x20   :  { %51 = vmatpush.msra.mxu0 %v16_v15  ;;  %80 = vmatpush.msra.mxu1 %v16_v15 }
  0x21   :  { %52 = vmatmul.f32.vlgmr.msra.gmra.mxu0 %v14_v16  ;;  %55 = vmatmul.f32.vlgmr.msra.gmra.mxu1 %v15_v17 }
  0x9e   :  { %v53_v19 = vpop.f32.mrf.mxu0  ;;  %v56_v20 = vpop.f32.mrf.mxu1 }
  0x9f   :  { %v54_v21 = vadd.f32 %v81_v18, %v53_v19  ;;  %v57_v22 = vadd.f32 %v81_v18, %v56_v20 }
  0xa1   :  { %59 = vst [vmem:[%s168_s3] sm:$0xff] %v54_v21 }
  0xa2   :  { %60 = vst [vmem:[%s168_s3 + $0x8] sm:$0xff] %v57_v22 }

// kernel: rnn_module_forward.2
= control target key start
LH: loop header
LB: loop body
LE: loop exit
PB: predicated region body
PF: predicated region fallthrough
CT: control target
= control target key end

     0   :  { %14 = vsyncpa [#allocation7], 0  ;;  %s2083_s30 = smov [#allocation6]   ;;  %s2084_s10 = smov 512   ;;  %s3173_s0 = inlined_call_operand.vmem [shape: f32[8,8,32], index: 0, kind: input, shape index: {}]   ;;  %s3174_s1 = inlined_call_operand.vmem [shape: f32[32,512], index: 1, kind: input, shape index: {}]   ;;  %s3175_s2 = inlined_call_operand.hbm [shape: f32[128,512], index: 2, kind: input, shape index: {}]   ;;  %s3176_s3 = inlined_call_operand.vmem [shape: f32[1,512], index: 3, kind: input, shape index: {}]   ;;  %s3177_s4 = inlined_call_operand.vmem [shape: f32[8,128], index: 4, kind: input, shape index: {}]   ;;  %s3178_s5 = inlined_call_operand.vmem [shape: f32[8,128], index: 5, kind: input, shape index: {}]   ;;  %s3179_s6 = inlined_call_operand.vmem [shape: f32[8,8,128], index: 6, kind: output, shape index: {0}]   ;;  %s3180_s7 = inlined_call_operand.vmem [shape: f32[8,128], index: 7, kind: output, shape index: {1}]   ;;  %s3181_s8 = inlined_call_operand.vmem [shape: f32[8,128], index: 8, kind: output, shape index: {2}]  }
   0x1   :  { %s23_s29 = sshll.u32 %s3175_s2, 4  ;;  %s25_s9 = sshll.u32 %s2083_s30, 4  ;;  %s24_s29 = int_to_ptr.hbm [resolvable:$true] %s23_s29  ;;  %s26_s9 = int_to_ptr.vmem [resolvable:$true] %s25_s9 }
   0x2   :  { %s2085_s11 = smov 32  }
   0x3   :  { %31 = dma.hbm_to_vmem [thread:$0]  %s24_s29, 8192, %s26_s9, [#allocation7], %s2084_s10, %s2084_s10, %s2085_s11  }
   0x4   :  { %2081 = dma.done.wait [#allocation7], 8192  }
   0x5   :  { %2082 = vsyncadd [#allocation7], 4294959104  ;;  %v70_v0 = vld [vmem:[%s3174_s1 + $0x60] sm:$0xff]  ;;  %v71_v1 = vld [vmem:[%s3174_s1 + $0x68] sm:$0xff]  ;;  %vm84_vm0 = vcmask 261120  }
   0x6   :  { %v72_v2 = vld [vmem:[%s3174_s1 + $0x70] sm:$0xff]  ;;  %121 = vmatpush.msra.mxu0 %v70_v0  ;;  %162 = vmatpush.msra.mxu1 %v71_v1  ;;  %v73_v3 = vld [vmem:[%s3174_s1 + $0x78] sm:$0xff]  ;;  %v66_v4 = vld [vmem:[%s3174_s1 + $0x40] sm:$0xff] }
   0x7   :  { %v67_v5 = vld [vmem:[%s3174_s1 + $0x48] sm:$0xff]  ;;  %203 = vmatpush.msra.mxu2 %v72_v2  ;;  %244 = vmatpush.msra.mxu3 %v73_v3  ;;  %v68_v6 = vld [vmem:[%s3174_s1 + $0x50] sm:$0xff]  ;;  %v69_v7 = vld [vmem:[%s3174_s1 + $0x58] sm:$0xff] }
   0x8   :  { %v62_v8 = vld [vmem:[%s3174_s1 + $0x20] sm:$0xff]  ;;  %122 = vmatpush.msra.mxu0 %v66_v4  ;;  %163 = vmatpush.msra.mxu1 %v67_v5  ;;  %v63_v9 = vld [vmem:[%s3174_s1 + $0x28] sm:$0xff]  ;;  %v64_v10 = vld [vmem:[%s3174_s1 + $0x30] sm:$0xff] }
   0x9   :  { %v65_v11 = vld [vmem:[%s3174_s1 + $0x38] sm:$0xff]  ;;  %204 = vmatpush.msra.mxu2 %v68_v6  ;;  %245 = vmatpush.msra.mxu3 %v69_v7  ;;  %v58_v12 = vld [vmem:[%s3174_s1] sm:$0xff]  ;;  %v59_v13 = vld [vmem:[%s3174_s1 + $0x8] sm:$0xff] }
   0xa   :  { %123 = vmatpush.msra.mxu0 %v62_v8  ;;  %164 = vmatpush.msra.mxu1 %v63_v9  ;;  %v60_v14 = vld [vmem:[%s3174_s1 + $0x10] sm:$0xff]  ;;  %v61_v15 = vld [vmem:[%s3174_s1 + $0x18] sm:$0xff]  ;;  %v50_v16 = vld [vmem:[%s3173_s0] sm:$0xff] }
   0xb   :  { %205 = vmatpush.msra.mxu2 %v64_v10  ;;  %246 = vmatpush.msra.mxu3 %v65_v11  ;;  %v2185_v17 = vld [vmem:[#allocation6 + $0x1e0] sm:$0xff]  ;;  %v2187_v18 = vld [vmem:[#allocation6 + $0x1e8] sm:$0xff]  ;;  %v2191_v19 = vld [vmem:[#allocation6 + $0x1f8] sm:$0xff] }
   0xc   :  { %124 = vmatpush.msra.mxu0 %v58_v12  ;;  %165 = vmatpush.msra.mxu1 %v59_v13  ;;  %v2193_v20 = vld [vmem:[#allocation6 + $0x1f0] sm:$0xff]  ;;  %v2197_v21 = vld [vmem:[#allocation6 + $0x1c0] sm:$0xff]  ;;  %v2199_v22 = vld [vmem:[#allocation6 + $0x1c8] sm:$0xff] }
   0xd   :  { %206 = vmatpush.msra.mxu2 %v60_v14  ;;  %247 = vmatpush.msra.mxu3 %v61_v15  ;;  %v2203_v23 = vld [vmem:[#allocation6 + $0x1d8] sm:$0xff]  ;;  %v2205_v24 = vld [vmem:[#allocation6 + $0x1d0] sm:$0xff]  ;;  %v2208_v25 = vld [vmem:[#allocation6 + $0x1a0] sm:$0xff] }
   0xe   :  { %1806 = vmatmul.msk.f32.vlgmr.msra.gmra.mxu0 %vm84_vm0, %v50_v16  ;;  %1814 = vmatmul.msk.f32.vlgmr.msra.gmra.mxu1 %vm84_vm0, %v50_v16  ;;  %v2210_v26 = vld [vmem:[#allocation6 + $0x1a8] sm:$0xff]  ;;  %v2215_v27 = vld [vmem:[#allocation6 + $0x1b8] sm:$0xff]  ;;  %v2217_v28 = vld [vmem:[#allocation6 + $0x1b0] sm:$0xff] }
   0xf   :  { %1822 = vmatmul.msk.f32.vlgmr.msra.gmra.mxu2 %vm84_vm0, %v50_v16  ;;  %1830 = vmatmul.msk.f32.vlgmr.msra.gmra.mxu3 %vm84_vm0, %v50_v16  ;;  %v51_v29 = vld [vmem:[%s3173_s0 + $0x8] sm:$0xff]  ;;  %v2226_v30 = vld [vmem:[#allocation6 + $0x180] sm:$0xff]  ;;  %v2234_v32 = vld [vmem:[#allocation6 + $0x198] sm:$0xff] }
  0x10   :  { %375 = vmatpush.msrb.mxu0 %v2185_v17  ;;  %395 = vmatpush.msrb.mxu1 %v2187_v18  ;;  %v2228_v31 = vld [vmem:[#allocation6 + $0x188] sm:$0xff]  ;;  %v2236_v33 = vld [vmem:[#allocation6 + $0x190] sm:$0xff]  ;;  %v2240_v34 = vld [vmem:[#allocation6 + $0x160] sm:$0xff] }
  0x11   :  { %435 = vmatpush.msrb.mxu3 %v2191_v19  ;;  %415 = vmatpush.msrb.mxu2 %v2193_v20  ;;  %v2242_v35 = vld [vmem:[#allocation6 + $0x168] sm:$0xff]  ;;  %v2246_v36 = vld [vmem:[#allocation6 + $0x178] sm:$0xff]  ;;  %v2248_v37 = vld [vmem:[#allocation6 + $0x170] sm:$0xff] }
  0x12   :  { %376 = vmatpush.msrb.mxu0 %v2197_v21  ;;  %396 = vmatpush.msrb.mxu1 %v2199_v22  ;;  %v2251_v38 = vld [vmem:[#allocation6 + $0x140] sm:$0xff]  ;;  %v2253_v39 = vld [vmem:[#allocation6 + $0x148] sm:$0xff]  ;;  %v2258_v40 = vld [vmem:[#allocation6 + $0x158] sm:$0xff] }
  0x13   :  { %436 = vmatpush.msrb.mxu3 %v2203_v23  ;;  %416 = vmatpush.msrb.mxu2 %v2205_v24  ;;  %v2260_v41 = vld [vmem:[#allocation6 + $0x150] sm:$0xff]  ;;  %v2269_v43 = vld [vmem:[#allocation6 + $0x120] sm:$0xff]  ;;  %v2271_v44 = vld [vmem:[#allocation6 + $0x128] sm:$0xff] }
  0x14   :  { %377 = vmatpush.msrb.mxu0 %v2208_v25  ;;  %397 = vmatpush.msrb.mxu1 %v2210_v26  ;;  %v52_v42 = vld [vmem:[%s3173_s0 + $0x10] sm:$0xff]  ;;  %v2277_v45 = vld [vmem:[#allocation6 + $0x138] sm:$0xff]  ;;  %v2283_v47 = vld [vmem:[#allocation6 + $0x100] sm:$0xff] }
  0x15   :  { %437 = vmatpush.msrb.mxu3 %v2215_v27  ;;  %417 = vmatpush.msrb.mxu2 %v2217_v28  ;;  %v2279_v46 = vld [vmem:[#allocation6 + $0x130] sm:$0xff]  ;;  %v2285_v48 = vld [vmem:[#allocation6 + $0x108] sm:$0xff]  ;;  %v2289_v49 = vld [vmem:[#allocation6 + $0x118] sm:$0xff] }
  0x16   :  { %1807 = vmatmul.msk.f32.gmra.mxu0 %vm84_vm0, %v51_v29  ;;  %1815 = vmatmul.msk.f32.gmra.mxu1 %vm84_vm0, %v51_v29  ;;  %v2291_v50 = vld [vmem:[#allocation6 + $0x110] sm:$0xff]  ;;  %v2294_v51 = vld [vmem:[#allocation6 + $0xe0] sm:$0xff]  ;;  %v2296_v52 = vld [vmem:[#allocation6 + $0xe8] sm:$0xff] }
  0x17   :  { %1823 = vmatmul.msk.f32.gmra.mxu2 %vm84_vm0, %v51_v29  ;;  %1831 = vmatmul.msk.f32.gmra.mxu3 %vm84_vm0, %v51_v29  ;;  %v2301_v53 = vld [vmem:[#allocation6 + $0xf8] sm:$0xff]  ;;  %v2303_v54 = vld [vmem:[#allocation6 + $0xf0] sm:$0xff]  ;;  %v2312_v56 = vld [vmem:[#allocation6 + $0xc0] sm:$0xff] }
  0x18   :  { %378 = vmatpush.msrb.mxu0 %v2226_v30  ;;  %398 = vmatpush.msrb.mxu1 %v2228_v31  ;;  %v53_v55 = vld [vmem:[%s3173_s0 + $0x18] sm:$0xff]  ;;  %v2314_v57 = vld [vmem:[#allocation6 + $0xc8] sm:$0xff]  ;;  %v2322_v59 = vld [vmem:[#allocation6 + $0xd0] sm:$0xff] }
  0x19   :  { %438 = vmatpush.msrb.mxu3 %v2234_v32  ;;  %418 = vmatpush.msrb.mxu2 %v2236_v33  ;;  %v2320_v58 = vld [vmem:[#allocation6 + $0xd8] sm:$0xff]  ;;  %v2326_v60 = vld [vmem:[#allocation6 + $0xa0] sm:$0xff]  ;;  %v2328_v61 = vld [vmem:[#allocation6 + $0xa8] sm:$0xff] }
  0x1a   :  { %379 = vmatpush.msrb.mxu0 %v2240_v34  ;;  %399 = vmatpush.msrb.mxu1 %v2242_v35  ;;  %3263 = vst [vmem:[#allocation9_spill] sm:$0xff] %v2320_v58  ;;  %v2332_v62 = vld [vmem:[#allocation6 + $0xb8] sm:$0xff]  ;;  %v2334_v63 = vld [vmem:[#allocation6 + $0xb0] sm:$0xff]  ;;  %v2337_v0 = vld [vmem:[#allocation6 + $0x80] sm:$0xff] }
  0x1b   :  { %439 = vmatpush.msrb.mxu3 %v2246_v36  ;;  %419 = vmatpush.msrb.mxu2 %v2248_v37  ;;  %3264 = vst [vmem:[#allocation10_spill] sm:$0xff] %v2326_v60  ;;  %v2339_v1 = vld [vmem:[#allocation6 + $0x88] sm:$0xff]  ;;  %v2344_v2 = vld [vmem:[#allocation6 + $0x98] sm:$0xff]  ;;  %v2346_v3 = vld [vmem:[#allocation6 + $0x90] sm:$0xff] }
  0x1c   :  { %380 = vmatpush.msrb.mxu0 %v2251_v38  ;;  %400 = vmatpush.msrb.mxu1 %v2253_v39  ;;  %3265 = vst [vmem:[#allocation11_spill] sm:$0xff] %v2328_v61  ;;  %v54_v4 = vld [vmem:[%s3173_s0 + $0x20] sm:$0xff]  ;;  %v2357_v6 = vld [vmem:[#allocation6 + $0x68] sm:$0xff]  ;;  %v2363_v7 = vld [vmem:[#allocation6 + $0x78] sm:$0xff] }
  0x1d   :  { %440 = vmatpush.msrb.mxu3 %v2258_v40  ;;  %420 = vmatpush.msrb.mxu2 %v2260_v41  ;;  %3266 = vst [vmem:[#allocation12_spill] sm:$0xff] %v2332_v62  ;;  %v2355_v5 = vld [vmem:[#allocation6 + $0x60] sm:$0xff]  ;;  %v2365_v8 = vld [vmem:[#allocation6 + $0x70] sm:$0xff]  ;;  %v2371_v10 = vld [vmem:[#allocation6 + $0x48] sm:$0xff] }
  0x1e   :  { %1808 = vmatmul.msk.f32.gmra.mxu0 %vm84_vm0, %v52_v42  ;;  %1816 = vmatmul.msk.f32.gmra.mxu1 %vm84_vm0, %v52_v42  ;;  %3267 = vst [vmem:[#allocation13_spill] sm:$0xff] %v2334_v63  ;;  %v2369_v9 = vld [vmem:[#allocation6 + $0x40] sm:$0xff]  ;;  %v2375_v11 = vld [vmem:[#allocation6 + $0x58] sm:$0xff]  ;;  %v2377_v12 = vld [vmem:[#allocation6 + $0x50] sm:$0xff] }
  0x1f   :  { %1824 = vmatmul.msk.f32.gmra.mxu2 %vm84_vm0, %v52_v42  ;;  %1832 = vmatmul.msk.f32.gmra.mxu3 %vm84_vm0, %v52_v42  ;;  %3268 = vst [vmem:[#allocation14_spill] sm:$0xff] %v2337_v0  ;;  %v2380_v13 = vld [vmem:[#allocation6 + $0x20] sm:$0xff]  ;;  %v2382_v14 = vld [vmem:[#allocation6 + $0x28] sm:$0xff]  ;;  %v2387_v15 = vld [vmem:[#allocation6 + $0x30] sm:$0xff] }
  0x20   :  { %381 = vmatpush.msrb.mxu0 %v2269_v43  ;;  %401 = vmatpush.msrb.mxu1 %v2271_v44  ;;  %3269 = vst [vmem:[#allocation15_spill] sm:$0xff] %v2339_v1  ;;  %v2389_v16 = vld [vmem:[#allocation6 + $0x38] sm:$0xff]  ;;  %v55_v29 = vld [vmem:[%s3173_s0 + $0x28] sm:$0xff]  ;;  %v2398_v42 = vld [vmem:[#allocation6] sm:$0xff] }
  0x21   :  { %441 = vmatpush.msrb.mxu3 %v2277_v45  ;;  %421 = vmatpush.msrb.mxu2 %v2279_v46  ;;  %3270 = vst [vmem:[#allocation16_spill] sm:$0xff] %v2344_v2 }
  0x22   :  { %382 = vmatpush.msrb.mxu0 %v2283_v47  ;;  %402 = vmatpush.msrb.mxu1 %v2285_v48  ;;  %3271 = vst [vmem:[#allocation17_spill] sm:$0xff] %v2346_v3 }
  0x23   :  { %442 = vmatpush.msrb.mxu3 %v2289_v49  ;;  %422 = vmatpush.msrb.mxu2 %v2291_v50  ;;  %3272 = vst [vmem:[#allocation18_spill] sm:$0xff] %v2355_v5 }
  0x24   :  { %383 = vmatpush.msrb.mxu0 %v2294_v51  ;;  %403 = vmatpush.msrb.mxu1 %v2296_v52  ;;  %3273 = vst [vmem:[#allocation19_spill] sm:$0xff] %v2357_v6 }
  0x25   :  { %443 = vmatpush.msrb.mxu3 %v2301_v53  ;;  %423 = vmatpush.msrb.mxu2 %v2303_v54  ;;  %3274 = vst [vmem:[#allocation20_spill] sm:$0xff] %v2363_v7 }
  0x26   :  { %1809 = vmatmul.msk.f32.gmra.mxu0 %vm84_vm0, %v53_v55  ;;  %1817 = vmatmul.msk.f32.gmra.mxu1 %vm84_vm0, %v53_v55  ;;  %3275 = vst [vmem:[#allocation21_spill] sm:$0xff] %v2365_v8 }
  0x27   :  { %1825 = vmatmul.msk.f32.gmra.mxu2 %vm84_vm0, %v53_v55  ;;  %1833 = vmatmul.msk.f32.gmra.mxu3 %vm84_vm0, %v53_v55  ;;  %3276 = vst [vmem:[#allocation22_spill] sm:$0xff] %v2369_v9  ;;  %v2400_v55 = vld [vmem:[#allocation6 + $0x8] sm:$0xff] }
  0x28   :  { %384 = vmatpush.msrb.mxu0 %v2312_v56  ;;  %404 = vmatpush.msrb.mxu1 %v2314_v57  ;;  %3277 = vst [vmem:[#allocation23_spill] sm:$0xff] %v2371_v10 }
  0x29   :  { %444 = vmatpush.msrb.mxu3 %v2320_v58  ;;  %424 = vmatpush.msrb.mxu2 %v2322_v59  ;;  %3278 = vst [vmem:[#allocation24_spill] sm:$0xff] %v2375_v11 }
  0x2a   :  { %385 = vmatpush.msrb.mxu0 %v2326_v60  ;;  %405 = vmatpush.msrb.mxu1 %v2328_v61  ;;  %3279 = vst [vmem:[#allocation25_spill] sm:$0xff] %v2377_v12 }
  0x2b   :  { %445 = vmatpush.msrb.mxu3 %v2332_v62  ;;  %425 = vmatpush.msrb.mxu2 %v2334_v63  ;;  %3280 = vst [vmem:[#allocation26_spill] sm:$0xff] %v2380_v13 }
  0x2c   :  { %386 = vmatpush.msrb.mxu0 %v2337_v0  ;;  %406 = vmatpush.msrb.mxu1 %v2339_v1  ;;  %3281 = vst [vmem:[#allocation27_spill] sm:$0xff] %v2382_v14 }
  0x2d   :  { %446 = vmatpush.msrb.mxu3 %v2344_v2  ;;  %426 = vmatpush.msrb.mxu2 %v2346_v3  ;;  %3282 = vst [vmem:[#allocation28_spill] sm:$0xff] %v2387_v15 }
  0x2e   :  { %1810 = vmatmul.msk.f32.gmra.mxu0 %vm84_vm0, %v54_v4  ;;  %1818 = vmatmul.msk.f32.gmra.mxu1 %vm84_vm0, %v54_v4  ;;  %3283 = vst [vmem:[#allocation29_spill] sm:$0xff] %v2389_v16 }
  0x2f   :  { %1826 = vmatmul.msk.f32.gmra.mxu2 %vm84_vm0, %v54_v4  ;;  %1834 = vmatmul.msk.f32.gmra.mxu3 %vm84_vm0, %v54_v4  ;;  %3284 = vst [vmem:[#allocation30_spill] sm:$0xff] %v2398_v42  ;;  %v2406_v4 = vld [vmem:[#allocation6 + $0x10] sm:$0xff] }
  0x30   :  { %387 = vmatpush.msrb.mxu0 %v2355_v5  ;;  %407 = vmatpush.msrb.mxu1 %v2357_v6  ;;  %3285 = vst [vmem:[#allocation31_spill] sm:$0xff] %v2400_v55 }
  0x31   :  { %447 = vmatpush.msrb.mxu3 %v2363_v7  ;;  %427 = vmatpush.msrb.mxu2 %v2365_v8  ;;  %3286 = vst [vmem:[#allocation32_spill] sm:$0xff] %v2406_v4 }
  0x32   :  { %388 = vmatpush.msrb.mxu0 %v2369_v9  ;;  %408 = vmatpush.msrb.mxu1 %v2371_v10 }
  0x33   :  { %448 = vmatpush.msrb.mxu3 %v2375_v11  ;;  %428 = vmatpush.msrb.mxu2 %v2377_v12  ;;  %v2408_v11 = vld [vmem:[#allocation6 + $0x18] sm:$0xff] }
  0x34   :  { %389 = vmatpush.msrb.mxu0 %v2380_v13  ;;  %409 = vmatpush.msrb.mxu1 %v2382_v14  ;;  %3287 = vst [vmem:[#allocation33_spill] sm:$0xff] %v2408_v11 }
  0x35   :  { %429 = vmatpush.msrb.mxu2 %v2387_v15  ;;  %449 = vmatpush.msrb.mxu3 %v2389_v16  ;;  %v56_v16 = vld [vmem:[%s3173_s0 + $0x30] sm:$0xff] }
  0x36   :  { %1811 = vmatmul.msk.f32.gmra.mxu0 %vm84_vm0, %v55_v29  ;;  %1819 = vmatmul.msk.f32.gmra.mxu1 %vm84_vm0, %v55_v29 }
  0x37   :  { %1827 = vmatmul.msk.f32.gmra.mxu2 %vm84_vm0, %v55_v29  ;;  %1835 = vmatmul.msk.f32.gmra.mxu3 %vm84_vm0, %v55_v29  ;;  %v57_v29 = vld [vmem:[%s3173_s0 + $0x38] sm:$0xff] }
  0x38   :  { %390 = vmatpush.msrb.mxu0 %v2398_v42  ;;  %410 = vmatpush.msrb.mxu1 %v2400_v55 }
  0x39   :  { %430 = vmatpush.msrb.mxu2 %v2406_v4  ;;  %450 = vmatpush.msrb.mxu3 %v2408_v11 }
  0x3a   :  { %550 = vmatpush.msra.mxu0 %v2185_v17  ;;  %570 = vmatpush.msra.mxu1 %v2187_v18 }
  0x3b   :  { %590 = vmatpush.msra.mxu2 %v2193_v20  ;;  %610 = vmatpush.msra.mxu3 %v2191_v19 }
  0x3c   :  { %551 = vmatpush.msra.mxu0 %v2197_v21  ;;  %571 = vmatpush.msra.mxu1 %v2199_v22 }
  0x3d   :  { %591 = vmatpush.msra.mxu2 %v2205_v24  ;;  %611 = vmatpush.msra.mxu3 %v2203_v23 }
  0x3e   :  { %1812 = vmatmul.msk.f32.gmra.mxu0 %vm84_vm0, %v56_v16  ;;  %1820 = vmatmul.msk.f32.gmra.mxu1 %vm84_vm0, %v56_v16 }
  0x3f   :  { %1828 = vmatmul.msk.f32.gmra.mxu2 %vm84_vm0, %v56_v16  ;;  %1836 = vmatmul.msk.f32.gmra.mxu3 %vm84_vm0, %v56_v16  ;;  %v46_v16 = vld [vmem:[%s3177_s4] sm:$0xff] }
  0x40   :  { %552 = vmatpush.msra.mxu0 %v2208_v25  ;;  %572 = vmatpush.msra.mxu1 %v2210_v26 }
  0x41   :  { %592 = vmatpush.msra.mxu2 %v2217_v28  ;;  %612 = vmatpush.msra.mxu3 %v2215_v27 }
  0x42   :  { %553 = vmatpush.msra.mxu0 %v2226_v30  ;;  %573 = vmatpush.msra.mxu1 %v2228_v31 }
  0x43   :  { %593 = vmatpush.msra.mxu2 %v2236_v33  ;;  %613 = vmatpush.msra.mxu3 %v2234_v32 }
  0x44   :  { %554 = vmatpush.msra.mxu0 %v2240_v34  ;;  %574 = vmatpush.msra.mxu1 %v2242_v35 }
  0x45   :  { %594 = vmatpush.msra.mxu2 %v2248_v37  ;;  %614 = vmatpush.msra.mxu3 %v2246_v36 }
  0x46   :  { %1813 = vmatmul.msk.f32.gmra.mxu0 %vm84_vm0, %v57_v29  ;;  %1821 = vmatmul.msk.f32.gmra.mxu1 %vm84_vm0, %v57_v29 }
  0x47   :  { %1829 = vmatmul.msk.f32.gmra.mxu2 %vm84_vm0, %v57_v29  ;;  %1837 = vmatmul.msk.f32.gmra.mxu3 %vm84_vm0, %v57_v29  ;;  %v3288_v29 = vld [vmem:[#allocation24_spill] sm:$0xff] }
  0x48   :  { %555 = vmatpush.msra.mxu0 %v2251_v38  ;;  %575 = vmatpush.msra.mxu1 %v2253_v39 }
  0x49   :  { %595 = vmatpush.msra.mxu2 %v2260_v41  ;;  %615 = vmatpush.msra.mxu3 %v2258_v40 }
  0x4a   :  { %556 = vmatpush.msra.mxu0 %v2269_v43  ;;  %576 = vmatpush.msra.mxu1 %v2271_v44 }
  0x4b   :  { %596 = vmatpush.msra.mxu2 %v2279_v46  ;;  %616 = vmatpush.msra.mxu3 %v2277_v45 }
  0x4c   :  { %557 = vmatpush.msra.mxu0 %v2283_v47  ;;  %577 = vmatpush.msra.mxu1 %v2285_v48 }
  0x4d   :  { %597 = vmatpush.msra.mxu2 %v2291_v50  ;;  %617 = vmatpush.msra.mxu3 %v2289_v49 }
  0x4e   :  { %391 = vmatmul.f32.vlgmr.msrb.gmra.mxu0 %v46_v16  ;;  %411 = vmatmul.f32.vlgmr.msrb.gmra.mxu1 %v46_v16 }
  0x4f   :  { %431 = vmatmul.f32.vlgmr.msrb.gmra.mxu2 %v46_v16  ;;  %451 = vmatmul.f32.vlgmr.msrb.gmra.mxu3 %v46_v16  ;;  %v3289_v16 = vld [vmem:[#allocation29_spill] sm:$0xff] }
  0x50   :  { %558 = vmatpush.msra.mxu0 %v2294_v51  ;;  %578 = vmatpush.msra.mxu1 %v2296_v52 }
  0x51   :  { %598 = vmatpush.msra.mxu2 %v2303_v54  ;;  %618 = vmatpush.msra.mxu3 %v2301_v53 }
  0x52   :  { %559 = vmatpush.msra.mxu0 %v2312_v56  ;;  %579 = vmatpush.msra.mxu1 %v2314_v57 }
  0x53   :  { %599 = vmatpush.msra.mxu2 %v2322_v59  ;;  %619 = vmatpush.msra.mxu3 %v2320_v58 }
  0x54   :  { %560 = vmatpush.msra.mxu0 %v2326_v60  ;;  %580 = vmatpush.msra.mxu1 %v2328_v61 }
  0x55   :  { %600 = vmatpush.msra.mxu2 %v2334_v63  ;;  %620 = vmatpush.msra.mxu3 %v2332_v62 }
  0x56   :  { %561 = vmatpush.msra.mxu0 %v2337_v0  ;;  %581 = vmatpush.msra.mxu1 %v2339_v1 }
  0x57   :  { %601 = vmatpush.msra.mxu2 %v2346_v3  ;;  %621 = vmatpush.msra.mxu3 %v2344_v2 }
  0x58   :  { %562 = vmatpush.msra.mxu0 %v2355_v5  ;;  %582 = vmatpush.msra.mxu1 %v2357_v6 }
  0x59   :  { %602 = vmatpush.msra.mxu2 %v2365_v8  ;;  %622 = vmatpush.msra.mxu3 %v2363_v7 }
  0x5a   :  { %563 = vmatpush.msra.mxu0 %v2369_v9  ;;  %583 = vmatpush.msra.mxu1 %v2371_v10 }
  0x5b   :  { %603 = vmatpush.msra.mxu2 %v2377_v12  ;;  %623 = vmatpush.msra.mxu3 %v3288_v29 }
  0x5c   :  { %564 = vmatpush.msra.mxu0 %v2380_v13  ;;  %584 = vmatpush.msra.mxu1 %v2382_v14 }
  0x5d   :  { %604 = vmatpush.msra.mxu2 %v2387_v15  ;;  %624 = vmatpush.msra.mxu3 %v3289_v16 }
  0x5e   :  { %565 = vmatpush.msra.mxu0 %v2398_v42  ;;  %585 = vmatpush.msra.mxu1 %v2400_v55 }
  0x5f   :  { %605 = vmatpush.msra.mxu2 %v2406_v4  ;;  %625 = vmatpush.msra.mxu3 %v2408_v11 }
  0x60   :  { %725 = vmatpush.msrb.mxu0 %v2185_v17  ;;  %745 = vmatpush.msrb.mxu1 %v2187_v18 }
  0x61   :  { %765 = vmatpush.msrb.mxu2 %v2193_v20  ;;  %785 = vmatpush.msrb.mxu3 %v2191_v19 }
  0x62   :  { %726 = vmatpush.msrb.mxu0 %v2197_v21  ;;  %746 = vmatpush.msrb.mxu1 %v2199_v22 }
  0x63   :  { %766 = vmatpush.msrb.mxu2 %v2205_v24  ;;  %786 = vmatpush.msrb.mxu3 %v2203_v23 }
  0x64   :  { %727 = vmatpush.msrb.mxu0 %v2208_v25  ;;  %747 = vmatpush.msrb.mxu1 %v2210_v26 }
  0x65   :  { %767 = vmatpush.msrb.mxu2 %v2217_v28  ;;  %787 = vmatpush.msrb.mxu3 %v2215_v27 }
  0x66   :  { %728 = vmatpush.msrb.mxu0 %v2226_v30  ;;  %748 = vmatpush.msrb.mxu1 %v2228_v31 }
  0x67   :  { %768 = vmatpush.msrb.mxu2 %v2236_v33  ;;  %788 = vmatpush.msrb.mxu3 %v2234_v32 }
  0x68   :  { %729 = vmatpush.msrb.mxu0 %v2240_v34  ;;  %749 = vmatpush.msrb.mxu1 %v2242_v35 }
  0x69   :  { %769 = vmatpush.msrb.mxu2 %v2248_v37  ;;  %789 = vmatpush.msrb.mxu3 %v2246_v36 }
  0x6a   :  { %730 = vmatpush.msrb.mxu0 %v2251_v38  ;;  %750 = vmatpush.msrb.mxu1 %v2253_v39 }
  0x6b   :  { %770 = vmatpush.msrb.mxu2 %v2260_v41  ;;  %790 = vmatpush.msrb.mxu3 %v2258_v40 }
  0x6c   :  { %731 = vmatpush.msrb.mxu0 %v2269_v43  ;;  %751 = vmatpush.msrb.mxu1 %v2271_v44 }
  0x6d   :  { %771 = vmatpush.msrb.mxu2 %v2279_v46  ;;  %791 = vmatpush.msrb.mxu3 %v2277_v45 }
  0x6e   :  { %732 = vmatpush.msrb.mxu0 %v2283_v47  ;;  %752 = vmatpush.msrb.mxu1 %v2285_v48 }
  0x6f   :  { %772 = vmatpush.msrb.mxu2 %v2291_v50  ;;  %792 = vmatpush.msrb.mxu3 %v2289_v49 }
  0x70   :  { %733 = vmatpush.msrb.mxu0 %v2294_v51  ;;  %753 = vmatpush.msrb.mxu1 %v2296_v52 }
  0x71   :  { %773 = vmatpush.msrb.mxu2 %v2303_v54  ;;  %793 = vmatpush.msrb.mxu3 %v2301_v53 }
  0x72   :  { %734 = vmatpush.msrb.mxu0 %v2312_v56  ;;  %754 = vmatpush.msrb.mxu1 %v2314_v57 }
  0x73   :  { %774 = vmatpush.msrb.mxu2 %v2322_v59  ;;  %794 = vmatpush.msrb.mxu3 %v2320_v58 }
  0x74   :  { %735 = vmatpush.msrb.mxu0 %v2326_v60  ;;  %755 = vmatpush.msrb.mxu1 %v2328_v61 }
  0x75   :  { %775 = vmatpush.msrb.mxu2 %v2334_v63  ;;  %795 = vmatpush.msrb.mxu3 %v2332_v62 }
  0x76   :  { %736 = vmatpush.msrb.mxu0 %v2337_v0  ;;  %756 = vmatpush.msrb.mxu1 %v2339_v1 }
  0x77   :  { %776 = vmatpush.msrb.mxu2 %v2346_v3  ;;  %796 = vmatpush.msrb.mxu3 %v2344_v2 }
  0x78   :  { %737 = vmatpush.msrb.mxu0 %v2355_v5  ;;  %757 = vmatpush.msrb.mxu1 %v2357_v6 }
  0x79   :  { %777 = vmatpush.msrb.mxu2 %v2365_v8  ;;  %797 = vmatpush.msrb.mxu3 %v2363_v7 }
  0x7a   :  { %738 = vmatpush.msrb.mxu0 %v2369_v9  ;;  %758 = vmatpush.msrb.mxu1 %v2371_v10 }
  0x7b   :  { %778 = vmatpush.msrb.mxu2 %v2377_v12  ;;  %798 = vmatpush.msrb.mxu3 %v3288_v29 }
  0x7c   :  { %739 = vmatpush.msrb.mxu0 %v2380_v13  ;;  %759 = vmatpush.msrb.mxu1 %v2382_v14  ;;  %v74_v13 = vld [vmem:[%s3176_s3] sm:$0xf] }
  0x7d   :  { %779 = vmatpush.msrb.mxu2 %v2387_v15  ;;  %799 = vmatpush.msrb.mxu3 %v3289_v16  ;;  %v76_v29 = vperm.slane %v74_v13, 0  ;;  %v77_v14 = vperm.slane %v74_v13, 1 }
  0x7e   :  { %740 = vmatpush.msrb.mxu0 %v2398_v42  ;;  %760 = vmatpush.msrb.mxu1 %v2400_v55 }
  0x7f   :  { %780 = vmatpush.msrb.mxu2 %v2406_v4  ;;  %800 = vmatpush.msrb.mxu3 %v2408_v11  ;;  %v2572_v4 = vperm.slane %v74_v13, 2  ;;  %v79_v11 = vperm.slane %v74_v13, 3 }
  0x8b   :  { %v126_v10 = vpop.f32.mrf.mxu0  ;;  %v167_v12 = vpop.f32.mrf.mxu1 }
  0x92   :  { %v2564_v9 = vpop.f32.mrf.mxu2  ;;  %v2566_v15 = vpop.f32.mrf.mxu3 }
  0x93   :  { %v129_v16 = vpop.f32.mrf.mxu0  ;;  %v170_v42 = vpop.f32.mrf.mxu1 }
  0x94   :  { %v2568_v7 = vadd.f32 %v129_v16, %v76_v29  ;;  %v2570_v55 = vadd.f32 %v170_v42, %v77_v14 }
  0x96   :  { %3290 = vst [vmem:[#allocation34_spill] sm:$0xff] %v2568_v7 }
  0x97   :  { %3291 = vst [vmem:[#allocation35_spill] sm:$0xff] %v2570_v55 }
  0x9a   :  { %v211_v8 = vpop.f32.mrf.mxu2  ;;  %v252_v6 = vpop.f32.mrf.mxu3 }
  0x9b   :  { %v2575_v5 = vadd.f32 %v211_v8, %v2572_v4  ;;  %v2577_v2 = vadd.f32 %v252_v6, %v79_v11  ;;  %v132_v3 = vpop.f32.mrf.mxu0  ;;  %v173_v1 = vpop.f32.mrf.mxu1 }
  0x9c   :  { %v2579_v0 = vadd.f32 %v132_v3, %v76_v29  ;;  %v2581_v62 = vadd.f32 %v173_v1, %v77_v14 }
  0x9d   :  { %3292 = vst [vmem:[#allocation36_spill] sm:$0xff] %v2575_v5 }
  0x9e   :  { %3293 = vst [vmem:[#allocation37_spill] sm:$0xff] %v2577_v2 }
  0x9f   :  { %3294 = vst [vmem:[#allocation38_spill] sm:$0xff] %v2579_v0 }
  0xa0   :  { %3295 = vst [vmem:[#allocation39_spill] sm:$0xff] %v2581_v62 }
  0xa2   :  { %v214_v16 = vpop.f32.mrf.mxu2  ;;  %v255_v7 = vpop.f32.mrf.mxu3 }
  0xa3   :  { %v2584_v42 = vadd.f32 %v214_v16, %v2572_v4  ;;  %v2586_v55 = vadd.f32 %v255_v7, %v79_v11  ;;  %v135_v13 = vpop.f32.mrf.mxu0  ;;  %v176_v63 = vpop.f32.mrf.mxu1 }
  0xa4   :  { %v2588_v61 = vadd.f32 %v135_v13, %v76_v29  ;;  %v2590_v8 = vadd.f32 %v176_v63, %v77_v14 }
  0xa5   :  { %3296 = vst [vmem:[#allocation40_spill] sm:$0xff] %v2584_v42 }
  0xa6   :  { %3297 = vst [vmem:[#allocation41_spill] sm:$0xff] %v2586_v55 }
  0xa7   :  { %3298 = vst [vmem:[#allocation42_spill] sm:$0xff] %v2588_v61 }
  0xa8   :  { %3299 = vst [vmem:[#allocation43_spill] sm:$0xff] %v2590_v8 }
  0xaa   :  { %v217_v6 = vpop.f32.mrf.mxu2  ;;  %v258_v5 = vpop.f32.mrf.mxu3 }
  0xab   :  { %v2593_v3 = vadd.f32 %v217_v6, %v2572_v4  ;;  %v2595_v1 = vadd.f32 %v258_v5, %v79_v11  ;;  %v138_v62 = vpop.f32.mrf.mxu0  ;;  %v179_v0 = vpop.f32.mrf.mxu1 }
  0xac   :  { %v2597_v2 = vadd.f32 %v138_v62, %v76_v29  ;;  %v2599_v16 = vadd.f32 %v179_v0, %v77_v14 }
  0xad   :  { %3300 = vst [vmem:[#allocation44_spill] sm:$0xff] %v2593_v3 }
  0xae   :  { %3301 = vst [vmem:[#allocation45_spill] sm:$0xff] %v2595_v1 }
  0xaf   :  { %3302 = vst [vmem:[#allocation46_spill] sm:$0xff] %v2597_v2 }
  0xb0   :  { %3303 = vst [vmem:[#allocation47_spill] sm:$0xff] %v2599_v16 }
  0xb2   :  { %v220_v7 = vpop.f32.mrf.mxu2  ;;  %v261_v42 = vpop.f32.mrf.mxu3 }
  0xb3   :  { %v2602_v13 = vadd.f32 %v220_v7, %v2572_v4  ;;  %v2604_v63 = vadd.f32 %v261_v42, %v79_v11  ;;  %v141_v8 = vpop.f32.mrf.mxu0  ;;  %v182_v61 = vpop.f32.mrf.mxu1 }
  0xb4   :  { %v2606_v55 = vadd.f32 %v141_v8, %v76_v29  ;;  %v2608_v6 = vadd.f32 %v182_v61, %v77_v14 }
  0xb5   :  { %3304 = vst [vmem:[#allocation48_spill] sm:$0xff] %v2602_v13 }
  0xb6   :  { %3305 = vst [vmem:[#allocation49_spill] sm:$0xff] %v2604_v63 }
  0xb7   :  { %3306 = vst [vmem:[#allocation50_spill] sm:$0xff] %v2606_v55 }
  0xb8   :  { %3307 = vst [vmem:[#allocation51_spill] sm:$0xff] %v2608_v6 }
  0xba   :  { %v223_v5 = vpop.f32.mrf.mxu2  ;;  %v264_v3 = vpop.f32.mrf.mxu3 }
  0xbb   :  { %v2611_v62 = vadd.f32 %v223_v5, %v2572_v4  ;;  %v2613_v0 = vadd.f32 %v264_v3, %v79_v11  ;;  %v144_v16 = vpop.f32.mrf.mxu0  ;;  %v185_v2 = vpop.f32.mrf.mxu1  ;;  %v127_v3 = vadd.f32 %v126_v10, %v76_v29 }
  0xbc   :  { %v2615_v1 = vadd.f32 %v144_v16, %v76_v29  ;;  %v2617_v7 = vadd.f32 %v185_v2, %v77_v14 }
  0xbd   :  { %3308 = vst [vmem:[#allocation52_spill] sm:$0xff] %v2611_v62  ;;  %v168_v62 = vadd.f32 %v167_v12, %v77_v14 }
  0xbe   :  { %3309 = vst [vmem:[#allocation53_spill] sm:$0xff] %v2613_v0 }
  0xbf   :  { %3310 = vst [vmem:[#allocation54_spill] sm:$0xff] %v2615_v1 }
  0xc0   :  { %3311 = vst [vmem:[#allocation55_spill] sm:$0xff] %v2617_v7 }
  0xc2   :  { %v226_v42 = vpop.f32.mrf.mxu2  ;;  %v267_v13 = vpop.f32.mrf.mxu3 }
  0xc3   :  { %v2620_v8 = vadd.f32 %v226_v42, %v2572_v4  ;;  %v2622_v61 = vadd.f32 %v267_v13, %v79_v11  ;;  %v147_v6 = vpop.f32.mrf.mxu0  ;;  %v188_v55 = vpop.f32.mrf.mxu1 }
  0xc4   :  { %v2624_v63 = vadd.f32 %v147_v6, %v76_v29  ;;  %v2626_v5 = vadd.f32 %v188_v55, %v77_v14  ;;  %v250_v6 = vadd.f32 %v2566_v15, %v79_v11 }
  0xc5   :  { %3312 = vst [vmem:[#allocation56_spill] sm:$0xff] %v2620_v8 }
  0xc6   :  { %3313 = vst [vmem:[#allocation57_spill] sm:$0xff] %v2622_v61 }
  0xc7   :  { %3314 = vst [vmem:[#allocation58_spill] sm:$0xff] %v2624_v63 }
  0xc8   :  { %3315 = vst [vmem:[#allocation59_spill] sm:$0xff] %v2626_v5 }
  0xca   :  { %v229_v0 = vpop.f32.mrf.mxu2  ;;  %v270_v16 = vpop.f32.mrf.mxu3 }
  0xcb   :  { %v2629_v2 = vadd.f32 %v229_v0, %v2572_v4  ;;  %v2631_v7 = vadd.f32 %v270_v16, %v79_v11  ;;  %v392_v1 = vpop.f32.mrf.mxu0  ;;  %v412_v42 = vpop.f32.mrf.mxu1 }
  0xcc   :  { %v455_v8 = vadd.f32 %v392_v1, %v127_v3  ;;  %v456_v13 = vadd.f32 %v412_v42, %v168_v62  ;;  %v209_v1 = vadd.f32 %v2564_v9, %v2572_v4 }
  0xcd   :  { %3316 = vst [vmem:[#allocation60_spill] sm:$0xff] %v2629_v2 }
  0xce   :  { %3317 = vst [vmem:[#allocation61_spill] sm:$0xff] %v2631_v7  ;;  %v1838_v61 = vmul.f32 -1.442695, %v455_v8  ;;  %v1839_v60 = vmul.f32 -1.442695, %v456_v13 }
  0xd0   :  { %1865 = vpow2.f32 %v1838_v61 }
  0xd1   :  { %1867 = vpow2.f32 %v1839_v60 }
  0xd2   :  { %v452_v55 = vpop.f32.mrf.mxu3  ;;  %v432_v16 = vpop.f32.mrf.mxu2 }
  0xd3   :  { %v458_v10 = vadd.f32 %v452_v55, %v250_v6  ;;  %v457_v61 = vadd.f32 %v432_v16, %v209_v1 }
  0xd5   :  { %v1840_v12 = vmul.f32 -1.442695, %v458_v10 }
  0xd6   :  { %v1866_v14 = vpop.eup %1865 }
  0xd7   :  { %v1868_v29 = vpop.eup %1867  ;;  %v462_v5 = vadd.f32 1.0, %v1866_v14  ;;  %1869 = vpow2.f32 %v1840_v12 }
  0xd8   :  { %v481_v0 = vadd.f32 1.0, %v1868_v29 }
  0xd9   :  { %1871 = vrcp.f32 %v462_v5  ;;  %v474_v13 = vand.u32 2147483648, %v462_v5  ;;  %v472_v10 = vand.u32 2147483647, %v462_v5  ;;  %vm468_vm3 = vweird.f32 %v462_v5 }
  0xda   :  { %1873 = vrcp.f32 %v481_v0  ;;  %v493_v6 = vand.u32 2147483648, %v481_v0  ;;  %v491_v14 = vand.u32 2147483647, %v481_v0  ;;  %vm487_vm4 = vweird.f32 %v481_v0 }
  0xdb   :  { %v475_v4 = vor.u32 1.1754944e-38, %v474_v13  ;;  %vm473_vm7 = vcmp.eq.f32.partialorder %v472_v10, 8.507059e+37 }
  0xdc   :  { %v494_v1 = vor.u32 1.1754944e-38, %v493_v6  ;;  %vm492_vm8 = vcmp.eq.f32.partialorder %v491_v14, 8.507059e+37 }
  0xdd   :  { %v1870_v2 = vpop.eup %1869 }
  0xde   :  { %v501_v62 = vadd.f32 1.0, %v1870_v2 }
  0xdf   :  { %v1872_v8 = vpop.eup %1871 }
  0xe0   :  { %v1874_v11 = vpop.eup %1873  ;;  %v464_v60 = vmul.f32 %v1872_v8, %v462_v5  ;;  %1875 = vrcp.f32 %v501_v62  ;;  %vm469_vm1 = vweird.f32 %v1872_v8  ;;  %v513_v6 = vand.u32 2147483648, %v501_v62 }
  0xe1   :  { %v483_v15 = vmul.f32 %v1874_v11, %v481_v0  ;;  %1877 = vtanh.f32 %v457_v61  ;;  %vm488_vm2 = vweird.f32 %v1874_v11  ;;  %vm470_vm5 = vmor %vm468_vm3, %vm469_vm1  ;;  %v48_v61 = vld [vmem:[%s3178_s5] sm:$0xff]  ;;  %vm507_vm10 = vweird.f32 %v501_v62 }
  0xe2   :  { %v465_v3 = vsub.f32 1.0, %v464_v60  ;;  %vm489_vm6 = vmor %vm487_vm4, %vm488_vm2  ;;  %v511_v58 = vand.u32 2147483647, %v501_v62  ;;  %v514_v10 = vor.u32 1.1754944e-38, %v513_v6 }
  0xe3   :  { %v484_v42 = vsub.f32 1.0, %v483_v15 }
  0xe4   :  { %v466_v55 = vmul.f32 %v1872_v8, %v465_v3  ;;  %vm512_vm12 = vcmp.eq.f32.partialorder %v511_v58, 8.507059e+37 }
  0xe5   :  { %v485_v12 = vmul.f32 %v1874_v11, %v484_v42 }
  0xe6   :  { %v1876_v29 = vpop.eup %1875  ;;  %v467_v9 = vadd.f32 %v1872_v8, %v466_v55 }
  0xe7   :  { %v486_v2 = vadd.f32 %v1874_v11, %v485_v12  ;;  %v503_v16 = vmul.f32 %v1876_v29, %v501_v62  ;;  %v1878_v15 = vpop.eup %1877  ;;  %vm508_vm9 = vweird.f32 %v1876_v29 }
  0xe8   :  { %v471_v60 = vsel %vm470_vm5, %v1872_v8, %v467_v9  ;;  %vm509_vm11 = vmor %vm507_vm10, %vm508_vm9 }
  0xe9   :  { %v476_v3 = vsel %vm473_vm7, %v475_v4, %v471_v60  ;;  %v490_v42 = vsel %vm489_vm6, %v1874_v11, %v486_v2  ;;  %v504_v7 = vsub.f32 1.0, %v503_v16 }
  0xea   :  { %v495_v55 = vsel %vm492_vm8, %v494_v1, %v490_v42  ;;  %v518_v5 = vmul.f32 %v1878_v15, %v476_v3  ;;  %v3346_v42 = vld [vmem:[#allocation36_spill] sm:$0xff] }
  0xeb   :  { %v517_v0 = vmul.f32 %v495_v55, %v48_v61  ;;  %v505_v63 = vmul.f32 %v1876_v29, %v504_v7 }
  0xed   :  { %v2639_v13 = vadd.f32 %v518_v5, %v517_v0  ;;  %v506_v12 = vadd.f32 %v1876_v29, %v505_v63 }
  0xef   :  { %1879 = vtanh.f32 %v2639_v13  ;;  %v510_v8 = vsel %vm509_vm11, %v1876_v29, %v506_v12 }
  0xf0   :  { %v515_v14 = vsel %vm512_vm12, %v514_v10, %v510_v8 }
  0xf5   :  { %v1880_v11 = vpop.eup %1879 }
  0xf6   :  { %v521_v9 = vmul.f32 %v1880_v11, %v515_v14 }
  0xf8   :  { %v523_v4 = vrot.slane %v521_v9, 1  ;;  %v524_v2 = vrot.slane %v521_v9, 2  ;;  %v525_v16 = vrot.slane %v521_v9, 3  ;;  %537 = vst [vmem:[#allocation3] sm:$0x1] %v521_v9  ;;  %566 = vmatmul.f32.vlgmr.msra.gmra.mxu0 %v521_v9  ;;  %586 = vmatmul.f32.vlgmr.msra.gmra.mxu1 %v521_v9  ;;  %v526_v63 = vrot.slane %v521_v9, 4 }
  0xf9   :  { %606 = vmatmul.f32.vlgmr.msra.gmra.mxu2 %v521_v9  ;;  %626 = vmatmul.f32.vlgmr.msra.gmra.mxu3 %v521_v9  ;;  %v527_v7 = vrot.slane %v521_v9, 5  ;;  %v528_v62 = vrot.slane %v521_v9, 6  ;;  %v529_v58 = vrot.slane %v521_v9, 7 }
  0xfa   :  { %538 = vst [vmem:[#allocation3 + $0x8] sm:$0x1] %v523_v4  ;;  %900 = vmatpush.msra.mxu0 %v2185_v17  ;;  %920 = vmatpush.msra.mxu1 %v2187_v18  ;;  %v3318_v17 = vld [vmem:[#allocation9_spill] sm:$0xff]  ;;  %v3319_v18 = vld [vmem:[#allocation10_spill] sm:$0xff] }
  0xfb   :  { %539 = vst [vmem:[#allocation3 + $0x10] sm:$0x1] %v524_v2  ;;  %940 = vmatpush.msra.mxu2 %v2193_v20  ;;  %960 = vmatpush.msra.mxu3 %v2191_v19  ;;  %v3320_v19 = vld [vmem:[#allocation11_spill] sm:$0xff]  ;;  %v3321_v20 = vld [vmem:[#allocation13_spill] sm:$0xff] }
  0xfc   :  { %540 = vst [vmem:[#allocation3 + $0x18] sm:$0x1] %v525_v16  ;;  %901 = vmatpush.msra.mxu0 %v2197_v21  ;;  %921 = vmatpush.msra.mxu1 %v2199_v22  ;;  %v3322_v21 = vld [vmem:[#allocation12_spill] sm:$0xff]  ;;  %v3323_v22 = vld [vmem:[#allocation14_spill] sm:$0xff] }
  0xfd   :  { %541 = vst [vmem:[#allocation3 + $0x20] sm:$0x1] %v526_v63  ;;  %941 = vmatpush.msra.mxu2 %v2205_v24  ;;  %961 = vmatpush.msra.mxu3 %v2203_v23  ;;  %v3324_v23 = vld [vmem:[#allocation15_spill] sm:$0xff]  ;;  %v3325_v24 = vld [vmem:[#allocation17_spill] sm:$0xff] }
  0xfe   :  { %542 = vst [vmem:[#allocation3 + $0x28] sm:$0x1] %v527_v7  ;;  %902 = vmatpush.msra.mxu0 %v2208_v25  ;;  %922 = vmatpush.msra.mxu1 %v2210_v26  ;;  %v3326_v25 = vld [vmem:[#allocation16_spill] sm:$0xff]  ;;  %v3327_v26 = vld [vmem:[#allocation18_spill] sm:$0xff] }
  0xff   :  { %543 = vst [vmem:[#allocation3 + $0x30] sm:$0x1] %v528_v62  ;;  %942 = vmatpush.msra.mxu2 %v2217_v28  ;;  %962 = vmatpush.msra.mxu3 %v2215_v27  ;;  %v3328_v27 = vld [vmem:[#allocation19_spill] sm:$0xff]  ;;  %v3329_v28 = vld [vmem:[#allocation21_spill] sm:$0xff] }
 0x100   :  { %544 = vst [vmem:[#allocation3 + $0x38] sm:$0x1] %v529_v58  ;;  %903 = vmatpush.msra.mxu0 %v2226_v30  ;;  %923 = vmatpush.msra.mxu1 %v2228_v31  ;;  %v3330_v30 = vld [vmem:[#allocation20_spill] sm:$0xff]  ;;  %v3331_v31 = vld [vmem:[#allocation22_spill] sm:$0xff] }
 0x101   :  { %943 = vmatpush.msra.mxu2 %v2236_v33  ;;  %963 = vmatpush.msra.mxu3 %v2234_v32  ;;  %v3332_v32 = vld [vmem:[#allocation23_spill] sm:$0xff]  ;;  %v3333_v33 = vld [vmem:[#allocation25_spill] sm:$0xff] }
 0x102   :  { %904 = vmatpush.msra.mxu0 %v2240_v34  ;;  %924 = vmatpush.msra.mxu1 %v2242_v35  ;;  %v3334_v34 = vld [vmem:[#allocation24_spill] sm:$0xff]  ;;  %v3335_v35 = vld [vmem:[#allocation26_spill] sm:$0xff] }
 0x103   :  { %944 = vmatpush.msra.mxu2 %v2248_v37  ;;  %964 = vmatpush.msra.mxu3 %v2246_v36  ;;  %v3336_v36 = vld [vmem:[#allocation27_spill] sm:$0xff]  ;;  %v3337_v37 = vld [vmem:[#allocation28_spill] sm:$0xff] }
 0x104   :  { %905 = vmatpush.msra.mxu0 %v2251_v38  ;;  %925 = vmatpush.msra.mxu1 %v2253_v39  ;;  %v3338_v38 = vld [vmem:[#allocation29_spill] sm:$0xff]  ;;  %v3339_v39 = vld [vmem:[#allocation30_spill] sm:$0xff] }
 0x105   :  { %945 = vmatpush.msra.mxu2 %v2260_v41  ;;  %965 = vmatpush.msra.mxu3 %v2258_v40  ;;  %v3340_v40 = vld [vmem:[#allocation31_spill] sm:$0xff]  ;;  %v3341_v41 = vld [vmem:[#allocation32_spill] sm:$0xff] }
 0x106   :  { %906 = vmatpush.msra.mxu0 %v2269_v43  ;;  %926 = vmatpush.msra.mxu1 %v2271_v44  ;;  %v3342_v43 = vld [vmem:[#allocation33_spill] sm:$0xff] }
 0x107   :  { %946 = vmatpush.msra.mxu2 %v2279_v46  ;;  %966 = vmatpush.msra.mxu3 %v2277_v45  ;;  %v3343_v46 = vld [vmem:[#allocation34_spill] sm:$0xff] }
 0x108   :  { %907 = vmatpush.msra.mxu0 %v2283_v47  ;;  %927 = vmatpush.msra.mxu1 %v2285_v48  ;;  %v3344_v48 = vld [vmem:[#allocation35_spill] sm:$0xff] }
 0x109   :  { %947 = vmatpush.msra.mxu2 %v2291_v50  ;;  %967 = vmatpush.msra.mxu3 %v2289_v49 }
 0x10a   :  { %908 = vmatpush.msra.mxu0 %v2294_v51  ;;  %928 = vmatpush.msra.mxu1 %v2296_v52 }
 0x10b   :  { %948 = vmatpush.msra.mxu2 %v2303_v54  ;;  %968 = vmatpush.msra.mxu3 %v2301_v53  ;;  %v3345_v53 = vld [vmem:[#allocation37_spill] sm:$0xff] }
 0x10c   :  { %909 = vmatpush.msra.mxu0 %v2312_v56  ;;  %929 = vmatpush.msra.mxu1 %v2314_v57 }
 0x10d   :  { %949 = vmatpush.msra.mxu2 %v2322_v59  ;;  %969 = vmatpush.msra.mxu3 %v3318_v17 }
 0x10e   :  { %910 = vmatpush.msra.mxu0 %v3319_v18  ;;  %930 = vmatpush.msra.mxu1 %v3320_v19 }
 0x10f   :  { %950 = vmatpush.msra.mxu2 %v3321_v20  ;;  %970 = vmatpush.msra.mxu3 %v3322_v21 }
 0x110   :  { %911 = vmatpush.msra.mxu0 %v3323_v22  ;;  %931 = vmatpush.msra.mxu1 %v3324_v23 }
 0x111   :  { %951 = vmatpush.msra.mxu2 %v3325_v24  ;;  %971 = vmatpush.msra.mxu3 %v3326_v25 }
 0x112   :  { %912 = vmatpush.msra.mxu0 %v3327_v26  ;;  %932 = vmatpush.msra.mxu1 %v3328_v27 }
 0x113   :  { %952 = vmatpush.msra.mxu2 %v3329_v28  ;;  %972 = vmatpush.msra.mxu3 %v3330_v30 }
 0x114   :  { %913 = vmatpush.msra.mxu0 %v3331_v31  ;;  %933 = vmatpush.msra.mxu1 %v3332_v32 }
 0x115   :  { %953 = vmatpush.msra.mxu2 %v3333_v33  ;;  %973 = vmatpush.msra.mxu3 %v3334_v34 }
 0x116   :  { %914 = vmatpush.msra.mxu0 %v3335_v35  ;;  %934 = vmatpush.msra.mxu1 %v3336_v36 }
 0x117   :  { %954 = vmatpush.msra.mxu2 %v3337_v37  ;;  %974 = vmatpush.msra.mxu3 %v3338_v38 }
 0x118   :  { %915 = vmatpush.msra.mxu0 %v3339_v39  ;;  %935 = vmatpush.msra.mxu1 %v3340_v40 }
 0x119   :  { %955 = vmatpush.msra.mxu2 %v3341_v41  ;;  %975 = vmatpush.msra.mxu3 %v3342_v43  ;;  %v2714_v41 = vld [vmem:[#allocation6 + $0x1e0] sm:$0xff]  ;;  %v2717_v43 = vld [vmem:[#allocation6 + $0x1e8] sm:$0xff] }
 0x175   :  { %v567_v44 = vpop.f32.mrf.mxu0  ;;  %v587_v45 = vpop.f32.mrf.mxu1 }
 0x176   :  { %v630_v47 = vadd.f32 %v567_v44, %v3343_v46  ;;  %v631_v49 = vadd.f32 %v587_v45, %v3344_v48  ;;  %v2720_v45 = vld [vmem:[#allocation6 + $0x1f0] sm:$0xff]  ;;  %v2723_v46 = vld [vmem:[#allocation6 + $0x1f8] sm:$0xff]  ;;  %v2726_v48 = vld [vmem:[#allocation6 + $0x1c0] sm:$0xff] }
 0x178   :  { %v1841_v50 = vmul.f32 -1.442695, %v630_v47  ;;  %v1842_v51 = vmul.f32 -1.442695, %v631_v49  ;;  %v2729_v49 = vld [vmem:[#allocation6 + $0x1c8] sm:$0xff] }
 0x17a   :  { %1881 = vpow2.f32 %v1841_v50  ;;  %v2732_v50 = vld [vmem:[#allocation6 + $0x1d0] sm:$0xff] }
 0x17b   :  { %1883 = vpow2.f32 %v1842_v51  ;;  %v2735_v51 = vld [vmem:[#allocation6 + $0x1d8] sm:$0xff] }
 0x17c   :  { %v627_v52 = vpop.f32.mrf.mxu3  ;;  %v607_v61 = vpop.f32.mrf.mxu2 }
 0x17d   :  { %v633_v54 = vadd.f32 %v627_v52, %v3345_v53  ;;  %v632_v55 = vadd.f32 %v607_v61, %v3346_v42  ;;  %v2738_v52 = vld [vmem:[#allocation6 + $0x1a0] sm:$0xff]  ;;  %v2741_v53 = vld [vmem:[#allocation6 + $0x1a8] sm:$0xff] }
 0x17e   :  { %v2762_v61 = vld [vmem:[#allocation6 + $0x160] sm:$0xff] }
 0x17f   :  { %v1843_v56 = vmul.f32 -1.442695, %v633_v54  ;;  %v2744_v54 = vld [vmem:[#allocation6 + $0x1b0] sm:$0xff]  ;;  %v2774_v42 = vld [vmem:[#allocation6 + $0x140] sm:$0xff] }
 0x180   :  { %v1882_v57 = vpop.eup %1881 }
 0x181   :  { %v1884_v59 = vpop.eup %1883  ;;  %v637_v29 = vadd.f32 1.0, %v1882_v57  ;;  %1885 = vpow2.f32 %v1843_v56  ;;  %v2747_v56 = vld [vmem:[#allocation6 + $0x1b8] sm:$0xff]  ;;  %v2750_v57 = vld [vmem:[#allocation6 + $0x180] sm:$0xff] }
 0x182   :  { %v656_v1 = vadd.f32 1.0, %v1884_v59  ;;  %v2753_v59 = vld [vmem:[#allocation6 + $0x188] sm:$0xff] }
 0x183   :  { %1887 = vrcp.f32 %v637_v29  ;;  %v649_v10 = vand.u32 2147483648, %v637_v29  ;;  %v647_v9 = vand.u32 2147483647, %v637_v29  ;;  %vm643_vm15 = vweird.f32 %v637_v29 }
 0x184   :  { %1889 = vrcp.f32 %v656_v1  ;;  %v668_v11 = vand.u32 2147483648, %v656_v1  ;;  %v666_v2 = vand.u32 2147483647, %v656_v1  ;;  %vm662_vm0 = vweird.f32 %v656_v1 }
 0x185   :  { %v650_v7 = vor.u32 1.1754944e-38, %v649_v10  ;;  %vm648_vm3 = vcmp.eq.f32.partialorder %v647_v9, 8.507059e+37  ;;  %v2795_v10 = vld [vmem:[#allocation6 + $0x138] sm:$0xff]  ;;  %v2804_v9 = vld [vmem:[#allocation6 + $0x110] sm:$0xff] }
 0x186   :  { %v669_v17 = vor.u32 1.1754944e-38, %v668_v11  ;;  %vm667_vm4 = vcmp.eq.f32.partialorder %v666_v2, 8.507059e+37  ;;  %v2798_v11 = vld [vmem:[#allocation6 + $0x100] sm:$0xff] }
 0x187   :  { %v1886_v60 = vpop.eup %1885  ;;  %v2810_v2 = vld [vmem:[#allocation6 + $0xe0] sm:$0xff] }
 0x188   :  { %v676_v15 = vadd.f32 1.0, %v1886_v60  ;;  %v2765_v60 = vld [vmem:[#allocation6 + $0x168] sm:$0xff] }
 0x189   :  { %v1888_v3 = vpop.eup %1887 }
 0x18a   :  { %v1890_v5 = vpop.eup %1889  ;;  %v639_v0 = vmul.f32 %v1888_v3, %v637_v29  ;;  %1891 = vrcp.f32 %v676_v15  ;;  %vm644_vm13 = vweird.f32 %v1888_v3  ;;  %v688_v30 = vand.u32 2147483648, %v676_v15  ;;  %v2756_v29 = vld [vmem:[#allocation6 + $0x190] sm:$0xff] }
 0x18b   :  { %v658_v12 = vmul.f32 %v1890_v5, %v656_v1  ;;  %1893 = vtanh.f32 %v632_v55  ;;  %vm663_vm14 = vweird.f32 %v1890_v5  ;;  %vm645_vm1 = vmor %vm643_vm15, %vm644_vm13  ;;  %vm682_vm6 = vweird.f32 %v676_v15  ;;  %v2759_v1 = vld [vmem:[#allocation6 + $0x198] sm:$0xff]  ;;  %v2777_v55 = vld [vmem:[#allocation6 + $0x148] sm:$0xff] }
 0x18c   :  { %v640_v6 = vsub.f32 1.0, %v639_v0  ;;  %vm664_vm2 = vmor %vm662_vm0, %vm663_vm14  ;;  %v686_v31 = vand.u32 2147483647, %v676_v15  ;;  %v689_v33 = vor.u32 1.1754944e-38, %v688_v30  ;;  %v2783_v0 = vld [vmem:[#allocation6 + $0x158] sm:$0xff]  ;;  %v2861_v30 = vld [vmem:[#allocation6 + $0x68] sm:$0xff] }
 0x18d   :  { %v659_v8 = vsub.f32 1.0, %v658_v12  ;;  %v2786_v12 = vld [vmem:[#allocation6 + $0x120] sm:$0xff]  ;;  %3358 = vst [vmem:[#allocation21_spill] sm:$0xff] %v2861_v30 }
 0x18e   :  { %v641_v14 = vmul.f32 %v1888_v3, %v640_v6  ;;  %vm687_vm8 = vcmp.eq.f32.partialorder %v686_v31, 8.507059e+37  ;;  %v2789_v6 = vld [vmem:[#allocation6 + $0x128] sm:$0xff]  ;;  %v2864_v31 = vld [vmem:[#allocation6 + $0x70] sm:$0xff] }
 0x18f   :  { %v660_v4 = vmul.f32 %v1890_v5, %v659_v8  ;;  %v2792_v8 = vld [vmem:[#allocation6 + $0x130] sm:$0xff]  ;;  %3359 = vst [vmem:[#allocation20_spill] sm:$0xff] %v2864_v31 }
 0x190   :  { %v1892_v16 = vpop.eup %1891  ;;  %v642_v63 = vadd.f32 %v1888_v3, %v641_v14  ;;  %v2801_v14 = vld [vmem:[#allocation6 + $0x108] sm:$0xff] }
 0x191   :  { %v661_v62 = vadd.f32 %v1890_v5, %v660_v4  ;;  %v678_v58 = vmul.f32 %v1892_v16, %v676_v15  ;;  %v1894_v19 = vpop.eup %1893  ;;  %vm683_vm5 = vweird.f32 %v1892_v16  ;;  %v2768_v15 = vld [vmem:[#allocation6 + $0x170] sm:$0xff]  ;;  %v2807_v4 = vld [vmem:[#allocation6 + $0x118] sm:$0xff] }
 0x192   :  { %v646_v18 = vsel %vm645_vm1, %v1888_v3, %v642_v63  ;;  %vm684_vm7 = vmor %vm682_vm6, %vm683_vm5  ;;  %v2771_v3 = vld [vmem:[#allocation6 + $0x178] sm:$0xff]  ;;  %v2816_v63 = vld [vmem:[#allocation6 + $0xf0] sm:$0xff] }
 0x193   :  { %v651_v20 = vsel %vm648_vm3, %v650_v7, %v646_v18  ;;  %v665_v21 = vsel %vm664_vm2, %v1890_v5, %v661_v62  ;;  %v679_v22 = vsub.f32 1.0, %v678_v58  ;;  %v2780_v5 = vld [vmem:[#allocation6 + $0x150] sm:$0xff]  ;;  %v2819_v7 = vld [vmem:[#allocation6 + $0xf8] sm:$0xff]  ;;  %v2822_v62 = vld [vmem:[#allocation6 + $0xc0] sm:$0xff] }
 0x194   :  { %v670_v23 = vsel %vm667_vm4, %v669_v17, %v665_v21  ;;  %v693_v24 = vmul.f32 %v1894_v19, %v651_v20  ;;  %v2825_v58 = vld [vmem:[#allocation6 + $0xc8] sm:$0xff]  ;;  %v2828_v17 = vld [vmem:[#allocation6 + $0xd0] sm:$0xff]  ;;  %v2831_v18 = vld [vmem:[#allocation6 + $0xd8] sm:$0xff] }
 0x195   :  { %v692_v25 = vmul.f32 %v670_v23, %v2639_v13  ;;  %v680_v26 = vmul.f32 %v1892_v16, %v679_v22  ;;  %3347 = vst [vmem:[#allocation9_spill] sm:$0xff] %v2828_v17  ;;  %v2834_v19 = vld [vmem:[#allocation6 + $0xa0] sm:$0xff]  ;;  %v2837_v20 = vld [vmem:[#allocation6 + $0xa8] sm:$0xff]  ;;  %v2840_v21 = vld [vmem:[#allocation6 + $0xb0] sm:$0xff] }
 0x196   :  { %3348 = vst [vmem:[#allocation10_spill] sm:$0xff] %v2831_v18  ;;  %v2843_v22 = vld [vmem:[#allocation6 + $0xb8] sm:$0xff]  ;;  %v2846_v23 = vld [vmem:[#allocation6 + $0x80] sm:$0xff] }
 0x197   :  { %v2711_v27 = vadd.f32 %v693_v24, %v692_v25  ;;  %v681_v28 = vadd.f32 %v1892_v16, %v680_v26  ;;  %3349 = vst [vmem:[#allocation11_spill] sm:$0xff] %v2834_v19  ;;  %v2849_v24 = vld [vmem:[#allocation6 + $0x88] sm:$0xff]  ;;  %v2852_v25 = vld [vmem:[#allocation6 + $0x90] sm:$0xff]  ;;  %v2855_v26 = vld [vmem:[#allocation6 + $0x98] sm:$0xff] }
 0x198   :  { %3350 = vst [vmem:[#allocation13_spill] sm:$0xff] %v2837_v20 }
 0x199   :  { %1895 = vtanh.f32 %v2711_v27  ;;  %v685_v32 = vsel %vm684_vm7, %v1892_v16, %v681_v28  ;;  %v2813_v16 = vld [vmem:[#allocation6 + $0xe8] sm:$0xff]  ;;  %3351 = vst [vmem:[#allocation12_spill] sm:$0xff] %v2840_v21  ;;  %v2858_v28 = vld [vmem:[#allocation6 + $0x60] sm:$0xff] }
 0x19a   :  { %v690_v35 = vsel %vm687_vm8, %v689_v33, %v685_v32  ;;  %3352 = vst [vmem:[#allocation14_spill] sm:$0xff] %v2843_v22  ;;  %v2867_v32 = vld [vmem:[#allocation6 + $0x78] sm:$0xff]  ;;  %v2870_v33 = vld [vmem:[#allocation6 + $0x40] sm:$0xff] }
 0x19b   :  { %3353 = vst [vmem:[#allocation15_spill] sm:$0xff] %v2846_v23 }
 0x19c   :  { %3354 = vst [vmem:[#allocation17_spill] sm:$0xff] %v2849_v24 }
 0x19d   :  { %3355 = vst [vmem:[#allocation16_spill] sm:$0xff] %v2852_v25 }
 0x19e   :  { %3356 = vst [vmem:[#allocation18_spill] sm:$0xff] %v2855_v26 }
 0x19f   :  { %v1896_v34 = vpop.eup %1895  ;;  %3357 = vst [vmem:[#allocation19_spill] sm:$0xff] %v2858_v28 }
 0x1a0   :  { %v696_v36 = vmul.f32 %v1896_v34, %v690_v35  ;;  %3360 = vst [vmem:[#allocation22_spill] sm:$0xff] %v2867_v32  ;;  %v2873_v34 = vld [vmem:[#allocation6 + $0x48] sm:$0xff]  ;;  %v2876_v35 = vld [vmem:[#allocation6 + $0x50] sm:$0xff] }
 0x1a1   :  { %3361 = vst [vmem:[#allocation23_spill] sm:$0xff] %v2870_v33 }
 0x1a2   :  { %v698_v37 = vrot.slane %v696_v36, 1  ;;  %v699_v38 = vrot.slane %v696_v36, 2  ;;  %v700_v13 = vrot.slane %v696_v36, 3  ;;  %712 = vst [vmem:[#allocation3 + $0x1] sm:$0x1] %v696_v36  ;;  %741 = vmatmul.f32.vlgmr.msrb.gmra.mxu0 %v696_v36  ;;  %761 = vmatmul.f32.vlgmr.msrb.gmra.mxu1 %v696_v36  ;;  %v701_v39 = vrot.slane %v696_v36, 4 }
 0x1a3   :  { %781 = vmatmul.f32.vlgmr.msrb.gmra.mxu2 %v696_v36  ;;  %801 = vmatmul.f32.vlgmr.msrb.gmra.mxu3 %v696_v36  ;;  %v702_v40 = vrot.slane %v696_v36, 5  ;;  %v703_v44 = vrot.slane %v696_v36, 6  ;;  %v704_v47 = vrot.slane %v696_v36, 7  ;;  %3362 = vst [vmem:[#allocation25_spill] sm:$0xff] %v2873_v34  ;;  %v2879_v36 = vld [vmem:[#allocation6 + $0x58] sm:$0xff] }
 0x1a4   :  { %713 = vst [vmem:[#allocation3 + $0x9] sm:$0x1] %v698_v37  ;;  %1075 = vmatpush.msrb.mxu0 %v2714_v41  ;;  %1095 = vmatpush.msrb.mxu1 %v2717_v43  ;;  %v2882_v37 = vld [vmem:[#allocation6 + $0x20] sm:$0xff] }
 0x1a5   :  { %714 = vst [vmem:[#allocation3 + $0x11] sm:$0x1] %v699_v38  ;;  %1115 = vmatpush.msrb.mxu2 %v2720_v45  ;;  %1135 = vmatpush.msrb.mxu3 %v2723_v46  ;;  %v2885_v38 = vld [vmem:[#allocation6 + $0x28] sm:$0xff] }
 0x1a6   :  { %715 = vst [vmem:[#allocation3 + $0x19] sm:$0x1] %v700_v13  ;;  %1076 = vmatpush.msrb.mxu0 %v2726_v48  ;;  %1096 = vmatpush.msrb.mxu1 %v2729_v49  ;;  %v2888_v13 = vld [vmem:[#allocation6 + $0x30] sm:$0xff] }
 0x1a7   :  { %716 = vst [vmem:[#allocation3 + $0x21] sm:$0x1] %v701_v39  ;;  %1116 = vmatpush.msrb.mxu2 %v2732_v50  ;;  %1136 = vmatpush.msrb.mxu3 %v2735_v51  ;;  %v2891_v39 = vld [vmem:[#allocation6 + $0x38] sm:$0xff] }
 0x1a8   :  { %717 = vst [vmem:[#allocation3 + $0x29] sm:$0x1] %v702_v40  ;;  %1077 = vmatpush.msrb.mxu0 %v2738_v52  ;;  %1097 = vmatpush.msrb.mxu1 %v2741_v53  ;;  %v2894_v40 = vld [vmem:[#allocation6] sm:$0xff] }
 0x1a9   :  { %718 = vst [vmem:[#allocation3 + $0x31] sm:$0x1] %v703_v44  ;;  %1117 = vmatpush.msrb.mxu2 %v2744_v54  ;;  %1137 = vmatpush.msrb.mxu3 %v2747_v56  ;;  %v2897_v44 = vld [vmem:[#allocation6 + $0x8] sm:$0xff] }
 0x1aa   :  { %719 = vst [vmem:[#allocation3 + $0x39] sm:$0x1] %v704_v47  ;;  %1078 = vmatpush.msrb.mxu0 %v2750_v57  ;;  %1098 = vmatpush.msrb.mxu1 %v2753_v59  ;;  %v2900_v47 = vld [vmem:[#allocation6 + $0x10] sm:$0xff] }
 0x1ab   :  { %1118 = vmatpush.msrb.mxu2 %v2756_v29  ;;  %1138 = vmatpush.msrb.mxu3 %v2759_v1  ;;  %3363 = vst [vmem:[#allocation24_spill] sm:$0xff] %v2876_v35 }
 0x1ac   :  { %1079 = vmatpush.msrb.mxu0 %v2762_v61  ;;  %1099 = vmatpush.msrb.mxu1 %v2765_v60  ;;  %3364 = vst [vmem:[#allocation26_spill] sm:$0xff] %v2879_v36 }
 0x1ad   :  { %1119 = vmatpush.msrb.mxu2 %v2768_v15  ;;  %1139 = vmatpush.msrb.mxu3 %v2771_v3  ;;  %3365 = vst [vmem:[#allocation27_spill] sm:$0xff] %v2882_v37 }
 0x1ae   :  { %1080 = vmatpush.msrb.mxu0 %v2774_v42  ;;  %1100 = vmatpush.msrb.mxu1 %v2777_v55  ;;  %3366 = vst [vmem:[#allocation28_spill] sm:$0xff] %v2885_v38 }
 0x1af   :  { %1120 = vmatpush.msrb.mxu2 %v2780_v5  ;;  %1140 = vmatpush.msrb.mxu3 %v2783_v0  ;;  %3367 = vst [vmem:[#allocation29_spill] sm:$0xff] %v2888_v13 }
 0x1b0   :  { %1081 = vmatpush.msrb.mxu0 %v2786_v12  ;;  %1101 = vmatpush.msrb.mxu1 %v2789_v6  ;;  %3368 = vst [vmem:[#allocation30_spill] sm:$0xff] %v2891_v39 }
 0x1b1   :  { %1121 = vmatpush.msrb.mxu2 %v2792_v8  ;;  %1141 = vmatpush.msrb.mxu3 %v2795_v10  ;;  %3369 = vst [vmem:[#allocation31_spill] sm:$0xff] %v2894_v40 }
 0x1b2   :  { %1082 = vmatpush.msrb.mxu0 %v2798_v11  ;;  %1102 = vmatpush.msrb.mxu1 %v2801_v14  ;;  %3370 = vst [vmem:[#allocation32_spill] sm:$0xff] %v2897_v44 }
 0x1b3   :  { %1122 = vmatpush.msrb.mxu2 %v2804_v9  ;;  %1142 = vmatpush.msrb.mxu3 %v2807_v4  ;;  %3371 = vst [vmem:[#allocation33_spill] sm:$0xff] %v2900_v47 }
 0x1b4   :  { %1083 = vmatpush.msrb.mxu0 %v2810_v2  ;;  %1103 = vmatpush.msrb.mxu1 %v2813_v16 }
 0x1b5   :  { %1123 = vmatpush.msrb.mxu2 %v2816_v63  ;;  %1143 = vmatpush.msrb.mxu3 %v2819_v7 }
 0x1b6   :  { %1084 = vmatpush.msrb.mxu0 %v2822_v62  ;;  %1104 = vmatpush.msrb.mxu1 %v2825_v58 }
 0x1b7   :  { %1124 = vmatpush.msrb.mxu2 %v2828_v17  ;;  %1144 = vmatpush.msrb.mxu3 %v2831_v18 }
 0x1b8   :  { %1085 = vmatpush.msrb.mxu0 %v2834_v19  ;;  %1105 = vmatpush.msrb.mxu1 %v2837_v20 }
 0x1b9   :  { %1125 = vmatpush.msrb.mxu2 %v2840_v21  ;;  %1145 = vmatpush.msrb.mxu3 %v2843_v22 }
 0x1ba   :  { %1086 = vmatpush.msrb.mxu0 %v2846_v23  ;;  %1106 = vmatpush.msrb.mxu1 %v2849_v24 }
 0x1bb   :  { %1126 = vmatpush.msrb.mxu2 %v2852_v25  ;;  %1146 = vmatpush.msrb.mxu3 %v2855_v26 }
 0x1bc   :  { %1087 = vmatpush.msrb.mxu0 %v2858_v28  ;;  %1107 = vmatpush.msrb.mxu1 %v2861_v30 }
 0x1bd   :  { %1127 = vmatpush.msrb.mxu2 %v2864_v31  ;;  %1147 = vmatpush.msrb.mxu3 %v2867_v32 }
 0x1be   :  { %1088 = vmatpush.msrb.mxu0 %v2870_v33  ;;  %1108 = vmatpush.msrb.mxu1 %v2873_v34 }
 0x1bf   :  { %1128 = vmatpush.msrb.mxu2 %v2876_v35  ;;  %1148 = vmatpush.msrb.mxu3 %v2879_v36  ;;  %v3373_v36 = vld [vmem:[#allocation38_spill] sm:$0xff]  ;;  %v3374_v35 = vld [vmem:[#allocation39_spill] sm:$0xff] }
 0x1c0   :  { %1089 = vmatpush.msrb.mxu0 %v2882_v37  ;;  %1109 = vmatpush.msrb.mxu1 %v2885_v38  ;;  %v2903_v38 = vld [vmem:[#allocation6 + $0x18] sm:$0xff] }
 0x1c1   :  { %1129 = vmatpush.msrb.mxu2 %v2888_v13  ;;  %1149 = vmatpush.msrb.mxu3 %v2891_v39  ;;  %3372 = vst [vmem:[#allocation34_spill] sm:$0xff] %v2903_v38 }
 0x1c2   :  { %1090 = vmatpush.msrb.mxu0 %v2894_v40  ;;  %1110 = vmatpush.msrb.mxu1 %v2897_v44  ;;  %v3375_v44 = vld [vmem:[#allocation41_spill] sm:$0xff] }
 0x1c3   :  { %1130 = vmatpush.msrb.mxu2 %v2900_v47  ;;  %1150 = vmatpush.msrb.mxu3 %v2903_v38 }
 0x21f   :  { %v742_v13 = vpop.f32.mrf.mxu0  ;;  %v762_v37 = vpop.f32.mrf.mxu1 }
 0x220   :  { %v805_v39 = vadd.f32 %v742_v13, %v3373_v36  ;;  %v806_v34 = vadd.f32 %v762_v37, %v3374_v35  ;;  %v3376_v35 = vld [vmem:[#allocation40_spill] sm:$0xff] }
 0x222   :  { %v1844_v33 = vmul.f32 -1.442695, %v805_v39  ;;  %v1845_v40 = vmul.f32 -1.442695, %v806_v34 }
 0x224   :  { %1897 = vpow2.f32 %v1844_v33 }
 0x225   :  { %1899 = vpow2.f32 %v1845_v40 }
 0x226   :  { %v802_v32 = vpop.f32.mrf.mxu3  ;;  %v782_v38 = vpop.f32.mrf.mxu2 }
 0x227   :  { %v808_v31 = vadd.f32 %v802_v32, %v3375_v44  ;;  %v807_v37 = vadd.f32 %v782_v38, %v3376_v35 }
 0x229   :  { %v1846_v30 = vmul.f32 -1.442695, %v808_v31 }
 0x22a   :  { %v1898_v28 = vpop.eup %1897 }
 0x22b   :  { %v1900_v47 = vpop.eup %1899  ;;  %v812_v26 = vadd.f32 1.0, %v1898_v28  ;;  %1901 = vpow2.f32 %v1846_v30 }
 0x22c   :  { %v831_v25 = vadd.f32 1.0, %v1900_v47 }
 0x22d   :  { %1903 = vrcp.f32 %v812_v26  ;;  %v824_v31 = vand.u32 2147483648, %v812_v26  ;;  %v822_v30 = vand.u32 2147483647, %v812_v26  ;;  %vm818_vm11 = vweird.f32 %v812_v26 }
 0x22e   :  { %1905 = vrcp.f32 %v831_v25  ;;  %v843_v44 = vand.u32 2147483648, %v831_v25  ;;  %v841_v23 = vand.u32 2147483647, %v831_v25  ;;  %vm837_vm12 = vweird.f32 %v831_v25 }
 0x22f   :  { %v825_v38 = vor.u32 1.1754944e-38, %v824_v31  ;;  %vm823_vm15 = vcmp.eq.f32.partialorder %v822_v30, 8.507059e+37 }
 0x230   :  { %vm842_vm0 = vcmp.eq.f32.partialorder %v841_v23, 8.507059e+37 }
 0x231   :  { %v1902_v24 = vpop.eup %1901 }
 0x232   :  { %v851_v36 = vadd.f32 1.0, %v1902_v24 }
 0x233   :  { %v1904_v13 = vpop.eup %1903 }
 0x234   :  { %v1906_v34 = vpop.eup %1905  ;;  %v814_v33 = vmul.f32 %v1904_v13, %v812_v26  ;;  %1907 = vrcp.f32 %v851_v36  ;;  %vm819_vm9 = vweird.f32 %v1904_v13  ;;  %v863_v31 = vand.u32 2147483648, %v851_v36 }
 0x235   :  { %v833_v39 = vmul.f32 %v1906_v34, %v831_v25  ;;  %1909 = vtanh.f32 %v807_v37  ;;  %vm838_vm10 = vweird.f32 %v1906_v34  ;;  %vm820_vm13 = vmor %vm818_vm11, %vm819_vm9  ;;  %vm857_vm2 = vweird.f32 %v851_v36 }
 0x236   :  { %v815_v40 = vsub.f32 1.0, %v814_v33  ;;  %vm839_vm14 = vmor %vm837_vm12, %vm838_vm10  ;;  %v844_v33 = vor.u32 1.1754944e-38, %v843_v44  ;;  %v864_v30 = vor.u32 1.1754944e-38, %v863_v31  ;;  %v3388_v31 = vld [vmem:[#allocation21_spill] sm:$0xff] }
 0x237   :  { %v834_v32 = vsub.f32 1.0, %v833_v39 }
 0x238   :  { %v816_v28 = vmul.f32 %v1904_v13, %v815_v40 }
 0x239   :  { %v835_v47 = vmul.f32 %v1906_v34, %v834_v32 }
 0x23a   :  { %v1908_v22 = vpop.eup %1907  ;;  %v817_v24 = vadd.f32 %v1904_v13, %v816_v28 }
 0x23b   :  { %v836_v35 = vadd.f32 %v1906_v34, %v835_v47  ;;  %v853_v21 = vmul.f32 %v1908_v22, %v851_v36  ;;  %v1910_v37 = vpop.eup %1909  ;;  %vm858_vm1 = vweird.f32 %v1908_v22 }
 0x23c   :  { %v821_v39 = vsel %vm820_vm13, %v1904_v13, %v817_v24  ;;  %v861_v13 = vand.u32 2147483647, %v851_v36  ;;  %vm859_vm3 = vmor %vm857_vm2, %vm858_vm1  ;;  %v3377_v36 = vld [vmem:[#allocation9_spill] sm:$0xff]  ;;  %v3378_v24 = vld [vmem:[#allocation10_spill] sm:$0xff] }
 0x23d   :  { %v826_v20 = vsel %vm823_vm15, %v825_v38, %v821_v39  ;;  %v840_v40 = vsel %vm839_vm14, %v1906_v34, %v836_v35  ;;  %v854_v19 = vsub.f32 1.0, %v853_v21  ;;  %v3379_v38 = vld [vmem:[#allocation11_spill] sm:$0xff]  ;;  %v3380_v35 = vld [vmem:[#allocation13_spill] sm:$0xff]  ;;  %v3382_v39 = vld [vmem:[#allocation14_spill] sm:$0xff] }
 0x23e   :  { %v845_v32 = vsel %vm842_vm0, %v844_v33, %v840_v40  ;;  %v868_v18 = vmul.f32 %v1910_v37, %v826_v20  ;;  %vm862_vm4 = vcmp.eq.f32.partialorder %v861_v13, 8.507059e+37  ;;  %v3381_v33 = vld [vmem:[#allocation12_spill] sm:$0xff]  ;;  %v3383_v37 = vld [vmem:[#allocation15_spill] sm:$0xff]  ;;  %v3384_v40 = vld [vmem:[#allocation17_spill] sm:$0xff] }
 0x23f   :  { %v867_v17 = vmul.f32 %v845_v32, %v2711_v27  ;;  %v855_v28 = vmul.f32 %v1908_v22, %v854_v19  ;;  %v3385_v32 = vld [vmem:[#allocation16_spill] sm:$0xff] }
 0x240   :  { %v3389_v13 = vld [vmem:[#allocation20_spill] sm:$0xff] }
 0x241   :  { %v2911_v26 = vadd.f32 %v868_v18, %v867_v17  ;;  %v856_v25 = vadd.f32 %v1908_v22, %v855_v28  ;;  %v3386_v28 = vld [vmem:[#allocation18_spill] sm:$0xff] }
 0x243   :  { %1911 = vtanh.f32 %v2911_v26  ;;  %v860_v44 = vsel %vm859_vm3, %v1908_v22, %v856_v25  ;;  %v3387_v25 = vld [vmem:[#allocation19_spill] sm:$0xff] }
 0x244   :  { %v865_v21 = vsel %vm862_vm4, %v864_v30, %v860_v44  ;;  %v3390_v44 = vld [vmem:[#allocation22_spill] sm:$0xff]  ;;  %v3391_v30 = vld [vmem:[#allocation23_spill] sm:$0xff] }
 0x249   :  { %v1912_v23 = vpop.eup %1911 }
 0x24a   :  { %v871_v34 = vmul.f32 %v1912_v23, %v865_v21  ;;  %v3392_v23 = vld [vmem:[#allocation25_spill] sm:$0xff]  ;;  %v3393_v21 = vld [vmem:[#allocation24_spill] sm:$0xff] }
 0x24c   :  { %v873_v20 = vrot.slane %v871_v34, 1  ;;  %v874_v47 = vrot.slane %v871_v34, 2  ;;  %v875_v27 = vrot.slane %v871_v34, 3  ;;  %887 = vst [vmem:[#allocation3 + $0x2] sm:$0x1] %v871_v34  ;;  %916 = vmatmul.f32.vlgmr.msra.gmra.mxu0 %v871_v34  ;;  %936 = vmatmul.f32.vlgmr.msra.gmra.mxu1 %v871_v34  ;;  %v876_v17 = vrot.slane %v871_v34, 4 }
 0x24d   :  { %956 = vmatmul.f32.vlgmr.msra.gmra.mxu2 %v871_v34  ;;  %976 = vmatmul.f32.vlgmr.msra.gmra.mxu3 %v871_v34  ;;  %v877_v18 = vrot.slane %v871_v34, 5  ;;  %v878_v19 = vrot.slane %v871_v34, 6  ;;  %v879_v22 = vrot.slane %v871_v34, 7  ;;  %v3394_v34 = vld [vmem:[#allocation26_spill] sm:$0xff] }
 0x24e   :  { %888 = vst [vmem:[#allocation3 + $0xa] sm:$0x1] %v873_v20  ;;  %1250 = vmatpush.msra.mxu0 %v2714_v41  ;;  %1270 = vmatpush.msra.mxu1 %v2717_v43  ;;  %v3395_v20 = vld [vmem:[#allocation27_spill] sm:$0xff] }
 0x24f   :  { %889 = vst [vmem:[#allocation3 + $0x12] sm:$0x1] %v874_v47  ;;  %1290 = vmatpush.msra.mxu2 %v2720_v45  ;;  %1310 = vmatpush.msra.mxu3 %v2723_v46  ;;  %v3396_v47 = vld [vmem:[#allocation28_spill] sm:$0xff] }
 0x250   :  { %890 = vst [vmem:[#allocation3 + $0x1a] sm:$0x1] %v875_v27  ;;  %1251 = vmatpush.msra.mxu0 %v2726_v48  ;;  %1271 = vmatpush.msra.mxu1 %v2729_v49  ;;  %v3397_v27 = vld [vmem:[#allocation29_spill] sm:$0xff] }
 0x251   :  { %891 = vst [vmem:[#allocation3 + $0x22] sm:$0x1] %v876_v17  ;;  %1291 = vmatpush.msra.mxu2 %v2732_v50  ;;  %1311 = vmatpush.msra.mxu3 %v2735_v51  ;;  %v3398_v17 = vld [vmem:[#allocation30_spill] sm:$0xff] }
 0x252   :  { %892 = vst [vmem:[#allocation3 + $0x2a] sm:$0x1] %v877_v18  ;;  %1252 = vmatpush.msra.mxu0 %v2738_v52  ;;  %1272 = vmatpush.msra.mxu1 %v2741_v53  ;;  %v3399_v18 = vld [vmem:[#allocation31_spill] sm:$0xff] }
 0x253   :  { %893 = vst [vmem:[#allocation3 + $0x32] sm:$0x1] %v878_v19  ;;  %1292 = vmatpush.msra.mxu2 %v2744_v54  ;;  %1312 = vmatpush.msra.mxu3 %v2747_v56  ;;  %v3400_v19 = vld [vmem:[#allocation32_spill] sm:$0xff] }
 0x254   :  { %894 = vst [vmem:[#allocation3 + $0x3a] sm:$0x1] %v879_v22  ;;  %1253 = vmatpush.msra.mxu0 %v2750_v57  ;;  %1273 = vmatpush.msra.mxu1 %v2753_v59  ;;  %v3401_v22 = vld [vmem:[#allocation33_spill] sm:$0xff] }
 0x255   :  { %1293 = vmatpush.msra.mxu2 %v2756_v29  ;;  %1313 = vmatpush.msra.mxu3 %v2759_v1 }
 0x256   :  { %1254 = vmatpush.msra.mxu0 %v2762_v61  ;;  %1274 = vmatpush.msra.mxu1 %v2765_v60 }
 0x257   :  { %1294 = vmatpush.msra.mxu2 %v2768_v15  ;;  %1314 = vmatpush.msra.mxu3 %v2771_v3 }
 0x258   :  { %1255 = vmatpush.msra.mxu0 %v2774_v42  ;;  %1275 = vmatpush.msra.mxu1 %v2777_v55 }
 0x259   :  { %1295 = vmatpush.msra.mxu2 %v2780_v5  ;;  %1315 = vmatpush.msra.mxu3 %v2783_v0 }
 0x25a   :  { %1256 = vmatpush.msra.mxu0 %v2786_v12  ;;  %1276 = vmatpush.msra.mxu1 %v2789_v6 }
 0x25b   :  { %1296 = vmatpush.msra.mxu2 %v2792_v8  ;;  %1316 = vmatpush.msra.mxu3 %v2795_v10 }
 0x25c   :  { %1257 = vmatpush.msra.mxu0 %v2798_v11  ;;  %1277 = vmatpush.msra.mxu1 %v2801_v14 }
 0x25d   :  { %1297 = vmatpush.msra.mxu2 %v2804_v9  ;;  %1317 = vmatpush.msra.mxu3 %v2807_v4 }
 0x25e   :  { %1258 = vmatpush.msra.mxu0 %v2810_v2  ;;  %1278 = vmatpush.msra.mxu1 %v2813_v16 }
 0x25f   :  { %1298 = vmatpush.msra.mxu2 %v2816_v63  ;;  %1318 = vmatpush.msra.mxu3 %v2819_v7 }
 0x260   :  { %1259 = vmatpush.msra.mxu0 %v2822_v62  ;;  %1279 = vmatpush.msra.mxu1 %v2825_v58 }
 0x261   :  { %1299 = vmatpush.msra.mxu2 %v3377_v36  ;;  %1319 = vmatpush.msra.mxu3 %v3378_v24 }
 0x262   :  { %1260 = vmatpush.msra.mxu0 %v3379_v38  ;;  %1280 = vmatpush.msra.mxu1 %v3380_v35 }
 0x263   :  { %1300 = vmatpush.msra.mxu2 %v3381_v33  ;;  %1320 = vmatpush.msra.mxu3 %v3382_v39 }
 0x264   :  { %1261 = vmatpush.msra.mxu0 %v3383_v37  ;;  %1281 = vmatpush.msra.mxu1 %v3384_v40 }
 0x265   :  { %1301 = vmatpush.msra.mxu2 %v3385_v32  ;;  %1321 = vmatpush.msra.mxu3 %v3386_v28 }
 0x266   :  { %1262 = vmatpush.msra.mxu0 %v3387_v25  ;;  %1282 = vmatpush.msra.mxu1 %v3388_v31 }
 0x267   :  { %1302 = vmatpush.msra.mxu2 %v3389_v13  ;;  %1322 = vmatpush.msra.mxu3 %v3390_v44  ;;  %v3403_v44 = vld [vmem:[#allocation42_spill] sm:$0xff]  ;;  %v3404_v13 = vld [vmem:[#allocation43_spill] sm:$0xff] }
 0x268   :  { %1263 = vmatpush.msra.mxu0 %v3391_v30  ;;  %1283 = vmatpush.msra.mxu1 %v3392_v23  ;;  %v3402_v30 = vld [vmem:[#allocation34_spill] sm:$0xff] }
 0x269   :  { %1303 = vmatpush.msra.mxu2 %v3393_v21  ;;  %1323 = vmatpush.msra.mxu3 %v3394_v34 }
 0x26a   :  { %1264 = vmatpush.msra.mxu0 %v3395_v20  ;;  %1284 = vmatpush.msra.mxu1 %v3396_v47 }
 0x26b   :  { %1304 = vmatpush.msra.mxu2 %v3397_v27  ;;  %1324 = vmatpush.msra.mxu3 %v3398_v17  ;;  %v3405_v17 = vld [vmem:[#allocation45_spill] sm:$0xff] }
 0x26c   :  { %1265 = vmatpush.msra.mxu0 %v3399_v18  ;;  %1285 = vmatpush.msra.mxu1 %v3400_v19 }
 0x26d   :  { %1305 = vmatpush.msra.mxu2 %v3401_v22  ;;  %1325 = vmatpush.msra.mxu3 %v3402_v30 }
 0x2c9   :  { %v917_v23 = vpop.f32.mrf.mxu0  ;;  %v937_v21 = vpop.f32.mrf.mxu1 }
 0x2ca   :  { %v980_v34 = vadd.f32 %v917_v23, %v3403_v44  ;;  %v981_v20 = vadd.f32 %v937_v21, %v3404_v13  ;;  %v3406_v13 = vld [vmem:[#allocation44_spill] sm:$0xff] }
 0x2cc   :  { %v1847_v31 = vmul.f32 -1.442695, %v980_v34  ;;  %v1848_v47 = vmul.f32 -1.442695, %v981_v20 }
 0x2ce   :  { %1913 = vpow2.f32 %v1847_v31 }
 0x2cf   :  { %1915 = vpow2.f32 %v1848_v47 }
 0x2d0   :  { %v977_v27 = vpop.f32.mrf.mxu3  ;;  %v957_v30 = vpop.f32.mrf.mxu2 }
 0x2d1   :  { %v983_v25 = vadd.f32 %v977_v27, %v3405_v17  ;;  %v982_v21 = vadd.f32 %v957_v30, %v3406_v13 }
 0x2d3   :  { %v1849_v18 = vmul.f32 -1.442695, %v983_v25 }
 0x2d4   :  { %v1914_v28 = vpop.eup %1913 }
 0x2d5   :  { %v1916_v19 = vpop.eup %1915  ;;  %v987_v32 = vadd.f32 1.0, %v1914_v28  ;;  %1917 = vpow2.f32 %v1849_v18 }
 0x2d6   :  { %v1006_v22 = vadd.f32 1.0, %v1916_v19 }
 0x2d7   :  { %1919 = vrcp.f32 %v987_v32  ;;  %v999_v25 = vand.u32 2147483648, %v987_v32  ;;  %v997_v18 = vand.u32 2147483647, %v987_v32  ;;  %vm993_vm7 = vweird.f32 %v987_v32 }
 0x2d8   :  { %1921 = vrcp.f32 %v1006_v22  ;;  %v1018_v17 = vand.u32 2147483648, %v1006_v22  ;;  %v1016_v37 = vand.u32 2147483647, %v1006_v22  ;;  %vm1012_vm8 = vweird.f32 %v1006_v22 }
 0x2d9   :  { %v1000_v30 = vor.u32 1.1754944e-38, %v999_v25  ;;  %vm998_vm11 = vcmp.eq.f32.partialorder %v997_v18, 8.507059e+37 }
 0x2da   :  { %vm1017_vm12 = vcmp.eq.f32.partialorder %v1016_v37, 8.507059e+37 }
 0x2db   :  { %v1918_v40 = vpop.eup %1917 }
 0x2dc   :  { %v1026_v44 = vadd.f32 1.0, %v1918_v40 }
 0x2dd   :  { %v1920_v23 = vpop.eup %1919 }
 0x2de   :  { %v1922_v34 = vpop.eup %1921  ;;  %v989_v31 = vmul.f32 %v1920_v23, %v987_v32  ;;  %1923 = vrcp.f32 %v1026_v44  ;;  %vm994_vm5 = vweird.f32 %v1920_v23  ;;  %v1038_v25 = vand.u32 2147483648, %v1026_v44 }
 0x2df   :  { %v1008_v20 = vmul.f32 %v1922_v34, %v1006_v22  ;;  %1925 = vtanh.f32 %v982_v21  ;;  %vm1013_vm6 = vweird.f32 %v1922_v34  ;;  %vm995_vm9 = vmor %vm993_vm7, %vm994_vm5  ;;  %vm1032_vm14 = vweird.f32 %v1026_v44 }
 0x2e0   :  { %v990_v47 = vsub.f32 1.0, %v989_v31  ;;  %vm1014_vm10 = vmor %vm1012_vm8, %vm1013_vm6  ;;  %v1019_v31 = vor.u32 1.1754944e-38, %v1018_v17  ;;  %v1039_v18 = vor.u32 1.1754944e-38, %v1038_v25  ;;  %v3418_v25 = vld [vmem:[#allocation21_spill] sm:$0xff] }
 0x2e1   :  { %v1009_v27 = vsub.f32 1.0, %v1008_v20 }
 0x2e2   :  { %v991_v28 = vmul.f32 %v1920_v23, %v990_v47 }
 0x2e3   :  { %v1010_v19 = vmul.f32 %v1922_v34, %v1009_v27 }
 0x2e4   :  { %v1924_v39 = vpop.eup %1923  ;;  %v992_v40 = vadd.f32 %v1920_v23, %v991_v28 }
 0x2e5   :  { %v1011_v13 = vadd.f32 %v1922_v34, %v1010_v19  ;;  %v1028_v33 = vmul.f32 %v1924_v39, %v1026_v44  ;;  %v1926_v21 = vpop.eup %1925  ;;  %vm1033_vm13 = vweird.f32 %v1924_v39 }
 0x2e6   :  { %v996_v20 = vsel %vm995_vm9, %v1920_v23, %v992_v40  ;;  %v1036_v23 = vand.u32 2147483647, %v1026_v44  ;;  %vm1034_vm15 = vmor %vm1032_vm14, %vm1033_vm13  ;;  %v3407_v44 = vld [vmem:[#allocation9_spill] sm:$0xff]  ;;  %v3408_v40 = vld [vmem:[#allocation10_spill] sm:$0xff] }
 0x2e7   :  { %v1001_v35 = vsel %vm998_vm11, %v1000_v30, %v996_v20  ;;  %v1015_v47 = vsel %vm1014_vm10, %v1922_v34, %v1011_v13  ;;  %v1029_v38 = vsub.f32 1.0, %v1028_v33  ;;  %v3409_v30 = vld [vmem:[#allocation11_spill] sm:$0xff]  ;;  %v3410_v13 = vld [vmem:[#allocation13_spill] sm:$0xff]  ;;  %v3412_v20 = vld [vmem:[#allocation14_spill] sm:$0xff] }
 0x2e8   :  { %v1020_v27 = vsel %vm1017_vm12, %v1019_v31, %v1015_v47  ;;  %v1043_v24 = vmul.f32 %v1926_v21, %v1001_v35  ;;  %vm1037_vm0 = vcmp.eq.f32.partialorder %v1036_v23, 8.507059e+37  ;;  %v3411_v31 = vld [vmem:[#allocation12_spill] sm:$0xff]  ;;  %v3413_v21 = vld [vmem:[#allocation15_spill] sm:$0xff]  ;;  %v3414_v47 = vld [vmem:[#allocation17_spill] sm:$0xff] }
 0x2e9   :  { %v1042_v36 = vmul.f32 %v1020_v27, %v2911_v26  ;;  %v1030_v28 = vmul.f32 %v1924_v39, %v1029_v38  ;;  %v3415_v27 = vld [vmem:[#allocation16_spill] sm:$0xff] }
 0x2ea   :  { %v3419_v23 = vld [vmem:[#allocation20_spill] sm:$0xff] }
 0x2eb   :  { %v2983_v32 = vadd.f32 %v1043_v24, %v1042_v36  ;;  %v1031_v22 = vadd.f32 %v1924_v39, %v1030_v28  ;;  %v3416_v28 = vld [vmem:[#allocation18_spill] sm:$0xff] }
 0x2ed   :  { %1927 = vtanh.f32 %v2983_v32  ;;  %v1035_v17 = vsel %vm1034_vm15, %v1924_v39, %v1031_v22  ;;  %v3417_v22 = vld [vmem:[#allocation19_spill] sm:$0xff] }
 0x2ee   :  { %v1040_v33 = vsel %vm1037_vm0, %v1039_v18, %v1035_v17  ;;  %v3420_v17 = vld [vmem:[#allocation22_spill] sm:$0xff]  ;;  %v3421_v18 = vld [vmem:[#allocation23_spill] sm:$0xff] }
 0x2f3   :  { %v1928_v37 = vpop.eup %1927 }
 0x2f4   :  { %v1046_v34 = vmul.f32 %v1928_v37, %v1040_v33  ;;  %v3422_v37 = vld [vmem:[#allocation25_spill] sm:$0xff]  ;;  %v3423_v33 = vld [vmem:[#allocation24_spill] sm:$0xff] }
 0x2f6   :  { %v1048_v35 = vrot.slane %v1046_v34, 1  ;;  %v1049_v19 = vrot.slane %v1046_v34, 2  ;;  %v1050_v26 = vrot.slane %v1046_v34, 3  ;;  %1062 = vst [vmem:[#allocation3 + $0x3] sm:$0x1] %v1046_v34  ;;  %1091 = vmatmul.f32.vlgmr.msrb.gmra.mxu0 %v1046_v34  ;;  %1111 = vmatmul.f32.vlgmr.msrb.gmra.mxu1 %v1046_v34  ;;  %v1051_v36 = vrot.slane %v1046_v34, 4 }
 0x2f7   :  { %1131 = vmatmul.f32.vlgmr.msrb.gmra.mxu2 %v1046_v34  ;;  %1151 = vmatmul.f32.vlgmr.msrb.gmra.mxu3 %v1046_v34  ;;  %v1052_v24 = vrot.slane %v1046_v34, 5  ;;  %v1053_v38 = vrot.slane %v1046_v34, 6  ;;  %v1054_v39 = vrot.slane %v1046_v34, 7  ;;  %v3424_v34 = vld [vmem:[#allocation26_spill] sm:$0xff] }
 0x2f8   :  { %1063 = vst [vmem:[#allocation3 + $0xb] sm:$0x1] %v1048_v35  ;;  %1425 = vmatpush.msrb.mxu0 %v2714_v41  ;;  %1445 = vmatpush.msrb.mxu1 %v2717_v43  ;;  %v3425_v35 = vld [vmem:[#allocation27_spill] sm:$0xff] }
 0x2f9   :  { %1064 = vst [vmem:[#allocation3 + $0x13] sm:$0x1] %v1049_v19  ;;  %1465 = vmatpush.msrb.mxu2 %v2720_v45  ;;  %1485 = vmatpush.msrb.mxu3 %v2723_v46  ;;  %v3426_v19 = vld [vmem:[#allocation28_spill] sm:$0xff] }
 0x2fa   :  { %1065 = vst [vmem:[#allocation3 + $0x1b] sm:$0x1] %v1050_v26  ;;  %1426 = vmatpush.msrb.mxu0 %v2726_v48  ;;  %1446 = vmatpush.msrb.mxu1 %v2729_v49  ;;  %v3427_v26 = vld [vmem:[#allocation29_spill] sm:$0xff] }
 0x2fb   :  { %1066 = vst [vmem:[#allocation3 + $0x23] sm:$0x1] %v1051_v36  ;;  %1466 = vmatpush.msrb.mxu2 %v2732_v50  ;;  %1486 = vmatpush.msrb.mxu3 %v2735_v51  ;;  %v3428_v36 = vld [vmem:[#allocation30_spill] sm:$0xff] }
 0x2fc   :  { %1067 = vst [vmem:[#allocation3 + $0x2b] sm:$0x1] %v1052_v24  ;;  %1427 = vmatpush.msrb.mxu0 %v2738_v52  ;;  %1447 = vmatpush.msrb.mxu1 %v2741_v53  ;;  %v3429_v24 = vld [vmem:[#allocation31_spill] sm:$0xff] }
 0x2fd   :  { %1068 = vst [vmem:[#allocation3 + $0x33] sm:$0x1] %v1053_v38  ;;  %1467 = vmatpush.msrb.mxu2 %v2744_v54  ;;  %1487 = vmatpush.msrb.mxu3 %v2747_v56  ;;  %v3430_v38 = vld [vmem:[#allocation32_spill] sm:$0xff] }
 0x2fe   :  { %1069 = vst [vmem:[#allocation3 + $0x3b] sm:$0x1] %v1054_v39  ;;  %1428 = vmatpush.msrb.mxu0 %v2750_v57  ;;  %1448 = vmatpush.msrb.mxu1 %v2753_v59  ;;  %v3431_v39 = vld [vmem:[#allocation33_spill] sm:$0xff] }
 0x2ff   :  { %1468 = vmatpush.msrb.mxu2 %v2756_v29  ;;  %1488 = vmatpush.msrb.mxu3 %v2759_v1 }
 0x300   :  { %1429 = vmatpush.msrb.mxu0 %v2762_v61  ;;  %1449 = vmatpush.msrb.mxu1 %v2765_v60 }
 0x301   :  { %1469 = vmatpush.msrb.mxu2 %v2768_v15  ;;  %1489 = vmatpush.msrb.mxu3 %v2771_v3 }
 0x302   :  { %1430 = vmatpush.msrb.mxu0 %v2774_v42  ;;  %1450 = vmatpush.msrb.mxu1 %v2777_v55 }
 0x303   :  { %1470 = vmatpush.msrb.mxu2 %v2780_v5  ;;  %1490 = vmatpush.msrb.mxu3 %v2783_v0 }
 0x304   :  { %1431 = vmatpush.msrb.mxu0 %v2786_v12  ;;  %1451 = vmatpush.msrb.mxu1 %v2789_v6 }
 0x305   :  { %1471 = vmatpush.msrb.mxu2 %v2792_v8  ;;  %1491 = vmatpush.msrb.mxu3 %v2795_v10 }
 0x306   :  { %1432 = vmatpush.msrb.mxu0 %v2798_v11  ;;  %1452 = vmatpush.msrb.mxu1 %v2801_v14 }
 0x307   :  { %1472 = vmatpush.msrb.mxu2 %v2804_v9  ;;  %1492 = vmatpush.msrb.mxu3 %v2807_v4 }
 0x308   :  { %1433 = vmatpush.msrb.mxu0 %v2810_v2  ;;  %1453 = vmatpush.msrb.mxu1 %v2813_v16 }
 0x309   :  { %1473 = vmatpush.msrb.mxu2 %v2816_v63  ;;  %1493 = vmatpush.msrb.mxu3 %v2819_v7 }
 0x30a   :  { %1434 = vmatpush.msrb.mxu0 %v2822_v62  ;;  %1454 = vmatpush.msrb.mxu1 %v2825_v58 }
 0x30b   :  { %1474 = vmatpush.msrb.mxu2 %v3407_v44  ;;  %1494 = vmatpush.msrb.mxu3 %v3408_v40 }
 0x30c   :  { %1435 = vmatpush.msrb.mxu0 %v3409_v30  ;;  %1455 = vmatpush.msrb.mxu1 %v3410_v13 }
 0x30d   :  { %1475 = vmatpush.msrb.mxu2 %v3411_v31  ;;  %1495 = vmatpush.msrb.mxu3 %v3412_v20 }
 0x30e   :  { %1436 = vmatpush.msrb.mxu0 %v3413_v21  ;;  %1456 = vmatpush.msrb.mxu1 %v3414_v47 }
 0x30f   :  { %1476 = vmatpush.msrb.mxu2 %v3415_v27  ;;  %1496 = vmatpush.msrb.mxu3 %v3416_v28 }
 0x310   :  { %1437 = vmatpush.msrb.mxu0 %v3417_v22  ;;  %1457 = vmatpush.msrb.mxu1 %v3418_v25 }
 0x311   :  { %1477 = vmatpush.msrb.mxu2 %v3419_v23  ;;  %1497 = vmatpush.msrb.mxu3 %v3420_v17  ;;  %v3433_v17 = vld [vmem:[#allocation46_spill] sm:$0xff]  ;;  %v3434_v23 = vld [vmem:[#allocation47_spill] sm:$0xff] }
 0x312   :  { %1438 = vmatpush.msrb.mxu0 %v3421_v18  ;;  %1458 = vmatpush.msrb.mxu1 %v3422_v37  ;;  %v3432_v18 = vld [vmem:[#allocation34_spill] sm:$0xff] }
 0x313   :  { %1478 = vmatpush.msrb.mxu2 %v3423_v33  ;;  %1498 = vmatpush.msrb.mxu3 %v3424_v34 }
 0x314   :  { %1439 = vmatpush.msrb.mxu0 %v3425_v35  ;;  %1459 = vmatpush.msrb.mxu1 %v3426_v19 }
 0x315   :  { %1479 = vmatpush.msrb.mxu2 %v3427_v26  ;;  %1499 = vmatpush.msrb.mxu3 %v3428_v36  ;;  %v3435_v36 = vld [vmem:[#allocation49_spill] sm:$0xff] }
 0x316   :  { %1440 = vmatpush.msrb.mxu0 %v3429_v24  ;;  %1460 = vmatpush.msrb.mxu1 %v3430_v38 }
 0x317   :  { %1480 = vmatpush.msrb.mxu2 %v3431_v39  ;;  %1500 = vmatpush.msrb.mxu3 %v3432_v18 }
 0x373   :  { %v1092_v37 = vpop.f32.mrf.mxu0  ;;  %v1112_v33 = vpop.f32.mrf.mxu1 }
 0x374   :  { %v1155_v34 = vadd.f32 %v1092_v37, %v3433_v17  ;;  %v1156_v35 = vadd.f32 %v1112_v33, %v3434_v23  ;;  %v3436_v23 = vld [vmem:[#allocation48_spill] sm:$0xff] }
 0x376   :  { %v1850_v25 = vmul.f32 -1.442695, %v1155_v34  ;;  %v1851_v19 = vmul.f32 -1.442695, %v1156_v35 }
 0x378   :  { %1929 = vpow2.f32 %v1850_v25 }
 0x379   :  { %1931 = vpow2.f32 %v1851_v19 }
 0x37a   :  { %v1152_v26 = vpop.f32.mrf.mxu3  ;;  %v1132_v18 = vpop.f32.mrf.mxu2 }
 0x37b   :  { %v1158_v22 = vadd.f32 %v1152_v26, %v3435_v36  ;;  %v1157_v33 = vadd.f32 %v1132_v18, %v3436_v23 }
 0x37d   :  { %v1852_v24 = vmul.f32 -1.442695, %v1158_v22 }
 0x37e   :  { %v1930_v28 = vpop.eup %1929 }
 0x37f   :  { %v1932_v38 = vpop.eup %1931  ;;  %v1162_v27 = vadd.f32 1.0, %v1930_v28  ;;  %1933 = vpow2.f32 %v1852_v24 }
 0x380   :  { %v1181_v39 = vadd.f32 1.0, %v1932_v38 }
 0x381   :  { %1935 = vrcp.f32 %v1162_v27  ;;  %v1174_v22 = vand.u32 2147483648, %v1162_v27  ;;  %v1172_v24 = vand.u32 2147483647, %v1162_v27  ;;  %vm1168_vm3 = vweird.f32 %v1162_v27 }
 0x382   :  { %1937 = vrcp.f32 %v1181_v39  ;;  %v1193_v36 = vand.u32 2147483648, %v1181_v39  ;;  %v1191_v21 = vand.u32 2147483647, %v1181_v39  ;;  %vm1187_vm4 = vweird.f32 %v1181_v39 }
 0x383   :  { %v1175_v18 = vor.u32 1.1754944e-38, %v1174_v22  ;;  %vm1173_vm7 = vcmp.eq.f32.partialorder %v1172_v24, 8.507059e+37 }
 0x384   :  { %vm1192_vm8 = vcmp.eq.f32.partialorder %v1191_v21, 8.507059e+37 }
 0x385   :  { %v1934_v47 = vpop.eup %1933 }
 0x386   :  { %v1201_v17 = vadd.f32 1.0, %v1934_v47 }
 0x387   :  { %v1936_v37 = vpop.eup %1935 }
 0x388   :  { %v1938_v34 = vpop.eup %1937  ;;  %v1164_v25 = vmul.f32 %v1936_v37, %v1162_v27  ;;  %1939 = vrcp.f32 %v1201_v17  ;;  %vm1169_vm1 = vweird.f32 %v1936_v37  ;;  %v1213_v22 = vand.u32 2147483648, %v1201_v17 }
 0x389   :  { %v1183_v35 = vmul.f32 %v1938_v34, %v1181_v39  ;;  %1941 = vtanh.f32 %v1157_v33  ;;  %vm1188_vm2 = vweird.f32 %v1938_v34  ;;  %vm1170_vm5 = vmor %vm1168_vm3, %vm1169_vm1  ;;  %vm1207_vm10 = vweird.f32 %v1201_v17 }
 0x38a   :  { %v1165_v19 = vsub.f32 1.0, %v1164_v25  ;;  %vm1189_vm6 = vmor %vm1187_vm4, %vm1188_vm2  ;;  %v1194_v25 = vor.u32 1.1754944e-38, %v1193_v36  ;;  %v1214_v24 = vor.u32 1.1754944e-38, %v1213_v22 }
 0x38b   :  { %v1184_v26 = vsub.f32 1.0, %v1183_v35 }
 0x38c   :  { %v1166_v28 = vmul.f32 %v1936_v37, %v1165_v19 }
 0x38d   :  { %v1185_v38 = vmul.f32 %v1938_v34, %v1184_v26 }
 0x38e   :  { %v1940_v20 = vpop.eup %1939  ;;  %v1167_v47 = vadd.f32 %v1936_v37, %v1166_v28 }
 0x38f   :  { %v1186_v23 = vadd.f32 %v1938_v34, %v1185_v38  ;;  %v1203_v31 = vmul.f32 %v1940_v20, %v1201_v17  ;;  %v1942_v33 = vpop.eup %1941  ;;  %vm1208_vm9 = vweird.f32 %v1940_v20 }
 0x390   :  { %v1171_v35 = vsel %vm1170_vm5, %v1936_v37, %v1167_v47  ;;  %v1211_v37 = vand.u32 2147483647, %v1201_v17  ;;  %vm1209_vm11 = vmor %vm1207_vm10, %vm1208_vm9 }
 0x391   :  { %v1176_v13 = vsel %vm1173_vm7, %v1175_v18, %v1171_v35  ;;  %v1190_v19 = vsel %vm1189_vm6, %v1938_v34, %v1186_v23  ;;  %v1204_v30 = vsub.f32 1.0, %v1203_v31 }
 0x392   :  { %v1195_v26 = vsel %vm1192_vm8, %v1194_v25, %v1190_v19  ;;  %v1218_v40 = vmul.f32 %v1942_v33, %v1176_v13  ;;  %vm1212_vm12 = vcmp.eq.f32.partialorder %v1211_v37, 8.507059e+37 }
 0x393   :  { %v1217_v44 = vmul.f32 %v1195_v26, %v2983_v32  ;;  %v1205_v28 = vmul.f32 %v1940_v20, %v1204_v30  ;;  %v3466_v26 = vld [vmem:[#allocation52_spill] sm:$0xff] }
 0x395   :  { %v3055_v27 = vadd.f32 %v1218_v40, %v1217_v44  ;;  %v1206_v39 = vadd.f32 %v1940_v20, %v1205_v28 }
 0x397   :  { %1943 = vtanh.f32 %v3055_v27  ;;  %v1210_v36 = vsel %vm1209_vm11, %v1940_v20, %v1206_v39 }
 0x398   :  { %v1215_v31 = vsel %vm1212_vm12, %v1214_v24, %v1210_v36 }
 0x39d   :  { %v1944_v21 = vpop.eup %1943 }
 0x39e   :  { %v1221_v34 = vmul.f32 %v1944_v21, %v1215_v31 }
 0x3a0   :  { %v1223_v13 = vrot.slane %v1221_v34, 1  ;;  %v1224_v38 = vrot.slane %v1221_v34, 2  ;;  %v1225_v32 = vrot.slane %v1221_v34, 3  ;;  %1237 = vst [vmem:[#allocation3 + $0x4] sm:$0x1] %v1221_v34  ;;  %1266 = vmatmul.f32.vlgmr.msra.gmra.mxu0 %v1221_v34  ;;  %1286 = vmatmul.f32.vlgmr.msra.gmra.mxu1 %v1221_v34  ;;  %v1226_v44 = vrot.slane %v1221_v34, 4 }
 0x3a1   :  { %1306 = vmatmul.f32.vlgmr.msra.gmra.mxu2 %v1221_v34  ;;  %1326 = vmatmul.f32.vlgmr.msra.gmra.mxu3 %v1221_v34  ;;  %v1227_v40 = vrot.slane %v1221_v34, 5  ;;  %v1228_v30 = vrot.slane %v1221_v34, 6  ;;  %v1229_v20 = vrot.slane %v1221_v34, 7 }
 0x3a2   :  { %1238 = vst [vmem:[#allocation3 + $0xc] sm:$0x1] %v1223_v13  ;;  %1600 = vmatpush.msra.mxu0 %v2714_v41  ;;  %1620 = vmatpush.msra.mxu1 %v2717_v43  ;;  %v3437_v41 = vld [vmem:[#allocation9_spill] sm:$0xff]  ;;  %v3438_v43 = vld [vmem:[#allocation10_spill] sm:$0xff] }
 0x3a3   :  { %1239 = vst [vmem:[#allocation3 + $0x14] sm:$0x1] %v1224_v38  ;;  %1640 = vmatpush.msra.mxu2 %v2720_v45  ;;  %1660 = vmatpush.msra.mxu3 %v2723_v46  ;;  %v3439_v45 = vld [vmem:[#allocation11_spill] sm:$0xff]  ;;  %v3440_v46 = vld [vmem:[#allocation13_spill] sm:$0xff] }
 0x3a4   :  { %1240 = vst [vmem:[#allocation3 + $0x1c] sm:$0x1] %v1225_v32  ;;  %1601 = vmatpush.msra.mxu0 %v2726_v48  ;;  %1621 = vmatpush.msra.mxu1 %v2729_v49  ;;  %v3441_v48 = vld [vmem:[#allocation12_spill] sm:$0xff]  ;;  %v3442_v49 = vld [vmem:[#allocation14_spill] sm:$0xff] }
 0x3a5   :  { %1241 = vst [vmem:[#allocation3 + $0x24] sm:$0x1] %v1226_v44  ;;  %1641 = vmatpush.msra.mxu2 %v2732_v50  ;;  %1661 = vmatpush.msra.mxu3 %v2735_v51  ;;  %v3443_v50 = vld [vmem:[#allocation15_spill] sm:$0xff]  ;;  %v3444_v51 = vld [vmem:[#allocation17_spill] sm:$0xff] }
 0x3a6   :  { %1242 = vst [vmem:[#allocation3 + $0x2c] sm:$0x1] %v1227_v40  ;;  %1602 = vmatpush.msra.mxu0 %v2738_v52  ;;  %1622 = vmatpush.msra.mxu1 %v2741_v53  ;;  %v3445_v52 = vld [vmem:[#allocation16_spill] sm:$0xff]  ;;  %v3446_v53 = vld [vmem:[#allocation18_spill] sm:$0xff] }
 0x3a7   :  { %1243 = vst [vmem:[#allocation3 + $0x34] sm:$0x1] %v1228_v30  ;;  %1642 = vmatpush.msra.mxu2 %v2744_v54  ;;  %1662 = vmatpush.msra.mxu3 %v2747_v56  ;;  %v3447_v54 = vld [vmem:[#allocation19_spill] sm:$0xff]  ;;  %v3448_v56 = vld [vmem:[#allocation21_spill] sm:$0xff] }
 0x3a8   :  { %1244 = vst [vmem:[#allocation3 + $0x3c] sm:$0x1] %v1229_v20  ;;  %1603 = vmatpush.msra.mxu0 %v2750_v57  ;;  %1623 = vmatpush.msra.mxu1 %v2753_v59  ;;  %v3449_v57 = vld [vmem:[#allocation20_spill] sm:$0xff]  ;;  %v3450_v59 = vld [vmem:[#allocation22_spill] sm:$0xff] }
 0x3a9   :  { %1643 = vmatpush.msra.mxu2 %v2756_v29  ;;  %1663 = vmatpush.msra.mxu3 %v2759_v1  ;;  %v3451_v29 = vld [vmem:[#allocation23_spill] sm:$0xff]  ;;  %v3452_v1 = vld [vmem:[#allocation25_spill] sm:$0xff] }
 0x3aa   :  { %1604 = vmatpush.msra.mxu0 %v2762_v61  ;;  %1624 = vmatpush.msra.mxu1 %v2765_v60  ;;  %v3453_v61 = vld [vmem:[#allocation24_spill] sm:$0xff]  ;;  %v3454_v60 = vld [vmem:[#allocation26_spill] sm:$0xff] }
 0x3ab   :  { %1644 = vmatpush.msra.mxu2 %v2768_v15  ;;  %1664 = vmatpush.msra.mxu3 %v2771_v3  ;;  %v3455_v15 = vld [vmem:[#allocation27_spill] sm:$0xff]  ;;  %v3456_v3 = vld [vmem:[#allocation28_spill] sm:$0xff] }
 0x3ac   :  { %1605 = vmatpush.msra.mxu0 %v2774_v42  ;;  %1625 = vmatpush.msra.mxu1 %v2777_v55  ;;  %v3457_v42 = vld [vmem:[#allocation29_spill] sm:$0xff]  ;;  %v3458_v55 = vld [vmem:[#allocation30_spill] sm:$0xff] }
 0x3ad   :  { %1645 = vmatpush.msra.mxu2 %v2780_v5  ;;  %1665 = vmatpush.msra.mxu3 %v2783_v0  ;;  %v3459_v5 = vld [vmem:[#allocation31_spill] sm:$0xff]  ;;  %v3460_v0 = vld [vmem:[#allocation32_spill] sm:$0xff] }
 0x3ae   :  { %1606 = vmatpush.msra.mxu0 %v2786_v12  ;;  %1626 = vmatpush.msra.mxu1 %v2789_v6  ;;  %v3461_v12 = vld [vmem:[#allocation33_spill] sm:$0xff]  ;;  %v3462_v6 = vld [vmem:[#allocation34_spill] sm:$0xff] }
 0x3af   :  { %1646 = vmatpush.msra.mxu2 %v2792_v8  ;;  %1666 = vmatpush.msra.mxu3 %v2795_v10 }
 0x3b0   :  { %1607 = vmatpush.msra.mxu0 %v2798_v11  ;;  %1627 = vmatpush.msra.mxu1 %v2801_v14  ;;  %v3463_v11 = vld [vmem:[#allocation50_spill] sm:$0xff] }
 0x3b1   :  { %1647 = vmatpush.msra.mxu2 %v2804_v9  ;;  %1667 = vmatpush.msra.mxu3 %v2807_v4  ;;  %v3464_v9 = vld [vmem:[#allocation51_spill] sm:$0xff] }
 0x3b2   :  { %1608 = vmatpush.msra.mxu0 %v2810_v2  ;;  %1628 = vmatpush.msra.mxu1 %v2813_v16 }
 0x3b3   :  { %1648 = vmatpush.msra.mxu2 %v2816_v63  ;;  %1668 = vmatpush.msra.mxu3 %v2819_v7  ;;  %v3465_v7 = vld [vmem:[#allocation53_spill] sm:$0xff] }
 0x3b4   :  { %1609 = vmatpush.msra.mxu0 %v2822_v62  ;;  %1629 = vmatpush.msra.mxu1 %v2825_v58 }
 0x3b5   :  { %1649 = vmatpush.msra.mxu2 %v3437_v41  ;;  %1669 = vmatpush.msra.mxu3 %v3438_v43 }
 0x3b6   :  { %1610 = vmatpush.msra.mxu0 %v3439_v45  ;;  %1630 = vmatpush.msra.mxu1 %v3440_v46 }
 0x3b7   :  { %1650 = vmatpush.msra.mxu2 %v3441_v48  ;;  %1670 = vmatpush.msra.mxu3 %v3442_v49 }
 0x3b8   :  { %1611 = vmatpush.msra.mxu0 %v3443_v50  ;;  %1631 = vmatpush.msra.mxu1 %v3444_v51 }
 0x3b9   :  { %1651 = vmatpush.msra.mxu2 %v3445_v52  ;;  %1671 = vmatpush.msra.mxu3 %v3446_v53 }
 0x3ba   :  { %1612 = vmatpush.msra.mxu0 %v3447_v54  ;;  %1632 = vmatpush.msra.mxu1 %v3448_v56 }
 0x3bb   :  { %1652 = vmatpush.msra.mxu2 %v3449_v57  ;;  %1672 = vmatpush.msra.mxu3 %v3450_v59 }
 0x3bc   :  { %1613 = vmatpush.msra.mxu0 %v3451_v29  ;;  %1633 = vmatpush.msra.mxu1 %v3452_v1 }
 0x3bd   :  { %1653 = vmatpush.msra.mxu2 %v3453_v61  ;;  %1673 = vmatpush.msra.mxu3 %v3454_v60 }
 0x3be   :  { %1614 = vmatpush.msra.mxu0 %v3455_v15  ;;  %1634 = vmatpush.msra.mxu1 %v3456_v3 }
 0x3bf   :  { %1654 = vmatpush.msra.mxu2 %v3457_v42  ;;  %1674 = vmatpush.msra.mxu3 %v3458_v55 }
 0x3c0   :  { %1615 = vmatpush.msra.mxu0 %v3459_v5  ;;  %1635 = vmatpush.msra.mxu1 %v3460_v0 }
 0x3c1   :  { %1655 = vmatpush.msra.mxu2 %v3461_v12  ;;  %1675 = vmatpush.msra.mxu3 %v3462_v6 }
 0x41d   :  { %v1267_v8 = vpop.f32.mrf.mxu0  ;;  %v1287_v10 = vpop.f32.mrf.mxu1 }
 0x41e   :  { %v1330_v14 = vadd.f32 %v1267_v8, %v3463_v11  ;;  %v1331_v4 = vadd.f32 %v1287_v10, %v3464_v9  ;;  %v3467_v11 = vld [vmem:[#allocation54_spill] sm:$0xff]  ;;  %v3468_v9 = vld [vmem:[#allocation55_spill] sm:$0xff] }
 0x420   :  { %v1853_v2 = vmul.f32 -1.442695, %v1330_v14  ;;  %v1854_v16 = vmul.f32 -1.442695, %v1331_v4 }
 0x422   :  { %1945 = vpow2.f32 %v1853_v2 }
 0x423   :  { %1947 = vpow2.f32 %v1854_v16 }
 0x424   :  { %v1327_v63 = vpop.f32.mrf.mxu3  ;;  %v1307_v25 = vpop.f32.mrf.mxu2 }
 0x425   :  { %v1333_v62 = vadd.f32 %v1327_v63, %v3465_v7  ;;  %v1332_v28 = vadd.f32 %v1307_v25, %v3466_v26  ;;  %v3469_v7 = vld [vmem:[#allocation57_spill] sm:$0xff]  ;;  %v3470_v26 = vld [vmem:[#allocation56_spill] sm:$0xff] }
 0x427   :  { %v1855_v58 = vmul.f32 -1.442695, %v1333_v62 }
 0x428   :  { %v1946_v17 = vpop.eup %1945 }
 0x429   :  { %v1948_v47 = vpop.eup %1947  ;;  %v1337_v18 = vadd.f32 1.0, %v1946_v17  ;;  %1949 = vpow2.f32 %v1855_v58 }
 0x42a   :  { %v1356_v23 = vadd.f32 1.0, %v1948_v47 }
 0x42b   :  { %1951 = vrcp.f32 %v1337_v18  ;;  %v1349_v21 = vand.u32 2147483648, %v1337_v18  ;;  %v1347_v13 = vand.u32 2147483647, %v1337_v18  ;;  %vm1343_vm15 = vweird.f32 %v1337_v18 }
 0x42c   :  { %1953 = vrcp.f32 %v1356_v23  ;;  %v1368_v31 = vand.u32 2147483648, %v1356_v23  ;;  %v1366_v32 = vand.u32 2147483647, %v1356_v23  ;;  %vm1362_vm0 = vweird.f32 %v1356_v23 }
 0x42d   :  { %v1350_v30 = vor.u32 1.1754944e-38, %v1349_v21  ;;  %vm1348_vm3 = vcmp.eq.f32.partialorder %v1347_v13, 8.507059e+37 }
 0x42e   :  { %v1369_v43 = vor.u32 1.1754944e-38, %v1368_v31  ;;  %vm1367_vm4 = vcmp.eq.f32.partialorder %v1366_v32, 8.507059e+37 }
 0x42f   :  { %v1950_v35 = vpop.eup %1949 }
 0x430   :  { %v1376_v33 = vadd.f32 1.0, %v1950_v35 }
 0x431   :  { %v1952_v19 = vpop.eup %1951 }
 0x432   :  { %v1954_v39 = vpop.eup %1953  ;;  %v1339_v22 = vmul.f32 %v1952_v19, %v1337_v18  ;;  %1955 = vrcp.f32 %v1376_v33  ;;  %vm1344_vm13 = vweird.f32 %v1952_v19  ;;  %v1388_v59 = vand.u32 2147483648, %v1376_v33 }
 0x433   :  { %v1358_v37 = vmul.f32 %v1954_v39, %v1356_v23  ;;  %1957 = vtanh.f32 %v1332_v28  ;;  %vm1363_vm14 = vweird.f32 %v1954_v39  ;;  %vm1345_vm1 = vmor %vm1343_vm15, %vm1344_vm13  ;;  %vm1382_vm6 = vweird.f32 %v1376_v33 }
 0x434   :  { %v1340_v36 = vsub.f32 1.0, %v1339_v22  ;;  %vm1364_vm2 = vmor %vm1362_vm0, %vm1363_vm14  ;;  %v1386_v29 = vand.u32 2147483647, %v1376_v33  ;;  %v1389_v61 = vor.u32 1.1754944e-38, %v1388_v59 }
 0x435   :  { %v1359_v24 = vsub.f32 1.0, %v1358_v37 }
 0x436   :  { %v1341_v34 = vmul.f32 %v1952_v19, %v1340_v36  ;;  %vm1387_vm8 = vcmp.eq.f32.partialorder %v1386_v29, 8.507059e+37 }
 0x437   :  { %v1360_v38 = vmul.f32 %v1954_v39, %v1359_v24 }
 0x438   :  { %v1956_v44 = vpop.eup %1955  ;;  %v1342_v40 = vadd.f32 %v1952_v19, %v1341_v34 }
 0x439   :  { %v1361_v20 = vadd.f32 %v1954_v39, %v1360_v38  ;;  %v1378_v41 = vmul.f32 %v1956_v44, %v1376_v33  ;;  %v1958_v46 = vpop.eup %1957  ;;  %vm1383_vm5 = vweird.f32 %v1956_v44 }
 0x43a   :  { %v1346_v45 = vsel %vm1345_vm1, %v1952_v19, %v1342_v40  ;;  %vm1384_vm7 = vmor %vm1382_vm6, %vm1383_vm5 }
 0x43b   :  { %v1351_v48 = vsel %vm1348_vm3, %v1350_v30, %v1346_v45  ;;  %v1365_v49 = vsel %vm1364_vm2, %v1954_v39, %v1361_v20  ;;  %v1379_v50 = vsub.f32 1.0, %v1378_v41 }
 0x43c   :  { %v1370_v51 = vsel %vm1367_vm4, %v1369_v43, %v1365_v49  ;;  %v1393_v52 = vmul.f32 %v1958_v46, %v1351_v48 }
 0x43d   :  { %v1392_v53 = vmul.f32 %v1370_v51, %v3055_v27  ;;  %v1380_v54 = vmul.f32 %v1956_v44, %v1379_v50 }
 0x43f   :  { %v3127_v56 = vadd.f32 %v1393_v52, %v1392_v53  ;;  %v1381_v57 = vadd.f32 %v1956_v44, %v1380_v54 }
 0x441   :  { %1959 = vtanh.f32 %v3127_v56  ;;  %v1385_v1 = vsel %vm1384_vm7, %v1956_v44, %v1381_v57 }
 0x442   :  { %v1390_v15 = vsel %vm1387_vm8, %v1389_v61, %v1385_v1 }
 0x447   :  { %v1960_v60 = vpop.eup %1959 }
 0x448   :  { %v1396_v3 = vmul.f32 %v1960_v60, %v1390_v15 }
 0x44a   :  { %v1398_v42 = vrot.slane %v1396_v3, 1  ;;  %v1399_v55 = vrot.slane %v1396_v3, 2  ;;  %v1400_v27 = vrot.slane %v1396_v3, 3  ;;  %1412 = vst [vmem:[#allocation3 + $0x5] sm:$0x1] %v1396_v3  ;;  %1441 = vmatmul.f32.vlgmr.msrb.gmra.mxu0 %v1396_v3  ;;  %1461 = vmatmul.f32.vlgmr.msrb.gmra.mxu1 %v1396_v3  ;;  %v1401_v5 = vrot.slane %v1396_v3, 4 }
 0x44b   :  { %1481 = vmatmul.f32.vlgmr.msrb.gmra.mxu2 %v1396_v3  ;;  %1501 = vmatmul.f32.vlgmr.msrb.gmra.mxu3 %v1396_v3  ;;  %v1402_v0 = vrot.slane %v1396_v3, 5  ;;  %v1403_v12 = vrot.slane %v1396_v3, 6  ;;  %v1404_v6 = vrot.slane %v1396_v3, 7 }
 0x44c   :  { %1413 = vst [vmem:[#allocation3 + $0xd] sm:$0x1] %v1398_v42 }
 0x44d   :  { %1414 = vst [vmem:[#allocation3 + $0x15] sm:$0x1] %v1399_v55 }
 0x44e   :  { %1415 = vst [vmem:[#allocation3 + $0x1d] sm:$0x1] %v1400_v27 }
 0x44f   :  { %1416 = vst [vmem:[#allocation3 + $0x25] sm:$0x1] %v1401_v5 }
 0x450   :  { %1417 = vst [vmem:[#allocation3 + $0x2d] sm:$0x1] %v1402_v0 }
 0x451   :  { %1418 = vst [vmem:[#allocation3 + $0x35] sm:$0x1] %v1403_v12 }
 0x452   :  { %1419 = vst [vmem:[#allocation3 + $0x3d] sm:$0x1] %v1404_v6 }
 0x4c7   :  { %v1442_v8 = vpop.f32.mrf.mxu0  ;;  %v1462_v10 = vpop.f32.mrf.mxu1 }
 0x4c8   :  { %v1505_v14 = vadd.f32 %v1442_v8, %v3467_v11  ;;  %v1506_v4 = vadd.f32 %v1462_v10, %v3468_v9  ;;  %v3471_v11 = vld [vmem:[#allocation58_spill] sm:$0xff]  ;;  %v3472_v9 = vld [vmem:[#allocation59_spill] sm:$0xff] }
 0x4ca   :  { %v1856_v2 = vmul.f32 -1.442695, %v1505_v14  ;;  %v1857_v16 = vmul.f32 -1.442695, %v1506_v4 }
 0x4cc   :  { %1961 = vpow2.f32 %v1856_v2 }
 0x4cd   :  { %1963 = vpow2.f32 %v1857_v16 }
 0x4ce   :  { %v1502_v63 = vpop.f32.mrf.mxu3  ;;  %v1482_v25 = vpop.f32.mrf.mxu2 }
 0x4cf   :  { %v1508_v62 = vadd.f32 %v1502_v63, %v3469_v7  ;;  %v1507_v28 = vadd.f32 %v1482_v25, %v3470_v26  ;;  %v3473_v7 = vld [vmem:[#allocation61_spill] sm:$0xff]  ;;  %v3474_v26 = vld [vmem:[#allocation60_spill] sm:$0xff] }
 0x4d1   :  { %v1858_v58 = vmul.f32 -1.442695, %v1508_v62 }
 0x4d2   :  { %v1962_v17 = vpop.eup %1961 }
 0x4d3   :  { %v1964_v47 = vpop.eup %1963  ;;  %v1512_v18 = vadd.f32 1.0, %v1962_v17  ;;  %1965 = vpow2.f32 %v1858_v58 }
 0x4d4   :  { %v1531_v23 = vadd.f32 1.0, %v1964_v47 }
 0x4d5   :  { %1967 = vrcp.f32 %v1512_v18  ;;  %v1524_v21 = vand.u32 2147483648, %v1512_v18  ;;  %v1522_v13 = vand.u32 2147483647, %v1512_v18  ;;  %vm1518_vm11 = vweird.f32 %v1512_v18 }
 0x4d6   :  { %1969 = vrcp.f32 %v1531_v23  ;;  %v1543_v31 = vand.u32 2147483648, %v1531_v23  ;;  %v1541_v32 = vand.u32 2147483647, %v1531_v23  ;;  %vm1537_vm12 = vweird.f32 %v1531_v23 }
 0x4d7   :  { %v1525_v30 = vor.u32 1.1754944e-38, %v1524_v21  ;;  %vm1523_vm15 = vcmp.eq.f32.partialorder %v1522_v13, 8.507059e+37 }
 0x4d8   :  { %v1544_v43 = vor.u32 1.1754944e-38, %v1543_v31  ;;  %vm1542_vm0 = vcmp.eq.f32.partialorder %v1541_v32, 8.507059e+37 }
 0x4d9   :  { %v1966_v35 = vpop.eup %1965 }
 0x4da   :  { %v1551_v33 = vadd.f32 1.0, %v1966_v35 }
 0x4db   :  { %v1968_v19 = vpop.eup %1967 }
 0x4dc   :  { %v1970_v39 = vpop.eup %1969  ;;  %v1514_v22 = vmul.f32 %v1968_v19, %v1512_v18  ;;  %1971 = vrcp.f32 %v1551_v33  ;;  %vm1519_vm9 = vweird.f32 %v1968_v19  ;;  %v1563_v29 = vand.u32 2147483648, %v1551_v33 }
 0x4dd   :  { %v1533_v37 = vmul.f32 %v1970_v39, %v1531_v23  ;;  %1973 = vtanh.f32 %v1507_v28  ;;  %vm1538_vm10 = vweird.f32 %v1970_v39  ;;  %vm1520_vm13 = vmor %vm1518_vm11, %vm1519_vm9  ;;  %vm1557_vm2 = vweird.f32 %v1551_v33 }
 0x4de   :  { %v1515_v36 = vsub.f32 1.0, %v1514_v22  ;;  %vm1539_vm14 = vmor %vm1537_vm12, %vm1538_vm10  ;;  %v1561_v1 = vand.u32 2147483647, %v1551_v33  ;;  %v1564_v60 = vor.u32 1.1754944e-38, %v1563_v29 }
 0x4df   :  { %v1534_v24 = vsub.f32 1.0, %v1533_v37 }
 0x4e0   :  { %v1516_v34 = vmul.f32 %v1968_v19, %v1515_v36  ;;  %vm1562_vm4 = vcmp.eq.f32.partialorder %v1561_v1, 8.507059e+37 }
 0x4e1   :  { %v1535_v38 = vmul.f32 %v1970_v39, %v1534_v24 }
 0x4e2   :  { %v1972_v44 = vpop.eup %1971  ;;  %v1517_v40 = vadd.f32 %v1968_v19, %v1516_v34 }
 0x4e3   :  { %v1536_v20 = vadd.f32 %v1970_v39, %v1535_v38  ;;  %v1553_v41 = vmul.f32 %v1972_v44, %v1551_v33  ;;  %v1974_v46 = vpop.eup %1973  ;;  %vm1558_vm1 = vweird.f32 %v1972_v44 }
 0x4e4   :  { %v1521_v45 = vsel %vm1520_vm13, %v1968_v19, %v1517_v40  ;;  %vm1559_vm3 = vmor %vm1557_vm2, %vm1558_vm1 }
 0x4e5   :  { %v1526_v48 = vsel %vm1523_vm15, %v1525_v30, %v1521_v45  ;;  %v1540_v49 = vsel %vm1539_vm14, %v1970_v39, %v1536_v20  ;;  %v1554_v50 = vsub.f32 1.0, %v1553_v41 }
 0x4e6   :  { %v1545_v51 = vsel %vm1542_vm0, %v1544_v43, %v1540_v49  ;;  %v1568_v52 = vmul.f32 %v1974_v46, %v1526_v48 }
 0x4e7   :  { %v1567_v53 = vmul.f32 %v1545_v51, %v3127_v56  ;;  %v1555_v54 = vmul.f32 %v1972_v44, %v1554_v50 }
 0x4e9   :  { %v3135_v57 = vadd.f32 %v1568_v52, %v1567_v53  ;;  %v1556_v59 = vadd.f32 %v1972_v44, %v1555_v54 }
 0x4eb   :  { %1975 = vtanh.f32 %v3135_v57  ;;  %v1560_v61 = vsel %vm1559_vm3, %v1972_v44, %v1556_v59 }
 0x4ec   :  { %v1565_v3 = vsel %vm1562_vm4, %v1564_v60, %v1560_v61 }
 0x4f1   :  { %v1976_v15 = vpop.eup %1975 }
 0x4f2   :  { %v1571_v42 = vmul.f32 %v1976_v15, %v1565_v3 }
 0x4f4   :  { %v1573_v55 = vrot.slane %v1571_v42, 1  ;;  %v1574_v27 = vrot.slane %v1571_v42, 2  ;;  %v1575_v56 = vrot.slane %v1571_v42, 3  ;;  %1587 = vst [vmem:[#allocation3 + $0x6] sm:$0x1] %v1571_v42  ;;  %1616 = vmatmul.f32.vlgmr.msra.gmra.mxu0 %v1571_v42  ;;  %1636 = vmatmul.f32.vlgmr.msra.gmra.mxu1 %v1571_v42  ;;  %v1576_v5 = vrot.slane %v1571_v42, 4 }
 0x4f5   :  { %1656 = vmatmul.f32.vlgmr.msra.gmra.mxu2 %v1571_v42  ;;  %1676 = vmatmul.f32.vlgmr.msra.gmra.mxu3 %v1571_v42  ;;  %v1577_v0 = vrot.slane %v1571_v42, 5  ;;  %v1578_v12 = vrot.slane %v1571_v42, 6  ;;  %v1579_v6 = vrot.slane %v1571_v42, 7 }
 0x4f6   :  { %1588 = vst [vmem:[#allocation3 + $0xe] sm:$0x1] %v1573_v55 }
 0x4f7   :  { %1589 = vst [vmem:[#allocation3 + $0x16] sm:$0x1] %v1574_v27 }
 0x4f8   :  { %1590 = vst [vmem:[#allocation3 + $0x1e] sm:$0x1] %v1575_v56 }
 0x4f9   :  { %1591 = vst [vmem:[#allocation3 + $0x26] sm:$0x1] %v1576_v5 }
 0x4fa   :  { %1592 = vst [vmem:[#allocation3 + $0x2e] sm:$0x1] %v1577_v0 }
 0x4fb   :  { %1593 = vst [vmem:[#allocation3 + $0x36] sm:$0x1] %v1578_v12 }
 0x4fc   :  { %1594 = vst [vmem:[#allocation3 + $0x3e] sm:$0x1] %v1579_v6 }
 0x571   :  { %v1617_v8 = vpop.f32.mrf.mxu0  ;;  %v1637_v10 = vpop.f32.mrf.mxu1 }
 0x572   :  { %v1680_v14 = vadd.f32 %v1617_v8, %v3471_v11  ;;  %v1681_v4 = vadd.f32 %v1637_v10, %v3472_v9 }
 0x574   :  { %v1859_v2 = vmul.f32 -1.442695, %v1680_v14  ;;  %v1860_v16 = vmul.f32 -1.442695, %v1681_v4 }
 0x576   :  { %1977 = vpow2.f32 %v1859_v2 }
 0x577   :  { %1979 = vpow2.f32 %v1860_v16 }
 0x578   :  { %v1677_v63 = vpop.f32.mrf.mxu3  ;;  %v1657_v25 = vpop.f32.mrf.mxu2 }
 0x579   :  { %v1683_v62 = vadd.f32 %v1677_v63, %v3473_v7  ;;  %v1682_v28 = vadd.f32 %v1657_v25, %v3474_v26 }
 0x57b   :  { %v1861_v58 = vmul.f32 -1.442695, %v1683_v62 }
 0x57c   :  { %v1978_v17 = vpop.eup %1977 }
 0x57d   :  { %v1980_v47 = vpop.eup %1979  ;;  %v1687_v18 = vadd.f32 1.0, %v1978_v17  ;;  %1981 = vpow2.f32 %v1861_v58 }
 0x57e   :  { %v1706_v23 = vadd.f32 1.0, %v1980_v47 }
 0x57f   :  { %1983 = vrcp.f32 %v1687_v18  ;;  %v1699_v21 = vand.u32 2147483648, %v1687_v18  ;;  %v1697_v13 = vand.u32 2147483647, %v1687_v18  ;;  %vm1693_vm7 = vweird.f32 %v1687_v18 }
 0x580   :  { %1985 = vrcp.f32 %v1706_v23  ;;  %v1718_v31 = vand.u32 2147483648, %v1706_v23  ;;  %v1716_v32 = vand.u32 2147483647, %v1706_v23  ;;  %vm1712_vm8 = vweird.f32 %v1706_v23 }
 0x581   :  { %v1700_v30 = vor.u32 1.1754944e-38, %v1699_v21  ;;  %vm1698_vm11 = vcmp.eq.f32.partialorder %v1697_v13, 8.507059e+37 }
 0x582   :  { %v1719_v43 = vor.u32 1.1754944e-38, %v1718_v31  ;;  %vm1717_vm12 = vcmp.eq.f32.partialorder %v1716_v32, 8.507059e+37 }
 0x583   :  { %v1982_v35 = vpop.eup %1981 }
 0x584   :  { %v1726_v33 = vadd.f32 1.0, %v1982_v35 }
 0x585   :  { %v1984_v19 = vpop.eup %1983 }
 0x586   :  { %v1986_v39 = vpop.eup %1985  ;;  %v1689_v22 = vmul.f32 %v1984_v19, %v1687_v18  ;;  %1987 = vrcp.f32 %v1726_v33  ;;  %vm1694_vm5 = vweird.f32 %v1984_v19  ;;  %v1738_v1 = vand.u32 2147483648, %v1726_v33 }
 0x587   :  { %v1708_v37 = vmul.f32 %v1986_v39, %v1706_v23  ;;  %1989 = vtanh.f32 %v1682_v28  ;;  %vm1713_vm6 = vweird.f32 %v1986_v39  ;;  %vm1695_vm9 = vmor %vm1693_vm7, %vm1694_vm5  ;;  %vm1732_vm14 = vweird.f32 %v1726_v33 }
 0x588   :  { %v1690_v36 = vsub.f32 1.0, %v1689_v22  ;;  %vm1714_vm10 = vmor %vm1712_vm8, %vm1713_vm6  ;;  %v1736_v61 = vand.u32 2147483647, %v1726_v33  ;;  %v1739_v15 = vor.u32 1.1754944e-38, %v1738_v1 }
 0x589   :  { %v1709_v24 = vsub.f32 1.0, %v1708_v37 }
 0x58a   :  { %v1691_v34 = vmul.f32 %v1984_v19, %v1690_v36  ;;  %vm1737_vm0 = vcmp.eq.f32.partialorder %v1736_v61, 8.507059e+37 }
 0x58b   :  { %v1710_v38 = vmul.f32 %v1986_v39, %v1709_v24 }
 0x58c   :  { %v1988_v44 = vpop.eup %1987  ;;  %v1692_v40 = vadd.f32 %v1984_v19, %v1691_v34 }
 0x58d   :  { %v1711_v20 = vadd.f32 %v1986_v39, %v1710_v38  ;;  %v1728_v41 = vmul.f32 %v1988_v44, %v1726_v33  ;;  %v1990_v46 = vpop.eup %1989  ;;  %vm1733_vm13 = vweird.f32 %v1988_v44 }
 0x58e   :  { %v1696_v45 = vsel %vm1695_vm9, %v1984_v19, %v1692_v40  ;;  %vm1734_vm15 = vmor %vm1732_vm14, %vm1733_vm13 }
 0x58f   :  { %v1701_v48 = vsel %vm1698_vm11, %v1700_v30, %v1696_v45  ;;  %v1715_v49 = vsel %vm1714_vm10, %v1986_v39, %v1711_v20  ;;  %v1729_v50 = vsub.f32 1.0, %v1728_v41 }
 0x590   :  { %v1720_v51 = vsel %vm1717_vm12, %v1719_v43, %v1715_v49  ;;  %v1743_v52 = vmul.f32 %v1990_v46, %v1701_v48 }
 0x591   :  { %v1742_v53 = vmul.f32 %v1720_v51, %v3135_v57  ;;  %v1730_v54 = vmul.f32 %v1988_v44, %v1729_v50 }
 0x593   :  { %v1744_v59 = vadd.f32 %v1743_v52, %v1742_v53  ;;  %v1731_v29 = vadd.f32 %v1988_v44, %v1730_v54 }
 0x595   :  { %1991 = vtanh.f32 %v1744_v59  ;;  %1792 = vst [vmem:[%s3181_s8] sm:$0xff] %v1744_v59  ;;  %v1735_v60 = vsel %vm1734_vm15, %v1988_v44, %v1731_v29 }
 0x596   :  { %v1740_v42 = vsel %vm1737_vm0, %v1739_v15, %v1735_v60 }
 0x59b   :  { %v1992_v3 = vpop.eup %1991 }
 0x59c   :  { %v1746_v55 = vmul.f32 %v1992_v3, %v1740_v42 }
 0x59e   :  { %v1748_v57 = vrot.slane %v1746_v55, 1  ;;  %v1749_v27 = vrot.slane %v1746_v55, 2  ;;  %v1750_v56 = vrot.slane %v1746_v55, 3  ;;  %1762 = vst [vmem:[#allocation3 + $0x7] sm:$0x1] %v1746_v55  ;;  %v1751_v5 = vrot.slane %v1746_v55, 4 }
 0x59f   :  { %1791 = vst [vmem:[%s3180_s7] sm:$0xff] %v1746_v55  ;;  %v1752_v0 = vrot.slane %v1746_v55, 5  ;;  %v1753_v12 = vrot.slane %v1746_v55, 6  ;;  %v1754_v6 = vrot.slane %v1746_v55, 7 }
 0x5a0   :  { %1763 = vst [vmem:[#allocation3 + $0xf] sm:$0x1] %v1748_v57 }
 0x5a1   :  { %1764 = vst [vmem:[#allocation3 + $0x17] sm:$0x1] %v1749_v27 }
 0x5a2   :  { %1765 = vst [vmem:[#allocation3 + $0x1f] sm:$0x1] %v1750_v56 }
 0x5a3   :  { %1766 = vst [vmem:[#allocation3 + $0x27] sm:$0x1] %v1751_v5 }
 0x5a4   :  { %1767 = vst [vmem:[#allocation3 + $0x2f] sm:$0x1] %v1752_v0 }
 0x5a5   :  { %1768 = vst [vmem:[#allocation3 + $0x37] sm:$0x1] %v1753_v12  ;;  %v1772_v8 = vld [vmem:[#allocation3] sm:$0xff] }
 0x5a6   :  { %1769 = vst [vmem:[#allocation3 + $0x3f] sm:$0x1] %v1754_v6 }
 0x5a7   :  { %v1773_v10 = vld [vmem:[#allocation3 + $0x8] sm:$0xff]  ;;  %1780 = vst [vmem:[%s3179_s6] sm:$0xff] %v1772_v8 }
 0x5a8   :  { %v1774_v11 = vld [vmem:[#allocation3 + $0x10] sm:$0xff]  ;;  %1781 = vst [vmem:[%s3179_s6 + $0x8] sm:$0xff] %v1773_v10 }
 0x5a9   :  { %v1775_v14 = vld [vmem:[#allocation3 + $0x18] sm:$0xff]  ;;  %1782 = vst [vmem:[%s3179_s6 + $0x10] sm:$0xff] %v1774_v11 }
 0x5aa   :  { %v1776_v9 = vld [vmem:[#allocation3 + $0x20] sm:$0xff]  ;;  %1783 = vst [vmem:[%s3179_s6 + $0x18] sm:$0xff] %v1775_v14 }
 0x5ab   :  { %v1777_v4 = vld [vmem:[#allocation3 + $0x28] sm:$0xff]  ;;  %1784 = vst [vmem:[%s3179_s6 + $0x20] sm:$0xff] %v1776_v9 }
 0x5ac   :  { %v1778_v2 = vld [vmem:[#allocation3 + $0x30] sm:$0xff]  ;;  %1785 = vst [vmem:[%s3179_s6 + $0x28] sm:$0xff] %v1777_v4 }
 0x5ad   :  { %v1779_v16 = vld [vmem:[#allocation3 + $0x38] sm:$0xff]  ;;  %1786 = vst [vmem:[%s3179_s6 + $0x30] sm:$0xff] %v1778_v2 }
 0x5ae   :  { %1787 = vst [vmem:[%s3179_s6 + $0x38] sm:$0xff] %v1779_v16 }
 0x5af   :  { %1805 = vsyncpa [#allocation7], 1 }

</bundles_post_ra>
